<compile_context>
chip_gen: v7x
topology: tpu7x:2x2x1
jax: 0.10.0
libtpu: 0.0.40
codegen_flags: <defaults>
</compile_context>

<pallas_src>
import math
import jax
import jax.numpy as jnp
from jax import lax
from jax.experimental import pallas as pl
from jax.experimental.pallas import tpu as pltpu

# ---------------- config (small shapes consistent with the module) -----------
B = 2            # batch
NPTS = 16        # num_points
C_IN = 4         # x, y, z, rcs
MIN_K = 5
MAX_K = 8        # module default 20 is > num_points at this size; 8 <= N
EMB = 32         # final embedding
DIM = 128        # attention / backbone width (fixed by the module)
HEADS = 4
DH = DIM // HEADS
RCS_EMB = 32     # RCS_attn embedding_dim
BN_EPS = 1e-5

RCS1_PAD = 8     # (MIN_K + 1) padded to a sublane multiple
RCS2_PAD = 16    # (MAX_K + 1) padded to a sublane multiple
OUT_PAD = 128    # lane-dense output slab; valid columns are [:EMB]


def _dot(a, b):
    """a @ b on the MXU with f32 accumulation."""
    return jnp.dot(a, b, preferred_element_type=jnp.float32)


def _dot_t(a, b):
    """a @ b.T on the MXU (contracting-dim spec, no explicit transpose)."""
    return lax.dot_general(a, b, (((1,), (1,)), ((), ())),
                           preferred_element_type=jnp.float32)


# ---------------- the single fused kernel -------------------------------------
def _fused_kernel(x_ref,
                  mw0, mb0, mw1, mb1, mw2, mb2, mw3, mb3, mw4, mb4,
                  dw0, db0, dw1, db1, dw2, db2, dw3, db3, dw4, db4, dw5, db5,
                  ew, eb, wq, wk, wv, wo, rw1, rw2, sg,
                  o_ref):
    f32 = jnp.float32
    x8 = x_ref[0]                                   # (N, 8): [x, y, z, rcs, 0, 0, 0, 0]
    xyz = x8[:, 0:3]
    rcs = x8[:, 3:4]

    # --- pairwise squared distances (top-k order identical on d^2; no NxN sqrt)
    sq = jnp.sum(xyz * xyz, axis=-1, keepdims=True)                     # (N, 1)
    gram = _dot_t(xyz, xyz)                                             # (N, N)
    d2 = jnp.maximum(sq + jnp.transpose(sq) - 2.0 * gram, 0.0)

    # --- in-kernel kNN: iterative argmin -> one-hot selection matrices --------
    # (self-distance 0 stays in, matching the reference's non-inplace masked_fill;
    #  ties broken by lowest column index.)
    col = jax.lax.broadcasted_iota(jnp.int32, (NPTS, NPTS), 1).astype(f32)
    nf = f32(NPTS)
    big = f32(1e30)
    work = d2
    onehots = []
    dvals = []
    for _ in range(MAX_K):
        m = jnp.min(work, axis=-1, keepdims=True)                       # (N, 1)
        sel = jnp.min(jnp.where(work == m, col, nf), axis=-1, keepdims=True)
        oh = (col == sel).astype(f32)                                   # (N, N) one-hot
        onehots.append(oh)
        dvals.append(m)
        work = jnp.where(col == sel, big, work)

    dmax_min = jnp.sqrt(dvals[MIN_K - 1])           # max distance among MIN_K nearest
    dmax_max = jnp.sqrt(dvals[MAX_K - 1])

    # gathered raw point features (xyz | rcs) via one-hot MXU matmuls
    gath = [_dot(onehots[k], x8) for k in range(MAX_K)]
    rcs_cols = [g[:, 3:4] for g in gath]

    def running_max(mats):
        acc = mats[0]
        for mm in mats[1:]:
            acc = jnp.maximum(acc, mm)
        return acc

    def neigh_max(feat, kk_):
        return running_max([_dot(onehots[k], feat) for k in range(kk_)])

    zcol = jnp.zeros((NPTS, 1), f32)

    def edge(feat, nmax, dmax):
        # [fea, max_k(neigh) - fea, max_k(dist)] + one zero pad column so the
        # contraction dim is a sublane multiple (weight rows are padded to match).
        return jnp.concatenate([feat, nmax - feat, dmax, zcol], axis=-1)

    def linear(h, w_ref, b_ref=None, act=None):
        y = _dot(h, w_ref[...])
        if b_ref is not None:
            y = y + b_ref[...]
        if act == 'relu':
            y = jnp.maximum(y, 0.0)
        elif act == 'leaky':
            y = jnp.where(y >= 0.0, y, 0.2 * y)
        return y

    # --- shared point MLP: conv_layers[:-1] + (folded) BN + ReLU --------------
    h = linear(x8, mw0, mb0, 'relu')
    h = linear(h, mw1, mb1, 'relu')
    h = linear(h, mw2, mb2, 'relu')
    feat128 = linear(h, mw3, mb3, 'relu')                               # (N, 128)

    # --- DGCNN edge-conv branches ---------------------------------------------
    nmax_xyz_min = running_max([g[:, 0:3] for g in gath[:MIN_K]])
    nmax_xyz_max = running_max([g[:, 0:3] for g in gath[:MAX_K]])
    g1 = linear(edge(xyz, nmax_xyz_min, dmax_min), dw0, db0, 'leaky')   # (N, 64)
    g2 = linear(edge(xyz, nmax_xyz_max, dmax_max), dw1, db1, 'leaky')
    g1c = jnp.concatenate([g1, xyz], axis=-1)                           # (N, 67)
    g2c = jnp.concatenate([g2, xyz], axis=-1)
    g3 = linear(edge(g1c, neigh_max(g1c, MIN_K), dmax_min), dw2, db2, 'leaky')
    g4 = linear(edge(g2c, neigh_max(g2c, MAX_K), dmax_max), dw3, db3, 'leaky')
    g3c = jnp.concatenate([g3, g1c], axis=-1)                           # (N, 131)
    g4c = jnp.concatenate([g4, g2c], axis=-1)
    g5 = linear(edge(g3c, neigh_max(g3c, MIN_K), dmax_min), dw4, db4, 'leaky')  # (N, 128)
    g6 = linear(edge(g4c, neigh_max(g4c, MAX_K), dmax_max), dw5, db5, 'leaky')

    sgv = sg[...]                                                       # (1, 2)
    sigma = sgv[:, 0:1]                                                 # (1, 1)
    gamma = sgv[:, 1:2]
    x3 = sigma * g5 + (1.0 - sigma) * g6                                # (N, 128)

    def softmax_rows(s):
        s = s - jnp.max(s, axis=-1, keepdims=True)
        p = jnp.exp(s)
        return p * pl.reciprocal(jnp.sum(p, axis=-1, keepdims=True), approx=True)

    # --- multi-head attention (q from point MLP features, kv from x3) ---------
    # TODO(synk): SelfAttention class source not provided; standard bias-free
    # multi-head cross-attention (q from x, k/v from context) assumed.
    q = _dot(feat128, wq[...])
    k_ = _dot(x3, wk[...])
    v_ = _dot(x3, wv[...])
    scale = 1.0 / math.sqrt(DH)
    heads = []
    for hh in range(HEADS):
        lo = hh * DH
        qh = q[:, lo:lo + DH]
        kh = k_[:, lo:lo + DH]
        vh = v_[:, lo:lo + DH]
        p = softmax_rows(_dot_t(qh, kh) * scale)
        heads.append(_dot(p, vh))
    attn = _dot(jnp.concatenate(heads, axis=-1), wo[...])               # (N, 128)

    # --- conv_enhanced + final conv/bn layer ----------------------------------
    x3b = linear(jnp.concatenate([feat128, attn], axis=-1), ew, eb, 'relu')  # (N, 128)
    xfin = linear(x3b, mw4, mb4, None)              # (N, 128); valid columns [:EMB]

    # --- RCS attention ---------------------------------------------------------
    # TODO(synk): RCS_attn class source not provided; cross-attention over the
    # (self|neighbor)-RCS feature vectors assumed.
    x_rcs1 = jnp.concatenate(
        [rcs] + rcs_cols[:MIN_K] + [jnp.zeros((NPTS, RCS1_PAD - (MIN_K + 1)), f32)],
        axis=-1)                                                        # (N, 8)
    x_rcs2 = jnp.concatenate(
        [rcs] + rcs_cols[:MAX_K] + [jnp.zeros((NPTS, RCS2_PAD - (MAX_K + 1)), f32)],
        axis=-1)                                                        # (N, 16)
    e1 = _dot(x_rcs1, rw1[...])                                         # (N, 32)
    e2 = _dot(x_rcs2, rw2[...])
    pr = softmax_rows(_dot_t(e1, e2))
    x_enh = _dot(pr, xfin)                                              # (N, 128)

    o_ref[0] = xfin + gamma * x_enh                                     # lane-dense store


# ---------------- parameter init (deterministic, eval-mode BN folded, padded) --
def _fold_bn(w, b, gamma, beta, eps=BN_EPS):
    # BatchNorm eval with running_mean=0, running_var=1 folded into the linear.
    scale = gamma / jnp.sqrt(1.0 + eps)
    return w * scale[None, :], b * scale + beta


def _pad2d(a, rows=None, cols=None):
    r = a.shape[0] if rows is None else rows
    c = a.shape[1] if cols is None else cols
    return jnp.pad(a, ((0, r - a.shape[0]), (0, c - a.shape[1])))


def init_params(key):
    keys = iter(jax.random.split(key, 64))

    def nrm(shape, s=0.1):
        return s * jax.random.normal(next(keys), shape, jnp.float32)

    def unif(shape):
        return jax.random.uniform(next(keys), shape, dtype=jnp.float32)

    flat = []

    # conv_layers + bn_layers (all 1x1): 4 -> 64 -> 64 -> 64 -> 128, then 128 -> EMB
    chans = [C_IN, 64, 64, 64, DIM, EMB]
    row_pad = [8, 64, 64, 64, DIM]          # Cin of first layer padded 4 -> 8
    col_pad = [64, 64, 64, DIM, OUT_PAD]    # Cout of final layer padded EMB -> 128
    for i in range(5):
        w = nrm((chans[i], chans[i + 1]))
        b = nrm((chans[i + 1],))
        g = 1.0 + nrm((chans[i + 1],))
        beta = nrm((chans[i + 1],))
        wf, bf = _fold_bn(w, b, g, beta)
        flat.append(_pad2d(wf, rows=row_pad[i], cols=col_pad[i]))
        flat.append(_pad2d(bf.reshape(1, -1), cols=col_pad[i]))

    # dgcnn_f_conv blocks: Conv1d(bias=False) + BN1d + LeakyReLU(0.2)
    dg_io = [(7, 64), (7, 64), (135, 64), (135, 64), (263, 128), (263, 128)]
    dg_row_pad = [8, 8, 136, 136, 264, 264]
    for (cin, cout), rp in zip(dg_io, dg_row_pad):
        w = nrm((cin, cout))
        g = 1.0 + nrm((cout,))
        beta = nrm((cout,))
        wf, bf = _fold_bn(w, jnp.zeros((cout,), jnp.float32), g, beta)
        flat.append(_pad2d(wf, rows=rp))
        flat.append(bf.reshape(1, -1))

    # conv_enhanced: Conv1d(256, 128, bias=False) + BN1d
    w = nrm((2 * DIM, DIM))
    g = 1.0 + nrm((DIM,))
    beta = nrm((DIM,))
    wf, bf = _fold_bn(w, jnp.zeros((DIM,), jnp.float32), g, beta)
    flat.append(wf)
    flat.append(bf.reshape(1, -1))

    # SelfAttention projections (bias-free)
    for _ in range(4):
        flat.append(nrm((DIM, DIM)))

    # RCS_attn projections (Cin padded to sublane multiples, zero rows)
    flat.append(_pad2d(nrm((MIN_K + 1, RCS_EMB)), rows=RCS1_PAD))
    flat.append(_pad2d(nrm((MAX_K + 1, RCS_EMB)), rows=RCS2_PAD))

    # sigma, gamma packed as a (1, 2) array
    flat.append(jnp.concatenate([unif((1,)), unif((1,))]).reshape(1, 2))

    return tuple(flat)


# ---------------- forward ------------------------------------------------------
def forward(params, x_nchw):
    xf = x_nchw.astype(jnp.float32)
    Bb, _, Nn, Cc = xf.shape
    # channels-last points, zero-padded to 8 lanes: [x, y, z, rcs, 0, 0, 0, 0]
    x_pts = jnp.pad(xf[:, 0, :, :], ((0, 0), (0, 0), (0, 8 - Cc)))

    in_specs = ([pl.BlockSpec((1, Nn, 8), lambda b: (b, 0, 0))]
                + [pl.BlockSpec(w.shape, lambda b: (0, 0)) for w in params])

    out_pad = pl.pallas_call(
        _fused_kernel,
        out_shape=jax.ShapeDtypeStruct((Bb, Nn, OUT_PAD), jnp.float32),
        grid=(Bb,),
        in_specs=in_specs,
        out_specs=pl.BlockSpec((1, Nn, OUT_PAD), lambda b: (b, 0, 0)),
        compiler_params=pltpu.CompilerParams(
            dimension_semantics=("parallel",)),
    )(x_pts, *params)

    out = out_pad[:, :, :EMB]                                           # (B, N, EMB)
    return jnp.transpose(out, (0, 2, 1))[..., None]                     # (B, EMB, N, 1)


if __name__ == "__main__":
    key = jax.random.PRNGKey(0)
    pkey, xkey = jax.random.split(key)
    params = init_params(pkey)
    x = jax.random.normal(xkey, (B, 1, NPTS, C_IN), jnp.float32)

    fwd = jax.jit(forward)
    out = jax.block_until_ready(fwd(params, x))
    assert out.shape == (B, EMB, NPTS, 1), out.shape
    assert bool(jnp.all(jnp.isfinite(out)))
    print("KERNEL_OK")
</pallas_src>

<mosaic_0001>
module attributes {stable_mosaic.version = 11 : i64} {
  func.func @_fused_kernel(%arg0: i32, %arg1: memref<1x16x8xf32, #tpu.memory_space<vmem>>, %arg2: memref<8x64xf32, #tpu.memory_space<vmem>>, %arg3: memref<1x64xf32, #tpu.memory_space<vmem>>, %arg4: memref<64x64xf32, #tpu.memory_space<vmem>>, %arg5: memref<1x64xf32, #tpu.memory_space<vmem>>, %arg6: memref<64x64xf32, #tpu.memory_space<vmem>>, %arg7: memref<1x64xf32, #tpu.memory_space<vmem>>, %arg8: memref<64x128xf32, #tpu.memory_space<vmem>>, %arg9: memref<1x128xf32, #tpu.memory_space<vmem>>, %arg10: memref<128x128xf32, #tpu.memory_space<vmem>>, %arg11: memref<1x128xf32, #tpu.memory_space<vmem>>, %arg12: memref<8x64xf32, #tpu.memory_space<vmem>>, %arg13: memref<1x64xf32, #tpu.memory_space<vmem>>, %arg14: memref<8x64xf32, #tpu.memory_space<vmem>>, %arg15: memref<1x64xf32, #tpu.memory_space<vmem>>, %arg16: memref<136x64xf32, #tpu.memory_space<vmem>>, %arg17: memref<1x64xf32, #tpu.memory_space<vmem>>, %arg18: memref<136x64xf32, #tpu.memory_space<vmem>>, %arg19: memref<1x64xf32, #tpu.memory_space<vmem>>, %arg20: memref<264x128xf32, #tpu.memory_space<vmem>>, %arg21: memref<1x128xf32, #tpu.memory_space<vmem>>, %arg22: memref<264x128xf32, #tpu.memory_space<vmem>>, %arg23: memref<1x128xf32, #tpu.memory_space<vmem>>, %arg24: memref<256x128xf32, #tpu.memory_space<vmem>>, %arg25: memref<1x128xf32, #tpu.memory_space<vmem>>, %arg26: memref<128x128xf32, #tpu.memory_space<vmem>>, %arg27: memref<128x128xf32, #tpu.memory_space<vmem>>, %arg28: memref<128x128xf32, #tpu.memory_space<vmem>>, %arg29: memref<128x128xf32, #tpu.memory_space<vmem>>, %arg30: memref<8x32xf32, #tpu.memory_space<vmem>>, %arg31: memref<16x32xf32, #tpu.memory_space<vmem>>, %arg32: memref<1x2xf32, #tpu.memory_space<vmem>>, %arg33: memref<1x16x128xf32, #tpu.memory_space<vmem>>) attributes {dimension_semantics = [#tpu.dimension_semantics<parallel>], iteration_bounds = array<i64: 2>, scalar_prefetch = 0 : i64, scratch_operands = 0 : i64, tpu.core_type = #tpu.core_type<tc>, window_params = [{transform_indices = @transform_0, window_bounds = array<i64: 1, 16, 8>}, {pipeline_mode = #tpu.pipeline_mode<synchronous>, transform_indices = @transform_1, window_bounds = array<i64: 8, 64>}, {pipeline_mode = #tpu.pipeline_mode<synchronous>, transform_indices = @transform_2, window_bounds = array<i64: 1, 64>}, {pipeline_mode = #tpu.pipeline_mode<synchronous>, transform_indices = @transform_3, window_bounds = array<i64: 64, 64>}, {pipeline_mode = #tpu.pipeline_mode<synchronous>, transform_indices = @transform_4, window_bounds = array<i64: 1, 64>}, {pipeline_mode = #tpu.pipeline_mode<synchronous>, transform_indices = @transform_5, window_bounds = array<i64: 64, 64>}, {pipeline_mode = #tpu.pipeline_mode<synchronous>, transform_indices = @transform_6, window_bounds = array<i64: 1, 64>}, {pipeline_mode = #tpu.pipeline_mode<synchronous>, transform_indices = @transform_7, window_bounds = array<i64: 64, 128>}, {pipeline_mode = #tpu.pipeline_mode<synchronous>, transform_indices = @transform_8, window_bounds = array<i64: 1, 128>}, {pipeline_mode = #tpu.pipeline_mode<synchronous>, transform_indices = @transform_9, window_bounds = array<i64: 128, 128>}, {pipeline_mode = #tpu.pipeline_mode<synchronous>, transform_indices = @transform_10, window_bounds = array<i64: 1, 128>}, {pipeline_mode = #tpu.pipeline_mode<synchronous>, transform_indices = @transform_11, window_bounds = array<i64: 8, 64>}, {pipeline_mode = #tpu.pipeline_mode<synchronous>, transform_indices = @transform_12, window_bounds = array<i64: 1, 64>}, {pipeline_mode = #tpu.pipeline_mode<synchronous>, transform_indices = @transform_13, window_bounds = array<i64: 8, 64>}, {pipeline_mode = #tpu.pipeline_mode<synchronous>, transform_indices = @transform_14, window_bounds = array<i64: 1, 64>}, {pipeline_mode = #tpu.pipeline_mode<synchronous>, transform_indices = @transform_15, window_bounds = array<i64: 136, 64>}, {pipeline_mode = #tpu.pipeline_mode<synchronous>, transform_indices = @transform_16, window_bounds = array<i64: 1, 64>}, {pipeline_mode = #tpu.pipeline_mode<synchronous>, transform_indices = @transform_17, window_bounds = array<i64: 136, 64>}, {pipeline_mode = #tpu.pipeline_mode<synchronous>, transform_indices = @transform_18, window_bounds = array<i64: 1, 64>}, {pipeline_mode = #tpu.pipeline_mode<synchronous>, transform_indices = @transform_19, window_bounds = array<i64: 264, 128>}, {pipeline_mode = #tpu.pipeline_mode<synchronous>, transform_indices = @transform_20, window_bounds = array<i64: 1, 128>}, {pipeline_mode = #tpu.pipeline_mode<synchronous>, transform_indices = @transform_21, window_bounds = array<i64: 264, 128>}, {pipeline_mode = #tpu.pipeline_mode<synchronous>, transform_indices = @transform_22, window_bounds = array<i64: 1, 128>}, {pipeline_mode = #tpu.pipeline_mode<synchronous>, transform_indices = @transform_23, window_bounds = array<i64: 256, 128>}, {pipeline_mode = #tpu.pipeline_mode<synchronous>, transform_indices = @transform_24, window_bounds = array<i64: 1, 128>}, {pipeline_mode = #tpu.pipeline_mode<synchronous>, transform_indices = @transform_25, window_bounds = array<i64: 128, 128>}, {pipeline_mode = #tpu.pipeline_mode<synchronous>, transform_indices = @transform_26, window_bounds = array<i64: 128, 128>}, {pipeline_mode = #tpu.pipeline_mode<synchronous>, transform_indices = @transform_27, window_bounds = array<i64: 128, 128>}, {pipeline_mode = #tpu.pipeline_mode<synchronous>, transform_indices = @transform_28, window_bounds = array<i64: 128, 128>}, {pipeline_mode = #tpu.pipeline_mode<synchronous>, transform_indices = @transform_29, window_bounds = array<i64: 8, 32>}, {pipeline_mode = #tpu.pipeline_mode<synchronous>, transform_indices = @transform_30, window_bounds = array<i64: 16, 32>}, {pipeline_mode = #tpu.pipeline_mode<synchronous>, transform_indices = @transform_31, window_bounds = array<i64: 1, 2>}, {transform_indices = @transform_32, window_bounds = array<i64: 1, 16, 128>}]} {
    %c0 = arith.constant 0 : index
    %c0_0 = arith.constant 0 : index
    %c0_1 = arith.constant 0 : index
    %0 = vector.load %arg1[%c0, %c0_0, %c0_1] : memref<1x16x8xf32, #tpu.memory_space<vmem>>, vector<1x16x8xf32>
    %1 = vector.shape_cast %0 : vector<1x16x8xf32> to vector<16x8xf32>
    %2 = vector.extract_strided_slice %1 {offsets = [0, 0], sizes = [16, 3], strides = [1, 1]} : vector<16x8xf32> to vector<16x3xf32>
    %3 = vector.extract_strided_slice %1 {offsets = [0, 3], sizes = [16, 1], strides = [1, 1]} : vector<16x8xf32> to vector<16x1xf32>
    %4 = arith.mulf %2, %2 : vector<16x3xf32>
    %cst = arith.constant dense<0.000000e+00> : vector<16xf32>
    %5 = vector.multi_reduction <add>, %4, %cst [1] : vector<16x3xf32> to vector<16xf32>
    %6 = vector.shape_cast %5 : vector<16xf32> to vector<16x1xf32>
    %cst_2 = arith.constant dense<0.000000e+00> : vector<16x16xf32>
    %7 = tpu.matmul %2, %2, %cst_2 {dimension_numbers = #tpu.dot_dimension_numbers<[1], [1], [0], [0], [0, 0, 1, 0], [], []>} : vector<16x3xf32>, vector<16x3xf32>, vector<16x16xf32> -> vector<16x16xf32>
    %8 = tpu.transpose %6, [1, 0] : vector<16x1xf32> -> vector<1x16xf32>
    %9 = vector.broadcast %6 : vector<16x1xf32> to vector<16x16xf32>
    %10 = vector.broadcast %8 : vector<1x16xf32> to vector<16x16xf32>
    %11 = arith.addf %9, %10 : vector<16x16xf32>
    %cst_3 = arith.constant 2.000000e+00 : f32
    %12 = vector.broadcast %cst_3 : f32 to vector<16x16xf32>
    %13 = arith.mulf %12, %7 : vector<16x16xf32>
    %14 = arith.subf %11, %13 : vector<16x16xf32>
    %cst_4 = arith.constant 0.000000e+00 : f32
    %15 = vector.broadcast %cst_4 : f32 to vector<16x16xf32>
    %16 = arith.maximumf %14, %15 : vector<16x16xf32>
    %17 = tpu.iota {dimensions = array<i32: 1>} : vector<16x16xi32>
    %18 = arith.sitofp %17 : vector<16x16xi32> to vector<16x16xf32>
    %cst_5 = arith.constant dense<0x7F800000> : vector<16xf32>
    %19 = vector.multi_reduction <minimumf>, %16, %cst_5 [1] : vector<16x16xf32> to vector<16xf32>
    %20 = vector.shape_cast %19 : vector<16xf32> to vector<16x1xf32>
    %21 = vector.broadcast %20 : vector<16x1xf32> to vector<16x16xf32>
    %22 = arith.cmpf oeq, %16, %21 : vector<16x16xf32>
    %cst_6 = arith.constant 1.600000e+01 : f32
    %23 = vector.broadcast %cst_6 : f32 to vector<16x16xf32>
    %24 = arith.select %22, %18, %23 : vector<16x16xi1>, vector<16x16xf32>
    %cst_7 = arith.constant dense<0x7F800000> : vector<16xf32>
    %25 = vector.multi_reduction <minimumf>, %24, %cst_7 [1] : vector<16x16xf32> to vector<16xf32>
    %26 = vector.shape_cast %25 : vector<16xf32> to vector<16x1xf32>
    %27 = vector.broadcast %26 : vector<16x1xf32> to vector<16x16xf32>
    %28 = arith.cmpf oeq, %18, %27 : vector<16x16xf32>
    %29 = arith.extui %28 : vector<16x16xi1> to vector<16x16xi32>
    %30 = arith.sitofp %29 : vector<16x16xi32> to vector<16x16xf32>
    %31 = vector.broadcast %26 : vector<16x1xf32> to vector<16x16xf32>
    %32 = arith.cmpf oeq, %18, %31 : vector<16x16xf32>
    %cst_8 = arith.constant 1.000000e+30 : f32
    %33 = vector.broadcast %cst_8 : f32 to vector<16x16xf32>
    %34 = arith.select %32, %33, %16 : vector<16x16xi1>, vector<16x16xf32>
    %cst_9 = arith.constant dense<0x7F800000> : vector<16xf32>
    %35 = vector.multi_reduction <minimumf>, %34, %cst_9 [1] : vector<16x16xf32> to vector<16xf32>
    %36 = vector.shape_cast %35 : vector<16xf32> to vector<16x1xf32>
    %37 = vector.broadcast %36 : vector<16x1xf32> to vector<16x16xf32>
    %38 = arith.cmpf oeq, %34, %37 : vector<16x16xf32>
    %cst_10 = arith.constant 1.600000e+01 : f32
    %39 = vector.broadcast %cst_10 : f32 to vector<16x16xf32>
    %40 = arith.select %38, %18, %39 : vector<16x16xi1>, vector<16x16xf32>
    %cst_11 = arith.constant dense<0x7F800000> : vector<16xf32>
    %41 = vector.multi_reduction <minimumf>, %40, %cst_11 [1] : vector<16x16xf32> to vector<16xf32>
    %42 = vector.shape_cast %41 : vector<16xf32> to vector<16x1xf32>
    %43 = vector.broadcast %42 : vector<16x1xf32> to vector<16x16xf32>
    %44 = arith.cmpf oeq, %18, %43 : vector<16x16xf32>
    %45 = arith.extui %44 : vector<16x16xi1> to vector<16x16xi32>
    %46 = arith.sitofp %45 : vector<16x16xi32> to vector<16x16xf32>
    %47 = vector.broadcast %42 : vector<16x1xf32> to vector<16x16xf32>
    %48 = arith.cmpf oeq, %18, %47 : vector<16x16xf32>
    %cst_12 = arith.constant 1.000000e+30 : f32
    %49 = vector.broadcast %cst_12 : f32 to vector<16x16xf32>
    %50 = arith.select %48, %49, %34 : vector<16x16xi1>, vector<16x16xf32>
    %cst_13 = arith.constant dense<0x7F800000> : vector<16xf32>
    %51 = vector.multi_reduction <minimumf>, %50, %cst_13 [1] : vector<16x16xf32> to vector<16xf32>
    %52 = vector.shape_cast %51 : vector<16xf32> to vector<16x1xf32>
    %53 = vector.broadcast %52 : vector<16x1xf32> to vector<16x16xf32>
    %54 = arith.cmpf oeq, %50, %53 : vector<16x16xf32>
    %cst_14 = arith.constant 1.600000e+01 : f32
    %55 = vector.broadcast %cst_14 : f32 to vector<16x16xf32>
    %56 = arith.select %54, %18, %55 : vector<16x16xi1>, vector<16x16xf32>
    %cst_15 = arith.constant dense<0x7F800000> : vector<16xf32>
    %57 = vector.multi_reduction <minimumf>, %56, %cst_15 [1] : vector<16x16xf32> to vector<16xf32>
    %58 = vector.shape_cast %57 : vector<16xf32> to vector<16x1xf32>
    %59 = vector.broadcast %58 : vector<16x1xf32> to vector<16x16xf32>
    %60 = arith.cmpf oeq, %18, %59 : vector<16x16xf32>
    %61 = arith.extui %60 : vector<16x16xi1> to vector<16x16xi32>
    %62 = arith.sitofp %61 : vector<16x16xi32> to vector<16x16xf32>
    %63 = vector.broadcast %58 : vector<16x1xf32> to vector<16x16xf32>
    %64 = arith.cmpf oeq, %18, %63 : vector<16x16xf32>
    %cst_16 = arith.constant 1.000000e+30 : f32
    %65 = vector.broadcast %cst_16 : f32 to vector<16x16xf32>
    %66 = arith.select %64, %65, %50 : vector<16x16xi1>, vector<16x16xf32>
    %cst_17 = arith.constant dense<0x7F800000> : vector<16xf32>
    %67 = vector.multi_reduction <minimumf>, %66, %cst_17 [1] : vector<16x16xf32> to vector<16xf32>
    %68 = vector.shape_cast %67 : vector<16xf32> to vector<16x1xf32>
    %69 = vector.broadcast %68 : vector<16x1xf32> to vector<16x16xf32>
    %70 = arith.cmpf oeq, %66, %69 : vector<16x16xf32>
    %cst_18 = arith.constant 1.600000e+01 : f32
    %71 = vector.broadcast %cst_18 : f32 to vector<16x16xf32>
    %72 = arith.select %70, %18, %71 : vector<16x16xi1>, vector<16x16xf32>
    %cst_19 = arith.constant dense<0x7F800000> : vector<16xf32>
    %73 = vector.multi_reduction <minimumf>, %72, %cst_19 [1] : vector<16x16xf32> to vector<16xf32>
    %74 = vector.shape_cast %73 : vector<16xf32> to vector<16x1xf32>
    %75 = vector.broadcast %74 : vector<16x1xf32> to vector<16x16xf32>
    %76 = arith.cmpf oeq, %18, %75 : vector<16x16xf32>
    %77 = arith.extui %76 : vector<16x16xi1> to vector<16x16xi32>
    %78 = arith.sitofp %77 : vector<16x16xi32> to vector<16x16xf32>
    %79 = vector.broadcast %74 : vector<16x1xf32> to vector<16x16xf32>
    %80 = arith.cmpf oeq, %18, %79 : vector<16x16xf32>
    %cst_20 = arith.constant 1.000000e+30 : f32
    %81 = vector.broadcast %cst_20 : f32 to vector<16x16xf32>
    %82 = arith.select %80, %81, %66 : vector<16x16xi1>, vector<16x16xf32>
    %cst_21 = arith.constant dense<0x7F800000> : vector<16xf32>
    %83 = vector.multi_reduction <minimumf>, %82, %cst_21 [1] : vector<16x16xf32> to vector<16xf32>
    %84 = vector.shape_cast %83 : vector<16xf32> to vector<16x1xf32>
    %85 = vector.broadcast %84 : vector<16x1xf32> to vector<16x16xf32>
    %86 = arith.cmpf oeq, %82, %85 : vector<16x16xf32>
    %cst_22 = arith.constant 1.600000e+01 : f32
    %87 = vector.broadcast %cst_22 : f32 to vector<16x16xf32>
    %88 = arith.select %86, %18, %87 : vector<16x16xi1>, vector<16x16xf32>
    %cst_23 = arith.constant dense<0x7F800000> : vector<16xf32>
    %89 = vector.multi_reduction <minimumf>, %88, %cst_23 [1] : vector<16x16xf32> to vector<16xf32>
    %90 = vector.shape_cast %89 : vector<16xf32> to vector<16x1xf32>
    %91 = vector.broadcast %90 : vector<16x1xf32> to vector<16x16xf32>
    %92 = arith.cmpf oeq, %18, %91 : vector<16x16xf32>
    %93 = arith.extui %92 : vector<16x16xi1> to vector<16x16xi32>
    %94 = arith.sitofp %93 : vector<16x16xi32> to vector<16x16xf32>
    %95 = vector.broadcast %90 : vector<16x1xf32> to vector<16x16xf32>
    %96 = arith.cmpf oeq, %18, %95 : vector<16x16xf32>
    %cst_24 = arith.constant 1.000000e+30 : f32
    %97 = vector.broadcast %cst_24 : f32 to vector<16x16xf32>
    %98 = arith.select %96, %97, %82 : vector<16x16xi1>, vector<16x16xf32>
    %cst_25 = arith.constant dense<0x7F800000> : vector<16xf32>
    %99 = vector.multi_reduction <minimumf>, %98, %cst_25 [1] : vector<16x16xf32> to vector<16xf32>
    %100 = vector.shape_cast %99 : vector<16xf32> to vector<16x1xf32>
    %101 = vector.broadcast %100 : vector<16x1xf32> to vector<16x16xf32>
    %102 = arith.cmpf oeq, %98, %101 : vector<16x16xf32>
    %cst_26 = arith.constant 1.600000e+01 : f32
    %103 = vector.broadcast %cst_26 : f32 to vector<16x16xf32>
    %104 = arith.select %102, %18, %103 : vector<16x16xi1>, vector<16x16xf32>
    %cst_27 = arith.constant dense<0x7F800000> : vector<16xf32>
    %105 = vector.multi_reduction <minimumf>, %104, %cst_27 [1] : vector<16x16xf32> to vector<16xf32>
    %106 = vector.shape_cast %105 : vector<16xf32> to vector<16x1xf32>
    %107 = vector.broadcast %106 : vector<16x1xf32> to vector<16x16xf32>
    %108 = arith.cmpf oeq, %18, %107 : vector<16x16xf32>
    %109 = arith.extui %108 : vector<16x16xi1> to vector<16x16xi32>
    %110 = arith.sitofp %109 : vector<16x16xi32> to vector<16x16xf32>
    %111 = vector.broadcast %106 : vector<16x1xf32> to vector<16x16xf32>
    %112 = arith.cmpf oeq, %18, %111 : vector<16x16xf32>
    %cst_28 = arith.constant 1.000000e+30 : f32
    %113 = vector.broadcast %cst_28 : f32 to vector<16x16xf32>
    %114 = arith.select %112, %113, %98 : vector<16x16xi1>, vector<16x16xf32>
    %cst_29 = arith.constant dense<0x7F800000> : vector<16xf32>
    %115 = vector.multi_reduction <minimumf>, %114, %cst_29 [1] : vector<16x16xf32> to vector<16xf32>
    %116 = vector.shape_cast %115 : vector<16xf32> to vector<16x1xf32>
    %117 = vector.broadcast %116 : vector<16x1xf32> to vector<16x16xf32>
    %118 = arith.cmpf oeq, %114, %117 : vector<16x16xf32>
    %cst_30 = arith.constant 1.600000e+01 : f32
    %119 = vector.broadcast %cst_30 : f32 to vector<16x16xf32>
    %120 = arith.select %118, %18, %119 : vector<16x16xi1>, vector<16x16xf32>
    %cst_31 = arith.constant dense<0x7F800000> : vector<16xf32>
    %121 = vector.multi_reduction <minimumf>, %120, %cst_31 [1] : vector<16x16xf32> to vector<16xf32>
    %122 = vector.shape_cast %121 : vector<16xf32> to vector<16x1xf32>
    %123 = vector.broadcast %122 : vector<16x1xf32> to vector<16x16xf32>
    %124 = arith.cmpf oeq, %18, %123 : vector<16x16xf32>
    %125 = arith.extui %124 : vector<16x16xi1> to vector<16x16xi32>
    %126 = arith.sitofp %125 : vector<16x16xi32> to vector<16x16xf32>
    %127 = vector.broadcast %122 : vector<16x1xf32> to vector<16x16xf32>
    %128 = arith.cmpf oeq, %18, %127 : vector<16x16xf32>
    %cst_32 = arith.constant 1.000000e+30 : f32
    %129 = vector.broadcast %cst_32 : f32 to vector<16x16xf32>
    %130 = arith.select %128, %129, %114 : vector<16x16xi1>, vector<16x16xf32>
    %cst_33 = arith.constant dense<0x7F800000> : vector<16xf32>
    %131 = vector.multi_reduction <minimumf>, %130, %cst_33 [1] : vector<16x16xf32> to vector<16xf32>
    %132 = vector.shape_cast %131 : vector<16xf32> to vector<16x1xf32>
    %133 = vector.broadcast %132 : vector<16x1xf32> to vector<16x16xf32>
    %134 = arith.cmpf oeq, %130, %133 : vector<16x16xf32>
    %cst_34 = arith.constant 1.600000e+01 : f32
    %135 = vector.broadcast %cst_34 : f32 to vector<16x16xf32>
    %136 = arith.select %134, %18, %135 : vector<16x16xi1>, vector<16x16xf32>
    %cst_35 = arith.constant dense<0x7F800000> : vector<16xf32>
    %137 = vector.multi_reduction <minimumf>, %136, %cst_35 [1] : vector<16x16xf32> to vector<16xf32>
    %138 = vector.shape_cast %137 : vector<16xf32> to vector<16x1xf32>
    %139 = vector.broadcast %138 : vector<16x1xf32> to vector<16x16xf32>
    %140 = arith.cmpf oeq, %18, %139 : vector<16x16xf32>
    %141 = arith.extui %140 : vector<16x16xi1> to vector<16x16xi32>
    %142 = arith.sitofp %141 : vector<16x16xi32> to vector<16x16xf32>
    %143 = math.sqrt %84 : vector<16x1xf32>
    %144 = math.sqrt %132 : vector<16x1xf32>
    %cst_36 = arith.constant dense<0.000000e+00> : vector<16x8xf32>
    %145 = tpu.matmul %30, %1, %cst_36 {dimension_numbers = #tpu.dot_dimension_numbers<[1], [0], [0], [1], [0, 0, 1, 1], [], []>} : vector<16x16xf32>, vector<16x8xf32>, vector<16x8xf32> -> vector<16x8xf32>
    %cst_37 = arith.constant dense<0.000000e+00> : vector<16x8xf32>
    %146 = tpu.matmul %46, %1, %cst_37 {dimension_numbers = #tpu.dot_dimension_numbers<[1], [0], [0], [1], [0, 0, 1, 1], [], []>} : vector<16x16xf32>, vector<16x8xf32>, vector<16x8xf32> -> vector<16x8xf32>
    %cst_38 = arith.constant dense<0.000000e+00> : vector<16x8xf32>
    %147 = tpu.matmul %62, %1, %cst_38 {dimension_numbers = #tpu.dot_dimension_numbers<[1], [0], [0], [1], [0, 0, 1, 1], [], []>} : vector<16x16xf32>, vector<16x8xf32>, vector<16x8xf32> -> vector<16x8xf32>
    %cst_39 = arith.constant dense<0.000000e+00> : vector<16x8xf32>
    %148 = tpu.matmul %78, %1, %cst_39 {dimension_numbers = #tpu.dot_dimension_numbers<[1], [0], [0], [1], [0, 0, 1, 1], [], []>} : vector<16x16xf32>, vector<16x8xf32>, vector<16x8xf32> -> vector<16x8xf32>
    %cst_40 = arith.constant dense<0.000000e+00> : vector<16x8xf32>
    %149 = tpu.matmul %94, %1, %cst_40 {dimension_numbers = #tpu.dot_dimension_numbers<[1], [0], [0], [1], [0, 0, 1, 1], [], []>} : vector<16x16xf32>, vector<16x8xf32>, vector<16x8xf32> -> vector<16x8xf32>
    %cst_41 = arith.constant dense<0.000000e+00> : vector<16x8xf32>
    %150 = tpu.matmul %110, %1, %cst_41 {dimension_numbers = #tpu.dot_dimension_numbers<[1], [0], [0], [1], [0, 0, 1, 1], [], []>} : vector<16x16xf32>, vector<16x8xf32>, vector<16x8xf32> -> vector<16x8xf32>
    %cst_42 = arith.constant dense<0.000000e+00> : vector<16x8xf32>
    %151 = tpu.matmul %126, %1, %cst_42 {dimension_numbers = #tpu.dot_dimension_numbers<[1], [0], [0], [1], [0, 0, 1, 1], [], []>} : vector<16x16xf32>, vector<16x8xf32>, vector<16x8xf32> -> vector<16x8xf32>
    %cst_43 = arith.constant dense<0.000000e+00> : vector<16x8xf32>
    %152 = tpu.matmul %142, %1, %cst_43 {dimension_numbers = #tpu.dot_dimension_numbers<[1], [0], [0], [1], [0, 0, 1, 1], [], []>} : vector<16x16xf32>, vector<16x8xf32>, vector<16x8xf32> -> vector<16x8xf32>
    %153 = vector.extract_strided_slice %145 {offsets = [0, 3], sizes = [16, 1], strides = [1, 1]} : vector<16x8xf32> to vector<16x1xf32>
    %154 = vector.extract_strided_slice %146 {offsets = [0, 3], sizes = [16, 1], strides = [1, 1]} : vector<16x8xf32> to vector<16x1xf32>
    %155 = vector.extract_strided_slice %147 {offsets = [0, 3], sizes = [16, 1], strides = [1, 1]} : vector<16x8xf32> to vector<16x1xf32>
    %156 = vector.extract_strided_slice %148 {offsets = [0, 3], sizes = [16, 1], strides = [1, 1]} : vector<16x8xf32> to vector<16x1xf32>
    %157 = vector.extract_strided_slice %149 {offsets = [0, 3], sizes = [16, 1], strides = [1, 1]} : vector<16x8xf32> to vector<16x1xf32>
    %158 = vector.extract_strided_slice %150 {offsets = [0, 3], sizes = [16, 1], strides = [1, 1]} : vector<16x8xf32> to vector<16x1xf32>
    %159 = vector.extract_strided_slice %151 {offsets = [0, 3], sizes = [16, 1], strides = [1, 1]} : vector<16x8xf32> to vector<16x1xf32>
    %160 = vector.extract_strided_slice %152 {offsets = [0, 3], sizes = [16, 1], strides = [1, 1]} : vector<16x8xf32> to vector<16x1xf32>
    %cst_44 = arith.constant 0.000000e+00 : f32
    %161 = vector.broadcast %cst_44 : f32 to vector<16x1xf32>
    %c0_45 = arith.constant 0 : index
    %c0_46 = arith.constant 0 : index
    %162 = vector.load %arg2[%c0_45, %c0_46] : memref<8x64xf32, #tpu.memory_space<vmem>>, vector<8x64xf32>
    %cst_47 = arith.constant dense<0.000000e+00> : vector<16x64xf32>
    %163 = tpu.matmul %1, %162, %cst_47 {dimension_numbers = #tpu.dot_dimension_numbers<[1], [0], [0], [1], [0, 0, 1, 1], [], []>} : vector<16x8xf32>, vector<8x64xf32>, vector<16x64xf32> -> vector<16x64xf32>
    %c0_48 = arith.constant 0 : index
    %c0_49 = arith.constant 0 : index
    %164 = vector.load %arg3[%c0_48, %c0_49] : memref<1x64xf32, #tpu.memory_space<vmem>>, vector<1x64xf32>
    %165 = vector.broadcast %164 : vector<1x64xf32> to vector<16x64xf32>
    %166 = arith.addf %163, %165 : vector<16x64xf32>
    %cst_50 = arith.constant 0.000000e+00 : f32
    %167 = vector.broadcast %cst_50 : f32 to vector<16x64xf32>
    %168 = arith.maximumf %166, %167 : vector<16x64xf32>
    %c0_51 = arith.constant 0 : index
    %c0_52 = arith.constant 0 : index
    %169 = vector.load %arg4[%c0_51, %c0_52] : memref<64x64xf32, #tpu.memory_space<vmem>>, vector<64x64xf32>
    %cst_53 = arith.constant dense<0.000000e+00> : vector<16x64xf32>
    %170 = tpu.matmul %168, %169, %cst_53 {dimension_numbers = #tpu.dot_dimension_numbers<[1], [0], [0], [1], [0, 0, 1, 1], [], []>} : vector<16x64xf32>, vector<64x64xf32>, vector<16x64xf32> -> vector<16x64xf32>
    %c0_54 = arith.constant 0 : index
    %c0_55 = arith.constant 0 : index
    %171 = vector.load %arg5[%c0_54, %c0_55] : memref<1x64xf32, #tpu.memory_space<vmem>>, vector<1x64xf32>
    %172 = vector.broadcast %171 : vector<1x64xf32> to vector<16x64xf32>
    %173 = arith.addf %170, %172 : vector<16x64xf32>
    %cst_56 = arith.constant 0.000000e+00 : f32
    %174 = vector.broadcast %cst_56 : f32 to vector<16x64xf32>
    %175 = arith.maximumf %173, %174 : vector<16x64xf32>
    %c0_57 = arith.constant 0 : index
    %c0_58 = arith.constant 0 : index
    %176 = vector.load %arg6[%c0_57, %c0_58] : memref<64x64xf32, #tpu.memory_space<vmem>>, vector<64x64xf32>
    %cst_59 = arith.constant dense<0.000000e+00> : vector<16x64xf32>
    %177 = tpu.matmul %175, %176, %cst_59 {dimension_numbers = #tpu.dot_dimension_numbers<[1], [0], [0], [1], [0, 0, 1, 1], [], []>} : vector<16x64xf32>, vector<64x64xf32>, vector<16x64xf32> -> vector<16x64xf32>
    %c0_60 = arith.constant 0 : index
    %c0_61 = arith.constant 0 : index
    %178 = vector.load %arg7[%c0_60, %c0_61] : memref<1x64xf32, #tpu.memory_space<vmem>>, vector<1x64xf32>
    %179 = vector.broadcast %178 : vector<1x64xf32> to vector<16x64xf32>
    %180 = arith.addf %177, %179 : vector<16x64xf32>
    %cst_62 = arith.constant 0.000000e+00 : f32
    %181 = vector.broadcast %cst_62 : f32 to vector<16x64xf32>
    %182 = arith.maximumf %180, %181 : vector<16x64xf32>
    %c0_63 = arith.constant 0 : index
    %c0_64 = arith.constant 0 : index
    %183 = vector.load %arg8[%c0_63, %c0_64] : memref<64x128xf32, #tpu.memory_space<vmem>>, vector<64x128xf32>
    %cst_65 = arith.constant dense<0.000000e+00> : vector<16x128xf32>
    %184 = tpu.matmul %182, %183, %cst_65 {dimension_numbers = #tpu.dot_dimension_numbers<[1], [0], [0], [1], [0, 0, 1, 1], [], []>} : vector<16x64xf32>, vector<64x128xf32>, vector<16x128xf32> -> vector<16x128xf32>
    %c0_66 = arith.constant 0 : index
    %c0_67 = arith.constant 0 : index
    %185 = vector.load %arg9[%c0_66, %c0_67] : memref<1x128xf32, #tpu.memory_space<vmem>>, vector<1x128xf32>
    %186 = vector.broadcast %185 : vector<1x128xf32> to vector<16x128xf32>
    %187 = arith.addf %184, %186 : vector<16x128xf32>
    %cst_68 = arith.constant 0.000000e+00 : f32
    %188 = vector.broadcast %cst_68 : f32 to vector<16x128xf32>
    %189 = arith.maximumf %187, %188 : vector<16x128xf32>
    %190 = vector.extract_strided_slice %145 {offsets = [0, 0], sizes = [16, 3], strides = [1, 1]} : vector<16x8xf32> to vector<16x3xf32>
    %191 = vector.extract_strided_slice %146 {offsets = [0, 0], sizes = [16, 3], strides = [1, 1]} : vector<16x8xf32> to vector<16x3xf32>
    %192 = vector.extract_strided_slice %147 {offsets = [0, 0], sizes = [16, 3], strides = [1, 1]} : vector<16x8xf32> to vector<16x3xf32>
    %193 = vector.extract_strided_slice %148 {offsets = [0, 0], sizes = [16, 3], strides = [1, 1]} : vector<16x8xf32> to vector<16x3xf32>
    %194 = vector.extract_strided_slice %149 {offsets = [0, 0], sizes = [16, 3], strides = [1, 1]} : vector<16x8xf32> to vector<16x3xf32>
    %195 = arith.maximumf %190, %191 : vector<16x3xf32>
    %196 = arith.maximumf %195, %192 : vector<16x3xf32>
    %197 = arith.maximumf %196, %193 : vector<16x3xf32>
    %198 = arith.maximumf %197, %194 : vector<16x3xf32>
    %199 = vector.extract_strided_slice %145 {offsets = [0, 0], sizes = [16, 3], strides = [1, 1]} : vector<16x8xf32> to vector<16x3xf32>
    %200 = vector.extract_strided_slice %146 {offsets = [0, 0], sizes = [16, 3], strides = [1, 1]} : vector<16x8xf32> to vector<16x3xf32>
    %201 = vector.extract_strided_slice %147 {offsets = [0, 0], sizes = [16, 3], strides = [1, 1]} : vector<16x8xf32> to vector<16x3xf32>
    %202 = vector.extract_strided_slice %148 {offsets = [0, 0], sizes = [16, 3], strides = [1, 1]} : vector<16x8xf32> to vector<16x3xf32>
    %203 = vector.extract_strided_slice %149 {offsets = [0, 0], sizes = [16, 3], strides = [1, 1]} : vector<16x8xf32> to vector<16x3xf32>
    %204 = vector.extract_strided_slice %150 {offsets = [0, 0], sizes = [16, 3], strides = [1, 1]} : vector<16x8xf32> to vector<16x3xf32>
    %205 = vector.extract_strided_slice %151 {offsets = [0, 0], sizes = [16, 3], strides = [1, 1]} : vector<16x8xf32> to vector<16x3xf32>
    %206 = vector.extract_strided_slice %152 {offsets = [0, 0], sizes = [16, 3], strides = [1, 1]} : vector<16x8xf32> to vector<16x3xf32>
    %207 = arith.maximumf %199, %200 : vector<16x3xf32>
    %208 = arith.maximumf %207, %201 : vector<16x3xf32>
    %209 = arith.maximumf %208, %202 : vector<16x3xf32>
    %210 = arith.maximumf %209, %203 : vector<16x3xf32>
    %211 = arith.maximumf %210, %204 : vector<16x3xf32>
    %212 = arith.maximumf %211, %205 : vector<16x3xf32>
    %213 = arith.maximumf %212, %206 : vector<16x3xf32>
    %214 = arith.subf %198, %2 : vector<16x3xf32>
    %215 = tpu.concatenate %2, %214, %143, %161 in 1 : vector<16x3xf32>, vector<16x3xf32>, vector<16x1xf32>, vector<16x1xf32> -> vector<16x8xf32>
    %c0_69 = arith.constant 0 : index
    %c0_70 = arith.constant 0 : index
    %216 = vector.load %arg12[%c0_69, %c0_70] : memref<8x64xf32, #tpu.memory_space<vmem>>, vector<8x64xf32>
    %cst_71 = arith.constant dense<0.000000e+00> : vector<16x64xf32>
    %217 = tpu.matmul %215, %216, %cst_71 {dimension_numbers = #tpu.dot_dimension_numbers<[1], [0], [0], [1], [0, 0, 1, 1], [], []>} : vector<16x8xf32>, vector<8x64xf32>, vector<16x64xf32> -> vector<16x64xf32>
    %c0_72 = arith.constant 0 : index
    %c0_73 = arith.constant 0 : index
    %218 = vector.load %arg13[%c0_72, %c0_73] : memref<1x64xf32, #tpu.memory_space<vmem>>, vector<1x64xf32>
    %219 = vector.broadcast %218 : vector<1x64xf32> to vector<16x64xf32>
    %220 = arith.addf %217, %219 : vector<16x64xf32>
    %cst_74 = arith.constant 0.000000e+00 : f32
    %221 = vector.broadcast %cst_74 : f32 to vector<16x64xf32>
    %222 = arith.cmpf oge, %220, %221 : vector<16x64xf32>
    %cst_75 = arith.constant 2.000000e-01 : f32
    %223 = vector.broadcast %cst_75 : f32 to vector<16x64xf32>
    %224 = arith.mulf %223, %220 : vector<16x64xf32>
    %225 = arith.select %222, %220, %224 : vector<16x64xi1>, vector<16x64xf32>
    %226 = arith.subf %213, %2 : vector<16x3xf32>
    %227 = tpu.concatenate %2, %226, %144, %161 in 1 : vector<16x3xf32>, vector<16x3xf32>, vector<16x1xf32>, vector<16x1xf32> -> vector<16x8xf32>
    %c0_76 = arith.constant 0 : index
    %c0_77 = arith.constant 0 : index
    %228 = vector.load %arg14[%c0_76, %c0_77] : memref<8x64xf32, #tpu.memory_space<vmem>>, vector<8x64xf32>
    %cst_78 = arith.constant dense<0.000000e+00> : vector<16x64xf32>
    %229 = tpu.matmul %227, %228, %cst_78 {dimension_numbers = #tpu.dot_dimension_numbers<[1], [0], [0], [1], [0, 0, 1, 1], [], []>} : vector<16x8xf32>, vector<8x64xf32>, vector<16x64xf32> -> vector<16x64xf32>
    %c0_79 = arith.constant 0 : index
    %c0_80 = arith.constant 0 : index
    %230 = vector.load %arg15[%c0_79, %c0_80] : memref<1x64xf32, #tpu.memory_space<vmem>>, vector<1x64xf32>
    %231 = vector.broadcast %230 : vector<1x64xf32> to vector<16x64xf32>
    %232 = arith.addf %229, %231 : vector<16x64xf32>
    %cst_81 = arith.constant 0.000000e+00 : f32
    %233 = vector.broadcast %cst_81 : f32 to vector<16x64xf32>
    %234 = arith.cmpf oge, %232, %233 : vector<16x64xf32>
    %cst_82 = arith.constant 2.000000e-01 : f32
    %235 = vector.broadcast %cst_82 : f32 to vector<16x64xf32>
    %236 = arith.mulf %235, %232 : vector<16x64xf32>
    %237 = arith.select %234, %232, %236 : vector<16x64xi1>, vector<16x64xf32>
    %238 = tpu.concatenate %225, %2 in 1 : vector<16x64xf32>, vector<16x3xf32> -> vector<16x67xf32>
    %239 = tpu.concatenate %237, %2 in 1 : vector<16x64xf32>, vector<16x3xf32> -> vector<16x67xf32>
    %cst_83 = arith.constant dense<0.000000e+00> : vector<16x67xf32>
    %240 = tpu.matmul %30, %238, %cst_83 {dimension_numbers = #tpu.dot_dimension_numbers<[1], [0], [0], [1], [0, 0, 1, 1], [], []>} : vector<16x16xf32>, vector<16x67xf32>, vector<16x67xf32> -> vector<16x67xf32>
    %cst_84 = arith.constant dense<0.000000e+00> : vector<16x67xf32>
    %241 = tpu.matmul %46, %238, %cst_84 {dimension_numbers = #tpu.dot_dimension_numbers<[1], [0], [0], [1], [0, 0, 1, 1], [], []>} : vector<16x16xf32>, vector<16x67xf32>, vector<16x67xf32> -> vector<16x67xf32>
    %cst_85 = arith.constant dense<0.000000e+00> : vector<16x67xf32>
    %242 = tpu.matmul %62, %238, %cst_85 {dimension_numbers = #tpu.dot_dimension_numbers<[1], [0], [0], [1], [0, 0, 1, 1], [], []>} : vector<16x16xf32>, vector<16x67xf32>, vector<16x67xf32> -> vector<16x67xf32>
    %cst_86 = arith.constant dense<0.000000e+00> : vector<16x67xf32>
    %243 = tpu.matmul %78, %238, %cst_86 {dimension_numbers = #tpu.dot_dimension_numbers<[1], [0], [0], [1], [0, 0, 1, 1], [], []>} : vector<16x16xf32>, vector<16x67xf32>, vector<16x67xf32> -> vector<16x67xf32>
    %cst_87 = arith.constant dense<0.000000e+00> : vector<16x67xf32>
    %244 = tpu.matmul %94, %238, %cst_87 {dimension_numbers = #tpu.dot_dimension_numbers<[1], [0], [0], [1], [0, 0, 1, 1], [], []>} : vector<16x16xf32>, vector<16x67xf32>, vector<16x67xf32> -> vector<16x67xf32>
    %245 = arith.maximumf %240, %241 : vector<16x67xf32>
    %246 = arith.maximumf %245, %242 : vector<16x67xf32>
    %247 = arith.maximumf %246, %243 : vector<16x67xf32>
    %248 = arith.maximumf %247, %244 : vector<16x67xf32>
    %249 = arith.subf %248, %238 : vector<16x67xf32>
    %250 = tpu.concatenate %238, %249, %143, %161 in 1 : vector<16x67xf32>, vector<16x67xf32>, vector<16x1xf32>, vector<16x1xf32> -> vector<16x136xf32>
    %c0_88 = arith.constant 0 : index
    %c0_89 = arith.constant 0 : index
    %251 = vector.load %arg16[%c0_88, %c0_89] : memref<136x64xf32, #tpu.memory_space<vmem>>, vector<136x64xf32>
    %cst_90 = arith.constant dense<0.000000e+00> : vector<16x64xf32>
    %252 = tpu.matmul %250, %251, %cst_90 {dimension_numbers = #tpu.dot_dimension_numbers<[1], [0], [0], [1], [0, 0, 1, 1], [], []>} : vector<16x136xf32>, vector<136x64xf32>, vector<16x64xf32> -> vector<16x64xf32>
    %c0_91 = arith.constant 0 : index
    %c0_92 = arith.constant 0 : index
    %253 = vector.load %arg17[%c0_91, %c0_92] : memref<1x64xf32, #tpu.memory_space<vmem>>, vector<1x64xf32>
    %254 = vector.broadcast %253 : vector<1x64xf32> to vector<16x64xf32>
    %255 = arith.addf %252, %254 : vector<16x64xf32>
    %cst_93 = arith.constant 0.000000e+00 : f32
    %256 = vector.broadcast %cst_93 : f32 to vector<16x64xf32>
    %257 = arith.cmpf oge, %255, %256 : vector<16x64xf32>
    %cst_94 = arith.constant 2.000000e-01 : f32
    %258 = vector.broadcast %cst_94 : f32 to vector<16x64xf32>
    %259 = arith.mulf %258, %255 : vector<16x64xf32>
    %260 = arith.select %257, %255, %259 : vector<16x64xi1>, vector<16x64xf32>
    %cst_95 = arith.constant dense<0.000000e+00> : vector<16x67xf32>
    %261 = tpu.matmul %30, %239, %cst_95 {dimension_numbers = #tpu.dot_dimension_numbers<[1], [0], [0], [1], [0, 0, 1, 1], [], []>} : vector<16x16xf32>, vector<16x67xf32>, vector<16x67xf32> -> vector<16x67xf32>
    %cst_96 = arith.constant dense<0.000000e+00> : vector<16x67xf32>
    %262 = tpu.matmul %46, %239, %cst_96 {dimension_numbers = #tpu.dot_dimension_numbers<[1], [0], [0], [1], [0, 0, 1, 1], [], []>} : vector<16x16xf32>, vector<16x67xf32>, vector<16x67xf32> -> vector<16x67xf32>
    %cst_97 = arith.constant dense<0.000000e+00> : vector<16x67xf32>
    %263 = tpu.matmul %62, %239, %cst_97 {dimension_numbers = #tpu.dot_dimension_numbers<[1], [0], [0], [1], [0, 0, 1, 1], [], []>} : vector<16x16xf32>, vector<16x67xf32>, vector<16x67xf32> -> vector<16x67xf32>
    %cst_98 = arith.constant dense<0.000000e+00> : vector<16x67xf32>
    %264 = tpu.matmul %78, %239, %cst_98 {dimension_numbers = #tpu.dot_dimension_numbers<[1], [0], [0], [1], [0, 0, 1, 1], [], []>} : vector<16x16xf32>, vector<16x67xf32>, vector<16x67xf32> -> vector<16x67xf32>
    %cst_99 = arith.constant dense<0.000000e+00> : vector<16x67xf32>
    %265 = tpu.matmul %94, %239, %cst_99 {dimension_numbers = #tpu.dot_dimension_numbers<[1], [0], [0], [1], [0, 0, 1, 1], [], []>} : vector<16x16xf32>, vector<16x67xf32>, vector<16x67xf32> -> vector<16x67xf32>
    %cst_100 = arith.constant dense<0.000000e+00> : vector<16x67xf32>
    %266 = tpu.matmul %110, %239, %cst_100 {dimension_numbers = #tpu.dot_dimension_numbers<[1], [0], [0], [1], [0, 0, 1, 1], [], []>} : vector<16x16xf32>, vector<16x67xf32>, vector<16x67xf32> -> vector<16x67xf32>
    %cst_101 = arith.constant dense<0.000000e+00> : vector<16x67xf32>
    %267 = tpu.matmul %126, %239, %cst_101 {dimension_numbers = #tpu.dot_dimension_numbers<[1], [0], [0], [1], [0, 0, 1, 1], [], []>} : vector<16x16xf32>, vector<16x67xf32>, vector<16x67xf32> -> vector<16x67xf32>
    %cst_102 = arith.constant dense<0.000000e+00> : vector<16x67xf32>
    %268 = tpu.matmul %142, %239, %cst_102 {dimension_numbers = #tpu.dot_dimension_numbers<[1], [0], [0], [1], [0, 0, 1, 1], [], []>} : vector<16x16xf32>, vector<16x67xf32>, vector<16x67xf32> -> vector<16x67xf32>
    %269 = arith.maximumf %261, %262 : vector<16x67xf32>
    %270 = arith.maximumf %269, %263 : vector<16x67xf32>
    %271 = arith.maximumf %270, %264 : vector<16x67xf32>
    %272 = arith.maximumf %271, %265 : vector<16x67xf32>
    %273 = arith.maximumf %272, %266 : vector<16x67xf32>
    %274 = arith.maximumf %273, %267 : vector<16x67xf32>
    %275 = arith.maximumf %274, %268 : vector<16x67xf32>
    %276 = arith.subf %275, %239 : vector<16x67xf32>
    %277 = tpu.concatenate %239, %276, %144, %161 in 1 : vector<16x67xf32>, vector<16x67xf32>, vector<16x1xf32>, vector<16x1xf32> -> vector<16x136xf32>
    %c0_103 = arith.constant 0 : index
    %c0_104 = arith.constant 0 : index
    %278 = vector.load %arg18[%c0_103, %c0_104] : memref<136x64xf32, #tpu.memory_space<vmem>>, vector<136x64xf32>
    %cst_105 = arith.constant dense<0.000000e+00> : vector<16x64xf32>
    %279 = tpu.matmul %277, %278, %cst_105 {dimension_numbers = #tpu.dot_dimension_numbers<[1], [0], [0], [1], [0, 0, 1, 1], [], []>} : vector<16x136xf32>, vector<136x64xf32>, vector<16x64xf32> -> vector<16x64xf32>
    %c0_106 = arith.constant 0 : index
    %c0_107 = arith.constant 0 : index
    %280 = vector.load %arg19[%c0_106, %c0_107] : memref<1x64xf32, #tpu.memory_space<vmem>>, vector<1x64xf32>
    %281 = vector.broadcast %280 : vector<1x64xf32> to vector<16x64xf32>
    %282 = arith.addf %279, %281 : vector<16x64xf32>
    %cst_108 = arith.constant 0.000000e+00 : f32
    %283 = vector.broadcast %cst_108 : f32 to vector<16x64xf32>
    %284 = arith.cmpf oge, %282, %283 : vector<16x64xf32>
    %cst_109 = arith.constant 2.000000e-01 : f32
    %285 = vector.broadcast %cst_109 : f32 to vector<16x64xf32>
    %286 = arith.mulf %285, %282 : vector<16x64xf32>
    %287 = arith.select %284, %282, %286 : vector<16x64xi1>, vector<16x64xf32>
    %288 = tpu.concatenate %260, %238 in 1 : vector<16x64xf32>, vector<16x67xf32> -> vector<16x131xf32>
    %289 = tpu.concatenate %287, %239 in 1 : vector<16x64xf32>, vector<16x67xf32> -> vector<16x131xf32>
    %cst_110 = arith.constant dense<0.000000e+00> : vector<16x131xf32>
    %290 = tpu.matmul %30, %288, %cst_110 {dimension_numbers = #tpu.dot_dimension_numbers<[1], [0], [0], [1], [0, 0, 1, 1], [], []>} : vector<16x16xf32>, vector<16x131xf32>, vector<16x131xf32> -> vector<16x131xf32>
    %cst_111 = arith.constant dense<0.000000e+00> : vector<16x131xf32>
    %291 = tpu.matmul %46, %288, %cst_111 {dimension_numbers = #tpu.dot_dimension_numbers<[1], [0], [0], [1], [0, 0, 1, 1], [], []>} : vector<16x16xf32>, vector<16x131xf32>, vector<16x131xf32> -> vector<16x131xf32>
    %cst_112 = arith.constant dense<0.000000e+00> : vector<16x131xf32>
    %292 = tpu.matmul %62, %288, %cst_112 {dimension_numbers = #tpu.dot_dimension_numbers<[1], [0], [0], [1], [0, 0, 1, 1], [], []>} : vector<16x16xf32>, vector<16x131xf32>, vector<16x131xf32> -> vector<16x131xf32>
    %cst_113 = arith.constant dense<0.000000e+00> : vector<16x131xf32>
    %293 = tpu.matmul %78, %288, %cst_113 {dimension_numbers = #tpu.dot_dimension_numbers<[1], [0], [0], [1], [0, 0, 1, 1], [], []>} : vector<16x16xf32>, vector<16x131xf32>, vector<16x131xf32> -> vector<16x131xf32>
    %cst_114 = arith.constant dense<0.000000e+00> : vector<16x131xf32>
    %294 = tpu.matmul %94, %288, %cst_114 {dimension_numbers = #tpu.dot_dimension_numbers<[1], [0], [0], [1], [0, 0, 1, 1], [], []>} : vector<16x16xf32>, vector<16x131xf32>, vector<16x131xf32> -> vector<16x131xf32>
    %295 = arith.maximumf %290, %291 : vector<16x131xf32>
    %296 = arith.maximumf %295, %292 : vector<16x131xf32>
    %297 = arith.maximumf %296, %293 : vector<16x131xf32>
    %298 = arith.maximumf %297, %294 : vector<16x131xf32>
    %299 = arith.subf %298, %288 : vector<16x131xf32>
    %300 = tpu.concatenate %288, %299, %143, %161 in 1 : vector<16x131xf32>, vector<16x131xf32>, vector<16x1xf32>, vector<16x1xf32> -> vector<16x264xf32>
    %c0_115 = arith.constant 0 : index
    %c0_116 = arith.constant 0 : index
    %301 = vector.load %arg20[%c0_115, %c0_116] : memref<264x128xf32, #tpu.memory_space<vmem>>, vector<264x128xf32>
    %cst_117 = arith.constant dense<0.000000e+00> : vector<16x128xf32>
    %302 = tpu.matmul %300, %301, %cst_117 {dimension_numbers = #tpu.dot_dimension_numbers<[1], [0], [0], [1], [0, 0, 1, 1], [], []>} : vector<16x264xf32>, vector<264x128xf32>, vector<16x128xf32> -> vector<16x128xf32>
    %c0_118 = arith.constant 0 : index
    %c0_119 = arith.constant 0 : index
    %303 = vector.load %arg21[%c0_118, %c0_119] : memref<1x128xf32, #tpu.memory_space<vmem>>, vector<1x128xf32>
    %304 = vector.broadcast %303 : vector<1x128xf32> to vector<16x128xf32>
    %305 = arith.addf %302, %304 : vector<16x128xf32>
    %cst_120 = arith.constant 0.000000e+00 : f32
    %306 = vector.broadcast %cst_120 : f32 to vector<16x128xf32>
    %307 = arith.cmpf oge, %305, %306 : vector<16x128xf32>
    %cst_121 = arith.constant 2.000000e-01 : f32
    %308 = vector.broadcast %cst_121 : f32 to vector<16x128xf32>
    %309 = arith.mulf %308, %305 : vector<16x128xf32>
    %310 = arith.select %307, %305, %309 : vector<16x128xi1>, vector<16x128xf32>
    %cst_122 = arith.constant dense<0.000000e+00> : vector<16x131xf32>
    %311 = tpu.matmul %30, %289, %cst_122 {dimension_numbers = #tpu.dot_dimension_numbers<[1], [0], [0], [1], [0, 0, 1, 1], [], []>} : vector<16x16xf32>, vector<16x131xf32>, vector<16x131xf32> -> vector<16x131xf32>
    %cst_123 = arith.constant dense<0.000000e+00> : vector<16x131xf32>
    %312 = tpu.matmul %46, %289, %cst_123 {dimension_numbers = #tpu.dot_dimension_numbers<[1], [0], [0], [1], [0, 0, 1, 1], [], []>} : vector<16x16xf32>, vector<16x131xf32>, vector<16x131xf32> -> vector<16x131xf32>
    %cst_124 = arith.constant dense<0.000000e+00> : vector<16x131xf32>
    %313 = tpu.matmul %62, %289, %cst_124 {dimension_numbers = #tpu.dot_dimension_numbers<[1], [0], [0], [1], [0, 0, 1, 1], [], []>} : vector<16x16xf32>, vector<16x131xf32>, vector<16x131xf32> -> vector<16x131xf32>
    %cst_125 = arith.constant dense<0.000000e+00> : vector<16x131xf32>
    %314 = tpu.matmul %78, %289, %cst_125 {dimension_numbers = #tpu.dot_dimension_numbers<[1], [0], [0], [1], [0, 0, 1, 1], [], []>} : vector<16x16xf32>, vector<16x131xf32>, vector<16x131xf32> -> vector<16x131xf32>
    %cst_126 = arith.constant dense<0.000000e+00> : vector<16x131xf32>
    %315 = tpu.matmul %94, %289, %cst_126 {dimension_numbers = #tpu.dot_dimension_numbers<[1], [0], [0], [1], [0, 0, 1, 1], [], []>} : vector<16x16xf32>, vector<16x131xf32>, vector<16x131xf32> -> vector<16x131xf32>
    %cst_127 = arith.constant dense<0.000000e+00> : vector<16x131xf32>
    %316 = tpu.matmul %110, %289, %cst_127 {dimension_numbers = #tpu.dot_dimension_numbers<[1], [0], [0], [1], [0, 0, 1, 1], [], []>} : vector<16x16xf32>, vector<16x131xf32>, vector<16x131xf32> -> vector<16x131xf32>
    %cst_128 = arith.constant dense<0.000000e+00> : vector<16x131xf32>
    %317 = tpu.matmul %126, %289, %cst_128 {dimension_numbers = #tpu.dot_dimension_numbers<[1], [0], [0], [1], [0, 0, 1, 1], [], []>} : vector<16x16xf32>, vector<16x131xf32>, vector<16x131xf32> -> vector<16x131xf32>
    %cst_129 = arith.constant dense<0.000000e+00> : vector<16x131xf32>
    %318 = tpu.matmul %142, %289, %cst_129 {dimension_numbers = #tpu.dot_dimension_numbers<[1], [0], [0], [1], [0, 0, 1, 1], [], []>} : vector<16x16xf32>, vector<16x131xf32>, vector<16x131xf32> -> vector<16x131xf32>
    %319 = arith.maximumf %311, %312 : vector<16x131xf32>
    %320 = arith.maximumf %319, %313 : vector<16x131xf32>
    %321 = arith.maximumf %320, %314 : vector<16x131xf32>
    %322 = arith.maximumf %321, %315 : vector<16x131xf32>
    %323 = arith.maximumf %322, %316 : vector<16x131xf32>
    %324 = arith.maximumf %323, %317 : vector<16x131xf32>
    %325 = arith.maximumf %324, %318 : vector<16x131xf32>
    %326 = arith.subf %325, %289 : vector<16x131xf32>
    %327 = tpu.concatenate %289, %326, %144, %161 in 1 : vector<16x131xf32>, vector<16x131xf32>, vector<16x1xf32>, vector<16x1xf32> -> vector<16x264xf32>
    %c0_130 = arith.constant 0 : index
    %c0_131 = arith.constant 0 : index
    %328 = vector.load %arg22[%c0_130, %c0_131] : memref<264x128xf32, #tpu.memory_space<vmem>>, vector<264x128xf32>
    %cst_132 = arith.constant dense<0.000000e+00> : vector<16x128xf32>
    %329 = tpu.matmul %327, %328, %cst_132 {dimension_numbers = #tpu.dot_dimension_numbers<[1], [0], [0], [1], [0, 0, 1, 1], [], []>} : vector<16x264xf32>, vector<264x128xf32>, vector<16x128xf32> -> vector<16x128xf32>
    %c0_133 = arith.constant 0 : index
    %c0_134 = arith.constant 0 : index
    %330 = vector.load %arg23[%c0_133, %c0_134] : memref<1x128xf32, #tpu.memory_space<vmem>>, vector<1x128xf32>
    %331 = vector.broadcast %330 : vector<1x128xf32> to vector<16x128xf32>
    %332 = arith.addf %329, %331 : vector<16x128xf32>
    %cst_135 = arith.constant 0.000000e+00 : f32
    %333 = vector.broadcast %cst_135 : f32 to vector<16x128xf32>
    %334 = arith.cmpf oge, %332, %333 : vector<16x128xf32>
    %cst_136 = arith.constant 2.000000e-01 : f32
    %335 = vector.broadcast %cst_136 : f32 to vector<16x128xf32>
    %336 = arith.mulf %335, %332 : vector<16x128xf32>
    %337 = arith.select %334, %332, %336 : vector<16x128xi1>, vector<16x128xf32>
    %c0_137 = arith.constant 0 : index
    %c0_138 = arith.constant 0 : index
    %338 = vector.load %arg32[%c0_137, %c0_138] : memref<1x2xf32, #tpu.memory_space<vmem>>, vector<1x2xf32>
    %339 = vector.extract_strided_slice %338 {offsets = [0, 0], sizes = [1, 1], strides = [1, 1]} : vector<1x2xf32> to vector<1x1xf32>
    %340 = vector.extract_strided_slice %338 {offsets = [0, 1], sizes = [1, 1], strides = [1, 1]} : vector<1x2xf32> to vector<1x1xf32>
    %341 = vector.broadcast %339 : vector<1x1xf32> to vector<16x128xf32>
    %342 = arith.mulf %341, %310 : vector<16x128xf32>
    %cst_139 = arith.constant 1.000000e+00 : f32
    %343 = vector.broadcast %cst_139 : f32 to vector<1x1xf32>
    %344 = arith.subf %343, %339 : vector<1x1xf32>
    %345 = vector.broadcast %344 : vector<1x1xf32> to vector<16x128xf32>
    %346 = arith.mulf %345, %337 : vector<16x128xf32>
    %347 = arith.addf %342, %346 : vector<16x128xf32>
    %c0_140 = arith.constant 0 : index
    %c0_141 = arith.constant 0 : index
    %348 = vector.load %arg26[%c0_140, %c0_141] : memref<128x128xf32, #tpu.memory_space<vmem>>, vector<128x128xf32>
    %cst_142 = arith.constant dense<0.000000e+00> : vector<16x128xf32>
    %349 = tpu.matmul %189, %348, %cst_142 {dimension_numbers = #tpu.dot_dimension_numbers<[1], [0], [0], [1], [0, 0, 1, 1], [], []>} : vector<16x128xf32>, vector<128x128xf32>, vector<16x128xf32> -> vector<16x128xf32>
    %c0_143 = arith.constant 0 : index
    %c0_144 = arith.constant 0 : index
    %350 = vector.load %arg27[%c0_143, %c0_144] : memref<128x128xf32, #tpu.memory_space<vmem>>, vector<128x128xf32>
    %cst_145 = arith.constant dense<0.000000e+00> : vector<16x128xf32>
    %351 = tpu.matmul %347, %350, %cst_145 {dimension_numbers = #tpu.dot_dimension_numbers<[1], [0], [0], [1], [0, 0, 1, 1], [], []>} : vector<16x128xf32>, vector<128x128xf32>, vector<16x128xf32> -> vector<16x128xf32>
    %c0_146 = arith.constant 0 : index
    %c0_147 = arith.constant 0 : index
    %352 = vector.load %arg28[%c0_146, %c0_147] : memref<128x128xf32, #tpu.memory_space<vmem>>, vector<128x128xf32>
    %cst_148 = arith.constant dense<0.000000e+00> : vector<16x128xf32>
    %353 = tpu.matmul %347, %352, %cst_148 {dimension_numbers = #tpu.dot_dimension_numbers<[1], [0], [0], [1], [0, 0, 1, 1], [], []>} : vector<16x128xf32>, vector<128x128xf32>, vector<16x128xf32> -> vector<16x128xf32>
    %354 = vector.extract_strided_slice %349 {offsets = [0, 0], sizes = [16, 32], strides = [1, 1]} : vector<16x128xf32> to vector<16x32xf32>
    %355 = vector.extract_strided_slice %351 {offsets = [0, 0], sizes = [16, 32], strides = [1, 1]} : vector<16x128xf32> to vector<16x32xf32>
    %356 = vector.extract_strided_slice %353 {offsets = [0, 0], sizes = [16, 32], strides = [1, 1]} : vector<16x128xf32> to vector<16x32xf32>
    %cst_149 = arith.constant dense<0.000000e+00> : vector<16x16xf32>
    %357 = tpu.matmul %354, %355, %cst_149 {dimension_numbers = #tpu.dot_dimension_numbers<[1], [1], [0], [0], [0, 0, 1, 0], [], []>} : vector<16x32xf32>, vector<16x32xf32>, vector<16x16xf32> -> vector<16x16xf32>
    %cst_150 = arith.constant 0.176776692 : f32
    %358 = vector.broadcast %cst_150 : f32 to vector<16x16xf32>
    %359 = arith.mulf %357, %358 : vector<16x16xf32>
    %cst_151 = arith.constant dense<0xFF800000> : vector<16xf32>
    %360 = vector.multi_reduction <maximumf>, %359, %cst_151 [1] : vector<16x16xf32> to vector<16xf32>
    %361 = vector.shape_cast %360 : vector<16xf32> to vector<16x1xf32>
    %362 = vector.broadcast %361 : vector<16x1xf32> to vector<16x16xf32>
    %363 = arith.subf %359, %362 : vector<16x16xf32>
    %364 = math.exp %363 : vector<16x16xf32>
    %cst_152 = arith.constant dense<0.000000e+00> : vector<16xf32>
    %365 = vector.multi_reduction <add>, %364, %cst_152 [1] : vector<16x16xf32> to vector<16xf32>
    %366 = vector.shape_cast %365 : vector<16xf32> to vector<16x1xf32>
    %367 = tpu.reciprocal %366 {approx = true} : vector<16x1xf32> -> vector<16x1xf32>
    %368 = vector.broadcast %367 : vector<16x1xf32> to vector<16x16xf32>
    %369 = arith.mulf %364, %368 : vector<16x16xf32>
    %cst_153 = arith.constant dense<0.000000e+00> : vector<16x32xf32>
    %370 = tpu.matmul %369, %356, %cst_153 {dimension_numbers = #tpu.dot_dimension_numbers<[1], [0], [0], [1], [0, 0, 1, 1], [], []>} : vector<16x16xf32>, vector<16x32xf32>, vector<16x32xf32> -> vector<16x32xf32>
    %371 = vector.extract_strided_slice %349 {offsets = [0, 32], sizes = [16, 32], strides = [1, 1]} : vector<16x128xf32> to vector<16x32xf32>
    %372 = vector.extract_strided_slice %351 {offsets = [0, 32], sizes = [16, 32], strides = [1, 1]} : vector<16x128xf32> to vector<16x32xf32>
    %373 = vector.extract_strided_slice %353 {offsets = [0, 32], sizes = [16, 32], strides = [1, 1]} : vector<16x128xf32> to vector<16x32xf32>
    %cst_154 = arith.constant dense<0.000000e+00> : vector<16x16xf32>
    %374 = tpu.matmul %371, %372, %cst_154 {dimension_numbers = #tpu.dot_dimension_numbers<[1], [1], [0], [0], [0, 0, 1, 0], [], []>} : vector<16x32xf32>, vector<16x32xf32>, vector<16x16xf32> -> vector<16x16xf32>
    %cst_155 = arith.constant 0.176776692 : f32
    %375 = vector.broadcast %cst_155 : f32 to vector<16x16xf32>
    %376 = arith.mulf %374, %375 : vector<16x16xf32>
    %cst_156 = arith.constant dense<0xFF800000> : vector<16xf32>
    %377 = vector.multi_reduction <maximumf>, %376, %cst_156 [1] : vector<16x16xf32> to vector<16xf32>
    %378 = vector.shape_cast %377 : vector<16xf32> to vector<16x1xf32>
    %379 = vector.broadcast %378 : vector<16x1xf32> to vector<16x16xf32>
    %380 = arith.subf %376, %379 : vector<16x16xf32>
    %381 = math.exp %380 : vector<16x16xf32>
    %cst_157 = arith.constant dense<0.000000e+00> : vector<16xf32>
    %382 = vector.multi_reduction <add>, %381, %cst_157 [1] : vector<16x16xf32> to vector<16xf32>
    %383 = vector.shape_cast %382 : vector<16xf32> to vector<16x1xf32>
    %384 = tpu.reciprocal %383 {approx = true} : vector<16x1xf32> -> vector<16x1xf32>
    %385 = vector.broadcast %384 : vector<16x1xf32> to vector<16x16xf32>
    %386 = arith.mulf %381, %385 : vector<16x16xf32>
    %cst_158 = arith.constant dense<0.000000e+00> : vector<16x32xf32>
    %387 = tpu.matmul %386, %373, %cst_158 {dimension_numbers = #tpu.dot_dimension_numbers<[1], [0], [0], [1], [0, 0, 1, 1], [], []>} : vector<16x16xf32>, vector<16x32xf32>, vector<16x32xf32> -> vector<16x32xf32>
    %388 = vector.extract_strided_slice %349 {offsets = [0, 64], sizes = [16, 32], strides = [1, 1]} : vector<16x128xf32> to vector<16x32xf32>
    %389 = vector.extract_strided_slice %351 {offsets = [0, 64], sizes = [16, 32], strides = [1, 1]} : vector<16x128xf32> to vector<16x32xf32>
    %390 = vector.extract_strided_slice %353 {offsets = [0, 64], sizes = [16, 32], strides = [1, 1]} : vector<16x128xf32> to vector<16x32xf32>
    %cst_159 = arith.constant dense<0.000000e+00> : vector<16x16xf32>
    %391 = tpu.matmul %388, %389, %cst_159 {dimension_numbers = #tpu.dot_dimension_numbers<[1], [1], [0], [0], [0, 0, 1, 0], [], []>} : vector<16x32xf32>, vector<16x32xf32>, vector<16x16xf32> -> vector<16x16xf32>
    %cst_160 = arith.constant 0.176776692 : f32
    %392 = vector.broadcast %cst_160 : f32 to vector<16x16xf32>
    %393 = arith.mulf %391, %392 : vector<16x16xf32>
    %cst_161 = arith.constant dense<0xFF800000> : vector<16xf32>
    %394 = vector.multi_reduction <maximumf>, %393, %cst_161 [1] : vector<16x16xf32> to vector<16xf32>
    %395 = vector.shape_cast %394 : vector<16xf32> to vector<16x1xf32>
    %396 = vector.broadcast %395 : vector<16x1xf32> to vector<16x16xf32>
    %397 = arith.subf %393, %396 : vector<16x16xf32>
    %398 = math.exp %397 : vector<16x16xf32>
    %cst_162 = arith.constant dense<0.000000e+00> : vector<16xf32>
    %399 = vector.multi_reduction <add>, %398, %cst_162 [1] : vector<16x16xf32> to vector<16xf32>
    %400 = vector.shape_cast %399 : vector<16xf32> to vector<16x1xf32>
    %401 = tpu.reciprocal %400 {approx = true} : vector<16x1xf32> -> vector<16x1xf32>
    %402 = vector.broadcast %401 : vector<16x1xf32> to vector<16x16xf32>
    %403 = arith.mulf %398, %402 : vector<16x16xf32>
    %cst_163 = arith.constant dense<0.000000e+00> : vector<16x32xf32>
    %404 = tpu.matmul %403, %390, %cst_163 {dimension_numbers = #tpu.dot_dimension_numbers<[1], [0], [0], [1], [0, 0, 1, 1], [], []>} : vector<16x16xf32>, vector<16x32xf32>, vector<16x32xf32> -> vector<16x32xf32>
    %405 = vector.extract_strided_slice %349 {offsets = [0, 96], sizes = [16, 32], strides = [1, 1]} : vector<16x128xf32> to vector<16x32xf32>
    %406 = vector.extract_strided_slice %351 {offsets = [0, 96], sizes = [16, 32], strides = [1, 1]} : vector<16x128xf32> to vector<16x32xf32>
    %407 = vector.extract_strided_slice %353 {offsets = [0, 96], sizes = [16, 32], strides = [1, 1]} : vector<16x128xf32> to vector<16x32xf32>
    %cst_164 = arith.constant dense<0.000000e+00> : vector<16x16xf32>
    %408 = tpu.matmul %405, %406, %cst_164 {dimension_numbers = #tpu.dot_dimension_numbers<[1], [1], [0], [0], [0, 0, 1, 0], [], []>} : vector<16x32xf32>, vector<16x32xf32>, vector<16x16xf32> -> vector<16x16xf32>
    %cst_165 = arith.constant 0.176776692 : f32
    %409 = vector.broadcast %cst_165 : f32 to vector<16x16xf32>
    %410 = arith.mulf %408, %409 : vector<16x16xf32>
    %cst_166 = arith.constant dense<0xFF800000> : vector<16xf32>
    %411 = vector.multi_reduction <maximumf>, %410, %cst_166 [1] : vector<16x16xf32> to vector<16xf32>
    %412 = vector.shape_cast %411 : vector<16xf32> to vector<16x1xf32>
    %413 = vector.broadcast %412 : vector<16x1xf32> to vector<16x16xf32>
    %414 = arith.subf %410, %413 : vector<16x16xf32>
    %415 = math.exp %414 : vector<16x16xf32>
    %cst_167 = arith.constant dense<0.000000e+00> : vector<16xf32>
    %416 = vector.multi_reduction <add>, %415, %cst_167 [1] : vector<16x16xf32> to vector<16xf32>
    %417 = vector.shape_cast %416 : vector<16xf32> to vector<16x1xf32>
    %418 = tpu.reciprocal %417 {approx = true} : vector<16x1xf32> -> vector<16x1xf32>
    %419 = vector.broadcast %418 : vector<16x1xf32> to vector<16x16xf32>
    %420 = arith.mulf %415, %419 : vector<16x16xf32>
    %cst_168 = arith.constant dense<0.000000e+00> : vector<16x32xf32>
    %421 = tpu.matmul %420, %407, %cst_168 {dimension_numbers = #tpu.dot_dimension_numbers<[1], [0], [0], [1], [0, 0, 1, 1], [], []>} : vector<16x16xf32>, vector<16x32xf32>, vector<16x32xf32> -> vector<16x32xf32>
    %422 = tpu.concatenate %370, %387, %404, %421 in 1 : vector<16x32xf32>, vector<16x32xf32>, vector<16x32xf32>, vector<16x32xf32> -> vector<16x128xf32>
    %c0_169 = arith.constant 0 : index
    %c0_170 = arith.constant 0 : index
    %423 = vector.load %arg29[%c0_169, %c0_170] : memref<128x128xf32, #tpu.memory_space<vmem>>, vector<128x128xf32>
    %cst_171 = arith.constant dense<0.000000e+00> : vector<16x128xf32>
    %424 = tpu.matmul %422, %423, %cst_171 {dimension_numbers = #tpu.dot_dimension_numbers<[1], [0], [0], [1], [0, 0, 1, 1], [], []>} : vector<16x128xf32>, vector<128x128xf32>, vector<16x128xf32> -> vector<16x128xf32>
    %425 = tpu.concatenate %189, %424 in 1 : vector<16x128xf32>, vector<16x128xf32> -> vector<16x256xf32>
    %c0_172 = arith.constant 0 : index
    %c0_173 = arith.constant 0 : index
    %426 = vector.load %arg24[%c0_172, %c0_173] : memref<256x128xf32, #tpu.memory_space<vmem>>, vector<256x128xf32>
    %cst_174 = arith.constant dense<0.000000e+00> : vector<16x128xf32>
    %427 = tpu.matmul %425, %426, %cst_174 {dimension_numbers = #tpu.dot_dimension_numbers<[1], [0], [0], [1], [0, 0, 1, 1], [], []>} : vector<16x256xf32>, vector<256x128xf32>, vector<16x128xf32> -> vector<16x128xf32>
    %c0_175 = arith.constant 0 : index
    %c0_176 = arith.constant 0 : index
    %428 = vector.load %arg25[%c0_175, %c0_176] : memref<1x128xf32, #tpu.memory_space<vmem>>, vector<1x128xf32>
    %429 = vector.broadcast %428 : vector<1x128xf32> to vector<16x128xf32>
    %430 = arith.addf %427, %429 : vector<16x128xf32>
    %cst_177 = arith.constant 0.000000e+00 : f32
    %431 = vector.broadcast %cst_177 : f32 to vector<16x128xf32>
    %432 = arith.maximumf %430, %431 : vector<16x128xf32>
    %c0_178 = arith.constant 0 : index
    %c0_179 = arith.constant 0 : index
    %433 = vector.load %arg10[%c0_178, %c0_179] : memref<128x128xf32, #tpu.memory_space<vmem>>, vector<128x128xf32>
    %cst_180 = arith.constant dense<0.000000e+00> : vector<16x128xf32>
    %434 = tpu.matmul %432, %433, %cst_180 {dimension_numbers = #tpu.dot_dimension_numbers<[1], [0], [0], [1], [0, 0, 1, 1], [], []>} : vector<16x128xf32>, vector<128x128xf32>, vector<16x128xf32> -> vector<16x128xf32>
    %c0_181 = arith.constant 0 : index
    %c0_182 = arith.constant 0 : index
    %435 = vector.load %arg11[%c0_181, %c0_182] : memref<1x128xf32, #tpu.memory_space<vmem>>, vector<1x128xf32>
    %436 = vector.broadcast %435 : vector<1x128xf32> to vector<16x128xf32>
    %437 = arith.addf %434, %436 : vector<16x128xf32>
    %cst_183 = arith.constant 0.000000e+00 : f32
    %438 = vector.broadcast %cst_183 : f32 to vector<16x2xf32>
    %439 = tpu.concatenate %3, %153, %154, %155, %156, %157, %438 in 1 : vector<16x1xf32>, vector<16x1xf32>, vector<16x1xf32>, vector<16x1xf32>, vector<16x1xf32>, vector<16x1xf32>, vector<16x2xf32> -> vector<16x8xf32>
    %cst_184 = arith.constant 0.000000e+00 : f32
    %440 = vector.broadcast %cst_184 : f32 to vector<16x7xf32>
    %441 = tpu.concatenate %3, %153, %154, %155, %156, %157, %158, %159, %160, %440 in 1 : vector<16x1xf32>, vector<16x1xf32>, vector<16x1xf32>, vector<16x1xf32>, vector<16x1xf32>, vector<16x1xf32>, vector<16x1xf32>, vector<16x1xf32>, vector<16x1xf32>, vector<16x7xf32> -> vector<16x16xf32>
    %c0_185 = arith.constant 0 : index
    %c0_186 = arith.constant 0 : index
    %442 = vector.load %arg30[%c0_185, %c0_186] : memref<8x32xf32, #tpu.memory_space<vmem>>, vector<8x32xf32>
    %cst_187 = arith.constant dense<0.000000e+00> : vector<16x32xf32>
    %443 = tpu.matmul %439, %442, %cst_187 {dimension_numbers = #tpu.dot_dimension_numbers<[1], [0], [0], [1], [0, 0, 1, 1], [], []>} : vector<16x8xf32>, vector<8x32xf32>, vector<16x32xf32> -> vector<16x32xf32>
    %c0_188 = arith.constant 0 : index
    %c0_189 = arith.constant 0 : index
    %444 = vector.load %arg31[%c0_188, %c0_189] : memref<16x32xf32, #tpu.memory_space<vmem>>, vector<16x32xf32>
    %cst_190 = arith.constant dense<0.000000e+00> : vector<16x32xf32>
    %445 = tpu.matmul %441, %444, %cst_190 {dimension_numbers = #tpu.dot_dimension_numbers<[1], [0], [0], [1], [0, 0, 1, 1], [], []>} : vector<16x16xf32>, vector<16x32xf32>, vector<16x32xf32> -> vector<16x32xf32>
    %cst_191 = arith.constant dense<0.000000e+00> : vector<16x16xf32>
    %446 = tpu.matmul %443, %445, %cst_191 {dimension_numbers = #tpu.dot_dimension_numbers<[1], [1], [0], [0], [0, 0, 1, 0], [], []>} : vector<16x32xf32>, vector<16x32xf32>, vector<16x16xf32> -> vector<16x16xf32>
    %cst_192 = arith.constant dense<0xFF800000> : vector<16xf32>
    %447 = vector.multi_reduction <maximumf>, %446, %cst_192 [1] : vector<16x16xf32> to vector<16xf32>
    %448 = vector.shape_cast %447 : vector<16xf32> to vector<16x1xf32>
    %449 = vector.broadcast %448 : vector<16x1xf32> to vector<16x16xf32>
    %450 = arith.subf %446, %449 : vector<16x16xf32>
    %451 = math.exp %450 : vector<16x16xf32>
    %cst_193 = arith.constant dense<0.000000e+00> : vector<16xf32>
    %452 = vector.multi_reduction <add>, %451, %cst_193 [1] : vector<16x16xf32> to vector<16xf32>
    %453 = vector.shape_cast %452 : vector<16xf32> to vector<16x1xf32>
    %454 = tpu.reciprocal %453 {approx = true} : vector<16x1xf32> -> vector<16x1xf32>
    %455 = vector.broadcast %454 : vector<16x1xf32> to vector<16x16xf32>
    %456 = arith.mulf %451, %455 : vector<16x16xf32>
    %cst_194 = arith.constant dense<0.000000e+00> : vector<16x128xf32>
    %457 = tpu.matmul %456, %437, %cst_194 {dimension_numbers = #tpu.dot_dimension_numbers<[1], [0], [0], [1], [0, 0, 1, 1], [], []>} : vector<16x16xf32>, vector<16x128xf32>, vector<16x128xf32> -> vector<16x128xf32>
    %458 = vector.broadcast %340 : vector<1x1xf32> to vector<16x128xf32>
    %459 = arith.mulf %458, %457 : vector<16x128xf32>
    %460 = arith.addf %437, %459 : vector<16x128xf32>
    %c0_195 = arith.constant 0 : index
    %c0_196 = arith.constant 0 : index
    %c0_197 = arith.constant 0 : index
    %461 = vector.load %arg33[%c0_195, %c0_196, %c0_197] : memref<1x16x128xf32, #tpu.memory_space<vmem>>, vector<1x16x128xf32>
    %462 = vector.shape_cast %461 : vector<1x16x128xf32> to vector<16x128xf32>
    %463 = vector.shape_cast %460 : vector<16x128xf32> to vector<1x16x128xf32>
    tpu.vector_store %arg33[%c0_195, %c0_196, %c0_197], %463 {strides = array<i32>} : memref<1x16x128xf32, #tpu.memory_space<vmem>>, vector<1x16x128xf32>,
    return
  }
  func.func @transform_0(%arg0: i32) -> (i32, i32, i32) {
    %c0_i32 = arith.constant 0 : i32
    %c0_i32_0 = arith.constant 0 : i32
    %c0_i32_1 = arith.constant 0 : i32
    return %arg0, %c0_i32, %c0_i32_0 : i32, i32, i32
  }
  func.func @transform_1(%arg0: i32) -> (i32, i32) {
    %c0_i32 = arith.constant 0 : i32
    %c0_i32_0 = arith.constant 0 : i32
    %c0_i32_1 = arith.constant 0 : i32
    return %c0_i32, %c0_i32_0 : i32, i32
  }
  func.func @transform_2(%arg0: i32) -> (i32, i32) {
    %c0_i32 = arith.constant 0 : i32
    %c0_i32_0 = arith.constant 0 : i32
    %c0_i32_1 = arith.constant 0 : i32
    return %c0_i32, %c0_i32_0 : i32, i32
  }
  func.func @transform_3(%arg0: i32) -> (i32, i32) {
    %c0_i32 = arith.constant 0 : i32
    %c0_i32_0 = arith.constant 0 : i32
    %c0_i32_1 = arith.constant 0 : i32
    return %c0_i32, %c0_i32_0 : i32, i32
  }
  func.func @transform_4(%arg0: i32) -> (i32, i32) {
    %c0_i32 = arith.constant 0 : i32
    %c0_i32_0 = arith.constant 0 : i32
    %c0_i32_1 = arith.constant 0 : i32
    return %c0_i32, %c0_i32_0 : i32, i32
  }
  func.func @transform_5(%arg0: i32) -> (i32, i32) {
    %c0_i32 = arith.constant 0 : i32
    %c0_i32_0 = arith.constant 0 : i32
    %c0_i32_1 = arith.constant 0 : i32
    return %c0_i32, %c0_i32_0 : i32, i32
  }
  func.func @transform_6(%arg0: i32) -> (i32, i32) {
    %c0_i32 = arith.constant 0 : i32
    %c0_i32_0 = arith.constant 0 : i32
    %c0_i32_1 = arith.constant 0 : i32
    return %c0_i32, %c0_i32_0 : i32, i32
  }
  func.func @transform_7(%arg0: i32) -> (i32, i32) {
    %c0_i32 = arith.constant 0 : i32
    %c0_i32_0 = arith.constant 0 : i32
    %c0_i32_1 = arith.constant 0 : i32
    return %c0_i32, %c0_i32_0 : i32, i32
  }
  func.func @transform_8(%arg0: i32) -> (i32, i32) {
    %c0_i32 = arith.constant 0 : i32
    %c0_i32_0 = arith.constant 0 : i32
    %c0_i32_1 = arith.constant 0 : i32
    return %c0_i32, %c0_i32_0 : i32, i32
  }
  func.func @transform_9(%arg0: i32) -> (i32, i32) {
    %c0_i32 = arith.constant 0 : i32
    %c0_i32_0 = arith.constant 0 : i32
    %c0_i32_1 = arith.constant 0 : i32
    return %c0_i32, %c0_i32_0 : i32, i32
  }
  func.func @transform_10(%arg0: i32) -> (i32, i32) {
    %c0_i32 = arith.constant 0 : i32
    %c0_i32_0 = arith.constant 0 : i32
    %c0_i32_1 = arith.constant 0 : i32
    return %c0_i32, %c0_i32_0 : i32, i32
  }
  func.func @transform_11(%arg0: i32) -> (i32, i32) {
    %c0_i32 = arith.constant 0 : i32
    %c0_i32_0 = arith.constant 0 : i32
    %c0_i32_1 = arith.constant 0 : i32
    return %c0_i32, %c0_i32_0 : i32, i32
  }
  func.func @transform_12(%arg0: i32) -> (i32, i32) {
    %c0_i32 = arith.constant 0 : i32
    %c0_i32_0 = arith.constant 0 : i32
    %c0_i32_1 = arith.constant 0 : i32
    return %c0_i32, %c0_i32_0 : i32, i32
  }
  func.func @transform_13(%arg0: i32) -> (i32, i32) {
    %c0_i32 = arith.constant 0 : i32
    %c0_i32_0 = arith.constant 0 : i32
    %c0_i32_1 = arith.constant 0 : i32
    return %c0_i32, %c0_i32_0 : i32, i32
  }
  func.func @transform_14(%arg0: i32) -> (i32, i32) {
    %c0_i32 = arith.constant 0 : i32
    %c0_i32_0 = arith.constant 0 : i32
    %c0_i32_1 = arith.constant 0 : i32
    return %c0_i32, %c0_i32_0 : i32, i32
  }
  func.func @transform_15(%arg0: i32) -> (i32, i32) {
    %c0_i32 = arith.constant 0 : i32
    %c0_i32_0 = arith.constant 0 : i32
    %c0_i32_1 = arith.constant 0 : i32
    return %c0_i32, %c0_i32_0 : i32, i32
  }
  func.func @transform_16(%arg0: i32) -> (i32, i32) {
    %c0_i32 = arith.constant 0 : i32
    %c0_i32_0 = arith.constant 0 : i32
    %c0_i32_1 = arith.constant 0 : i32
    return %c0_i32, %c0_i32_0 : i32, i32
  }
  func.func @transform_17(%arg0: i32) -> (i32, i32) {
    %c0_i32 = arith.constant 0 : i32
    %c0_i32_0 = arith.constant 0 : i32
    %c0_i32_1 = arith.constant 0 : i32
    return %c0_i32, %c0_i32_0 : i32, i32
  }
  func.func @transform_18(%arg0: i32) -> (i32, i32) {
    %c0_i32 = arith.constant 0 : i32
    %c0_i32_0 = arith.constant 0 : i32
    %c0_i32_1 = arith.constant 0 : i32
    return %c0_i32, %c0_i32_0 : i32, i32
  }
  func.func @transform_19(%arg0: i32) -> (i32, i32) {
    %c0_i32 = arith.constant 0 : i32
    %c0_i32_0 = arith.constant 0 : i32
    %c0_i32_1 = arith.constant 0 : i32
    return %c0_i32, %c0_i32_0 : i32, i32
  }
  func.func @transform_20(%arg0: i32) -> (i32, i32) {
    %c0_i32 = arith.constant 0 : i32
    %c0_i32_0 = arith.constant 0 : i32
    %c0_i32_1 = arith.constant 0 : i32
    return %c0_i32, %c0_i32_0 : i32, i32
  }
  func.func @transform_21(%arg0: i32) -> (i32, i32) {
    %c0_i32 = arith.constant 0 : i32
    %c0_i32_0 = arith.constant 0 : i32
    %c0_i32_1 = arith.constant 0 : i32
    return %c0_i32, %c0_i32_0 : i32, i32
  }
  func.func @transform_22(%arg0: i32) -> (i32, i32) {
    %c0_i32 = arith.constant 0 : i32
    %c0_i32_0 = arith.constant 0 : i32
    %c0_i32_1 = arith.constant 0 : i32
    return %c0_i32, %c0_i32_0 : i32, i32
  }
  func.func @transform_23(%arg0: i32) -> (i32, i32) {
    %c0_i32 = arith.constant 0 : i32
    %c0_i32_0 = arith.constant 0 : i32
    %c0_i32_1 = arith.constant 0 : i32
    return %c0_i32, %c0_i32_0 : i32, i32
  }
  func.func @transform_24(%arg0: i32) -> (i32, i32) {
    %c0_i32 = arith.constant 0 : i32
    %c0_i32_0 = arith.constant 0 : i32
    %c0_i32_1 = arith.constant 0 : i32
    return %c0_i32, %c0_i32_0 : i32, i32
  }
  func.func @transform_25(%arg0: i32) -> (i32, i32) {
    %c0_i32 = arith.constant 0 : i32
    %c0_i32_0 = arith.constant 0 : i32
    %c0_i32_1 = arith.constant 0 : i32
    return %c0_i32, %c0_i32_0 : i32, i32
  }
  func.func @transform_26(%arg0: i32) -> (i32, i32) {
    %c0_i32 = arith.constant 0 : i32
    %c0_i32_0 = arith.constant 0 : i32
    %c0_i32_1 = arith.constant 0 : i32
    return %c0_i32, %c0_i32_0 : i32, i32
  }
  func.func @transform_27(%arg0: i32) -> (i32, i32) {
    %c0_i32 = arith.constant 0 : i32
    %c0_i32_0 = arith.constant 0 : i32
    %c0_i32_1 = arith.constant 0 : i32
    return %c0_i32, %c0_i32_0 : i32, i32
  }
  func.func @transform_28(%arg0: i32) -> (i32, i32) {
    %c0_i32 = arith.constant 0 : i32
    %c0_i32_0 = arith.constant 0 : i32
    %c0_i32_1 = arith.constant 0 : i32
    return %c0_i32, %c0_i32_0 : i32, i32
  }
  func.func @transform_29(%arg0: i32) -> (i32, i32) {
    %c0_i32 = arith.constant 0 : i32
    %c0_i32_0 = arith.constant 0 : i32
    %c0_i32_1 = arith.constant 0 : i32
    return %c0_i32, %c0_i32_0 : i32, i32
  }
  func.func @transform_30(%arg0: i32) -> (i32, i32) {
    %c0_i32 = arith.constant 0 : i32
    %c0_i32_0 = arith.constant 0 : i32
    %c0_i32_1 = arith.constant 0 : i32
    return %c0_i32, %c0_i32_0 : i32, i32
  }
  func.func @transform_31(%arg0: i32) -> (i32, i32) {
    %c0_i32 = arith.constant 0 : i32
    %c0_i32_0 = arith.constant 0 : i32
    %c0_i32_1 = arith.constant 0 : i32
    return %c0_i32, %c0_i32_0 : i32, i32
  }
  func.func @transform_32(%arg0: i32) -> (i32, i32, i32) {
    %c0_i32 = arith.constant 0 : i32
    %c0_i32_0 = arith.constant 0 : i32
    %c0_i32_1 = arith.constant 0 : i32
    return %arg0, %c0_i32, %c0_i32_0 : i32, i32, i32
  }
}

</mosaic_0001>

<bundles_post_ra>
// kernel: forward.1
= control target key start
LH: loop header
LB: loop body
LE: loop exit
PB: predicated region body
PF: predicated region fallthrough
CT: control target
= control target key end

     0   :  { %s10353_s6 = smov 1   ;;  %s10354_s10 = smov 2   ;;  %s11933_s0 = inlined_call_operand.smem [shape: u32[33], index: -1, kind: input, shape index: {}] }
   0x1   :  { %s10431_s5 = sld [smem:[%s11933_s0]]   ;;  %s10355_s14 = smov 3  }
   0x2   :  { %s10436_s9 = sld [smem:[%s11933_s0 + %s10353_s6]]   ;;  %s10356_s18 = smov 4  }
   0x3   :  { %s10441_s13 = sld [smem:[%s11933_s0 + %s10354_s10]]   ;;  %s10357_s22 = smov 5  }
   0x4   :  { %s10446_s17 = sld [smem:[%s11933_s0 + %s10355_s14]]   ;;  %s10358_s26 = smov 6  }
   0x5   :  { %s10451_s21 = sld [smem:[%s11933_s0 + %s10356_s18]]   ;;  %s10359_s30 = smov 7  }
   0x6   :  { %s10456_s25 = sld [smem:[%s11933_s0 + %s10357_s22]]   ;;  %s10360_s4 = smov 8  }
   0x7   :  { %11978 = sst [smem:[#allocation40_spill]] %s10431_s5  ;;  %s10361_s10 = smov 9  }
   0x8   :  { %s10461_s29 = sld [smem:[%s11933_s0 + %s10358_s26]]   ;;  %s10362_s15 = smov 10  }
   0x9   :  { %11979 = sst [smem:[#allocation41_spill]] %s10441_s13  ;;  %s10363_s20 = smov 11  }
   0xa   :  { %11980 = sst [smem:[#allocation42_spill]] %s10446_s17  ;;  %s10364_s26 = smov 12  }
   0xb   :  { %s10466_s3 = sld [smem:[%s11933_s0 + %s10359_s30]]   ;;  %s10365_s1 = smov 13  }
   0xc   :  { %11981 = sst [smem:[#allocation43_spill]] %s10456_s25  ;;  %s10366_s7 = smov 14  }
   0xd   :  { %s10471_s8 = sld [smem:[%s11933_s0 + %s10360_s4]]   ;;  %s10368_s22 = smov 16  }
   0xe   :  { %s10476_s14 = sld [smem:[%s11933_s0 + %s10361_s10]]   ;;  %s10369_s28 = smov 17  }
   0xf   :  { %s10481_s19 = sld [smem:[%s11933_s0 + %s10362_s15]]   ;;  %s10367_s15 = smov 15  }
  0x10   :  { %s10486_s24 = sld [smem:[%s11933_s0 + %s10363_s20]]  }
  0x11   :  { %11982 = sst [smem:[#allocation44_spill]] %s10466_s3 }
  0x12   :  { %s10491_s30 = sld [smem:[%s11933_s0 + %s10364_s26]]  }
  0x13   :  { %s10496_s6 = sld [smem:[%s11933_s0 + %s10365_s1]]  }
  0x14   :  { %11983 = sst [smem:[#allocation45_spill]] %s10476_s14 }
  0x15   :  { %s10501_s12 = sld [smem:[%s11933_s0 + %s10366_s7]]   ;;  %s10370_s7 = smov 18  }
  0x16   :  { %s10506_s20 = sld [smem:[%s11933_s0 + %s10367_s15]]   ;;  %s10371_s15 = smov 19  }
  0x17   :  { %s10511_s27 = sld [smem:[%s11933_s0 + %s10368_s22]]   ;;  %s10372_s22 = smov 20  }
  0x18   :  { %s10516_s4 = sld [smem:[%s11933_s0 + %s10369_s28]]   ;;  %s10373_s28 = smov 21  }
  0x19   :  { %11984 = sst [smem:[#allocation46_spill]] %s10496_s6 }
  0x1a   :  { %s10521_s14 = sld [smem:[%s11933_s0 + %s10370_s7]]   ;;  %s10374_s7 = smov 22  }
  0x1c   :  { %11985 = sst [smem:[#allocation47_spill]] %s10506_s20 }
  0x1d   :  { %11986 = sst [smem:[#allocation48_spill]] %s10511_s27 }
  0x1e   :  { %11987 = sst [smem:[#allocation49_spill]] %s10516_s4 }
  0x1f   :  { %s10526_s20 = sld [smem:[%s11933_s0 + %s10371_s15]]   ;;  %s10375_s15 = smov 23  }
  0x20   :  { %11988 = sst [smem:[#allocation50_spill]] %s10521_s14 }
  0x21   :  { %s10531_s27 = sld [smem:[%s11933_s0 + %s10372_s22]]   ;;  %s10376_s22 = smov 24  }
  0x22   :  { %s10536_s4 = sld [smem:[%s11933_s0 + %s10373_s28]]   ;;  %s10377_s28 = smov 25  }
  0x23   :  { %s10541_s14 = sld [smem:[%s11933_s0 + %s10374_s7]]   ;;  %s10378_s7 = smov 26  }
  0x25   :  { %11989 = sst [smem:[#allocation51_spill]] %s10526_s20 }
  0x26   :  { %s10546_s20 = sld [smem:[%s11933_s0 + %s10375_s15]]   ;;  %s10379_s15 = smov 27  }
  0x27   :  { %11990 = sst [smem:[#allocation52_spill]] %s10531_s27 }
  0x28   :  { %11991 = sst [smem:[#allocation53_spill]] %s10536_s4 }
  0x29   :  { %11992 = sst [smem:[#allocation54_spill]] %s10541_s14 }
  0x2a   :  { %s10551_s27 = sld [smem:[%s11933_s0 + %s10376_s22]]   ;;  %s10380_s22 = smov 28  }
  0x2b   :  { %s10556_s4 = sld [smem:[%s11933_s0 + %s10377_s28]]   ;;  %s10381_s28 = smov 29  }
  0x2c   :  { %11993 = sst [smem:[#allocation55_spill]] %s10546_s20 }
  0x2d   :  { %s10561_s14 = sld [smem:[%s11933_s0 + %s10378_s7]]   ;;  %s10382_s7 = smov 30  }
  0x2e   :  { %s10566_s13 = sld [smem:[%s11933_s0 + %s10379_s15]]   ;;  %s10383_s15 = smov 31  }
  0x2f   :  { %s10576_s5 = sld [smem:[%s11933_s0 + %s10381_s28]]  }
  0x30   :  { %11994 = sst [smem:[#allocation56_spill]] %s10551_s27 }
  0x31   :  { %11995 = sst [smem:[#allocation57_spill]] %s10556_s4 }
  0x32   :  { %s10571_s27 = sld [smem:[%s11933_s0 + %s10380_s22]]   ;;  %s10384_s22 = smov 32  }
  0x33   :  { %11996 = sst [smem:[#allocation58_spill]] %s10561_s14 }
  0x34   :  { %s10581_s14 = sld [smem:[%s11933_s0 + %s10382_s7]]  }
  0x35   :  { %11998 = sst [smem:[#allocation60_spill]] %s10576_s5 }
  0x36   :  { %s10586_s20 = sld [smem:[%s11933_s0 + %s10383_s15]]  }
  0x38   :  { %11997 = sst [smem:[#allocation59_spill]] %s10571_s27 }
  0x39   :  { %s10591_s27 = sld [smem:[%s11933_s0 + %s10384_s22]]  }
  0x3a   :  { %70 = vsyncpa [#allocation3], 0 }
  0x3b   :  { %71 = vsyncpa [#allocation6], 0 }
  0x3c   :  { %72 = vsyncpa [#allocation9], 0 }
  0x3d   :  { %73 = vsyncpa [#allocation12], 0 }
  0x3e   :  { %74 = vsyncpa [#allocation15], 0 }
  0x3f   :  { %75 = vsyncpa [#allocation18], 0 }
  0x40   :  { %76 = vsyncpa [#allocation21], 0 }
  0x41   :  { %77 = vsyncpa [#allocation24], 0 }
  0x42   :  { %78 = vsyncpa [#allocation27], 0 }
  0x43   :  { %79 = vsyncpa [#allocation4], 0 }
  0x44   :  { %81 = vsyncpa [#allocation4 + $0x1], 0  ;;  %s10593_s28 = smov 0   ;;  %s10595_s1 = smov 0  }
  0x45   :  { %s10597_s2 = smov 0   ;;  %s10599_s7 = smov 0  }
  0x46 LB: > { %s11999_s6 = sld [smem:[#allocation46_spill]]  ;;  %s12000_s4 = sld [smem:[#allocation57_spill]]  ;;  %s10339_s28 = sphi %s10593_s28, %s12085_s28   ;;  %s10351_s7 = sphi %s10599_s7, %s12082_s7   ;;  %s10347_s2 = sphi %s10597_s2, %s12084_s2   ;;  %s10343_s1 = sphi %s10595_s1, %s12086_s1  }
  0x47   : > { %s12001_s3 = sld [smem:[#allocation44_spill]]  ;;  %s12002_s25 = sld [smem:[#allocation43_spill]] }
  0x48   : > { %s12003_s17 = sld [smem:[#allocation42_spill]]  ;;  %12004 = sst [smem:[#allocation61_spill]] %s10339_s28 }
  0x49   : > { %12005 = sst [smem:[#allocation62_spill]] %s10347_s2  ;;  %s10614_s0 = sadd.s32 4294967295, %s10351_s7  }
  0x4a   : > { %12006 = sst [smem:[#allocation63_spill]] %s10351_s7  ;;  %s7790_s10 = sadd.s32 4294967294, %s10351_s7  }
  0x4b   : > { %s10618_s11 = sadd.s32 1, %s10351_s7   ;;  %s771_s15 = sadd.s32 1, %s10347_s2 }
  0x4c   : > { %12007 = sst [smem:[#allocation64_spill]] %s10618_s11  ;;  %s768_s16 = ssub.s32 %s10351_s7, %s10618_s11 }
  0x4d   : > { %p781_p0 = scmp.ne.s32.totalorder %s10347_s2, %s10343_s1  ;;  %p769_p1 = scmp.eq.s32.totalorder %s768_s16, 0 }
  0x4e   : > { %p782_p2 = scmp.eq.s32.totalorder %s10614_s0, 1  ;;  %p787_p3 = scmp.ne.s32.totalorder %s10343_s1, %s10339_s28 }
  0x4f   : > { %p788_p4 = scmp.eq.s32.totalorder %s7790_s10, 1  ;;  %p7791_p7 = scmp.ge.s32.totalorder %s10351_s7, 1 }
  0x50   : > { %s10629_s18 = scalar_select %p769_p1, %s10347_s2, %s771_s15  }
  0x51   : > { %p10631_p5 = por %p782_p2, %p781_p0  ;;  %p10635_p6 = por %p788_p4, %p787_p3 }
  0x52   : > { %12008 = sst [smem:[#allocation65_spill]] %s10629_s18  ;;  %p795_p8 = scmp.lt.s32.totalorder %s10351_s7, 3 }
  0x53   : > { %s12009_s22 = scalar_select %p10631_p5, 1, 0 }
  0x54   : > { %s12010_s23 = scalar_select %p10635_p6, 1, 0 }
  0x55   : > { %p11947_p9 = scmp.eq.s32.totalorder %s10614_s0, 0  ;;  %p10642_p10 = pnand %p7791_p7, %p795_p8 }
  0x56   : > { %12011 = sst [smem:[#allocation66_spill]] %s12010_s23  ;;  %s10385_s10 = smov [#allocation5]  }
  0x57   : > { %s12012_s26 = scalar_select %p10642_p10, 1, 0 }
  0x58   : > { %s821_s15 = sshll.u32 %s10385_s10, 4  ;;  %p9487_p11 = pneg %p10642_p10  ;;  %s10648_s15 = int_to_ptr.vmem [resolvable:$true] %s821_s15 }
  0x59   : > { %s10386_s18 = smov [#allocation8]   ;;  %s10387_s11 = smov [#allocation11]  }
  0x5a   : > { %p10652_p12 = pnand %p11947_p9, %p9487_p11  ;;  %s845_s2 = sshll.u32 %s10386_s18, 4  ;;  %s10656_s2 = int_to_ptr.vmem [resolvable:$true] %s845_s2 }
  0x5b   : > { %s10658_s23 = sshll.u32 %s10387_s11, 4  ;;  %s9777_s28 = scalar_lea.hbm %s12003_s17, 1024  ;;  %s870_s23 = int_to_ptr.vmem [resolvable:$true] %s10658_s23 }
  0x5c   : > { %p9778_p13 = scmp.ne.s32.totalorder %s12003_s17, %s9777_s28  ;;  %p10664_p0 = pneg %p10652_p12 }
  0x5d   : > { %p9784_p3 = scmp.lt.u32.totalorder %s9777_s28, %s12003_s17 }
  0x5e   : > { %p9780_p1 = pnand %p10664_p0, %p9778_p13 }
  0x60   : > { %p9781_p2 = pneg %p9780_p1 }
  0x62   : > { %p9786_p4 = pnand %p9784_p3, %p9781_p2 }
  0x64   : > { %9789 = shalt.err (!%p9786_p4)
}
  0x65   : > { %s9790_s11 = scalar_lea.vmem %s10648_s15, 1024  ;;  %p9798_p9 = scmp.lt.s32.totalorder %s10648_s15, %s10648_s15 }
  0x66   : > { %p9791_p7 = scmp.ne.s32.totalorder %s10648_s15, %s9790_s11  ;;  %p9799_p6 = scmp.lt.s32.totalorder %s9790_s11, %s9790_s11 }
  0x68   : > { %p9793_p8 = pnand %p9791_p7, %p10664_p0  ;;  %p9800_p5 = por %p9799_p6, %p9798_p9 }
  0x6a   : > { %p9794_p11 = pneg %p9793_p8 }
  0x6c   : > { %p9801_p10 = pnand %p9800_p5, %p9794_p11 }
  0x6e   : > { %9804 = shalt.err (!%p9801_p10)
}
  0x6f   : > { %s11953_s18 = smov 128   ;;  %s11955_s28 = smov 8  }
  0x70   : > { %9493 = dma.hbm_to_vmem [thread:$0]  (!%p10652_p12), %s12003_s17, 1024, %s10648_s15, [#allocation6], %s11953_s18, %s11953_s18, %s11955_s28  }
  0x71   : > { %s9805_s7 = scalar_lea.hbm %s12002_s25, 1024 }
  0x72   : > { %p9806_p13 = scmp.ne.s32.totalorder %s12002_s25, %s9805_s7  ;;  %p9812_p9 = scmp.lt.u32.totalorder %s9805_s7, %s12002_s25 }
  0x74   : > { %p9808_p6 = pnand %p9806_p13, %p10664_p0 }
  0x76   : > { %p9809_p5 = pneg %p9808_p6 }
  0x78   : > { %p9814_p10 = pnand %p9812_p9, %p9809_p5 }
  0x7a   : > { %9817 = shalt.err (!%p9814_p10)
}
  0x7b   : > { %s9818_s11 = scalar_lea.vmem %s10656_s2, 1024  ;;  %p9826_p4 = scmp.lt.s32.totalorder %s10656_s2, %s10656_s2 }
  0x7c   : > { %p9819_p1 = scmp.ne.s32.totalorder %s10656_s2, %s9818_s11  ;;  %p9827_p7 = scmp.lt.s32.totalorder %s9818_s11, %s9818_s11 }
  0x7e   : > { %p9821_p2 = pnand %p9819_p1, %p10664_p0  ;;  %p9828_p8 = por %p9827_p7, %p9826_p4 }
  0x80   : > { %p9822_p3 = pneg %p9821_p2 }
  0x82   : > { %p9829_p11 = pnand %p9828_p8, %p9822_p3 }
  0x84   : > { %9832 = shalt.err (!%p9829_p11)
}
  0x85   : > { %9499 = dma.hbm_to_vmem [thread:$0]  (!%p10652_p12), %s12002_s25, 1024, %s10656_s2, [#allocation9], %s11953_s18, %s11953_s18, %s11955_s28  }
  0x86   : > { %s9833_s7 = scalar_lea.hbm %s12001_s3, 1024 }
  0x87   : > { %p9834_p13 = scmp.ne.s32.totalorder %s12001_s3, %s9833_s7  ;;  %p9840_p9 = scmp.lt.u32.totalorder %s9833_s7, %s12001_s3 }
  0x89   : > { %p9836_p6 = pnand %p9834_p13, %p10664_p0 }
  0x8b   : > { %p9837_p5 = pneg %p9836_p6 }
  0x8d   : > { %p9842_p10 = pnand %p9840_p9, %p9837_p5 }
  0x8f   : > { %9845 = shalt.err (!%p9842_p10)
}
  0x90   : > { %s9846_s15 = scalar_lea.vmem %s870_s23, 1024  ;;  %p9854_p4 = scmp.lt.s32.totalorder %s870_s23, %s870_s23 }
  0x91   : > { %p9847_p1 = scmp.ne.s32.totalorder %s870_s23, %s9846_s15  ;;  %p9855_p7 = scmp.lt.s32.totalorder %s9846_s15, %s9846_s15 }
  0x93   : > { %p9849_p2 = pnand %p9847_p1, %p10664_p0  ;;  %p9856_p8 = por %p9855_p7, %p9854_p4 }
  0x95   : > { %p9850_p3 = pneg %p9849_p2 }
  0x97   : > { %p9857_p11 = pnand %p9856_p8, %p9850_p3 }
  0x99   : > { %9860 = shalt.err (!%p9857_p11)
}
  0x9a   : > { %9505 = dma.hbm_to_vmem [thread:$0]  (!%p10652_p12), %s12001_s3, 1024, %s870_s23, [#allocation12], %s11953_s18, %s11953_s18, %s11955_s28  }
  0x9b   : > { %s10390_s2 = smov [#allocation14]   ;;  %s10391_s7 = smov [#allocation17]  }
  0x9c   : > { %s897_s11 = sshll.u32 %s10390_s2, 4  ;;  %s919_s17 = sshll.u32 %s10391_s7, 4  ;;  %s898_s11 = int_to_ptr.vmem [resolvable:$true] %s897_s11  ;;  %s920_s17 = int_to_ptr.vmem [resolvable:$true] %s919_s17 }
  0x9d   : > { %s9861_s15 = scalar_lea.hbm %s10481_s19, 16 }
  0x9e   : > { %p9862_p13 = scmp.ne.s32.totalorder %s10481_s19, %s9861_s15  ;;  %p9868_p9 = scmp.lt.u32.totalorder %s9861_s15, %s10481_s19 }
  0xa0   : > { %p9864_p6 = pnand %p9862_p13, %p10664_p0 }
  0xa2   : > { %p9865_p5 = pneg %p9864_p6 }
  0xa4   : > { %p9870_p10 = pnand %p9868_p9, %p9865_p5 }
  0xa6   : > { %9873 = shalt.err (!%p9870_p10)
}
  0xa7   : > { %s9874_s25 = scalar_lea.vmem %s898_s11, 16  ;;  %s9881_s23 = scalar_lea.vmem %s898_s11, 32 }
  0xa8   : > { %p9875_p1 = scmp.ne.s32.totalorder %s898_s11, %s9874_s25  ;;  %p9882_p4 = scmp.lt.s32.totalorder %s898_s11, %s898_s11 }
  0xa9   : > { %p9883_p7 = scmp.lt.s32.totalorder %s9881_s23, %s9874_s25 }
  0xaa   : > { %p9877_p2 = pnand %p9875_p1, %p10664_p0 }
  0xab   : > { %p9884_p8 = por %p9883_p7, %p9882_p4 }
  0xac   : > { %p9878_p3 = pneg %p9877_p2 }
  0xae   : > { %p9885_p11 = pnand %p9884_p8, %p9878_p3 }
  0xb0   : > { %9888 = shalt.err (!%p9885_p11)
}
  0xb1   : > { %9511 = dma.hbm_to_vmem [thread:$0]  (!%p10652_p12), %s10481_s19, 16, %s898_s11, [#allocation15]  }
  0xb2   : > { %s9889_s2 = scalar_lea.hbm %s10491_s30, 16 }
  0xb3   : > { %p9890_p13 = scmp.ne.s32.totalorder %s10491_s30, %s9889_s2  ;;  %p9896_p9 = scmp.lt.u32.totalorder %s9889_s2, %s10491_s30 }
  0xb5   : > { %p9892_p6 = pnand %p9890_p13, %p10664_p0 }
  0xb7   : > { %p9893_p5 = pneg %p9892_p6 }
  0xb9   : > { %p9898_p10 = pnand %p9896_p9, %p9893_p5 }
  0xbb   : > { %9901 = shalt.err (!%p9898_p10)
}
  0xbc   : > { %s9902_s25 = scalar_lea.vmem %s920_s17, 16  ;;  %s9909_s7 = scalar_lea.vmem %s920_s17, 32 }
  0xbd   : > { %p9903_p1 = scmp.ne.s32.totalorder %s920_s17, %s9902_s25  ;;  %p9910_p4 = scmp.lt.s32.totalorder %s920_s17, %s920_s17 }
  0xbe   : > { %p9911_p7 = scmp.lt.s32.totalorder %s9909_s7, %s9902_s25 }
  0xbf   : > { %p9905_p2 = pnand %p9903_p1, %p10664_p0 }
  0xc0   : > { %p9912_p8 = por %p9911_p7, %p9910_p4 }
  0xc1   : > { %p9906_p3 = pneg %p9905_p2 }
  0xc3   : > { %p9913_p11 = pnand %p9912_p8, %p9906_p3 }
  0xc5   : > { %9916 = shalt.err (!%p9913_p11)
}
  0xc6   : > { %9517 = dma.hbm_to_vmem [thread:$0]  (!%p10652_p12), %s10491_s30, 16, %s920_s17, [#allocation18]  }
  0xc7   : > { %s10392_s11 = smov [#allocation20]   ;;  %s10393_s23 = smov [#allocation23]  }
  0xc8   : > { %s941_s15 = sshll.u32 %s10392_s11, 4  ;;  %s991_s2 = sshll.u32 %s10393_s23, 4  ;;  %s942_s15 = int_to_ptr.vmem [resolvable:$true] %s941_s15  ;;  %s992_s2 = int_to_ptr.vmem [resolvable:$true] %s991_s2 }
  0xc9   : > { %s9917_s18 = scalar_lea.hbm %s10501_s12, 16 }
  0xca   : > { %p9918_p13 = scmp.ne.s32.totalorder %s10501_s12, %s9917_s18  ;;  %p9924_p9 = scmp.lt.u32.totalorder %s9917_s18, %s10501_s12 }
  0xcc   : > { %p9920_p6 = pnand %p9918_p13, %p10664_p0 }
  0xce   : > { %p9921_p5 = pneg %p9920_p6 }
  0xd0   : > { %p9926_p10 = pnand %p9924_p9, %p9921_p5 }
  0xd2   : > { %9929 = shalt.err (!%p9926_p10)
}
  0xd3   : > { %s9930_s25 = scalar_lea.vmem %s942_s15, 16  ;;  %s9937_s17 = scalar_lea.vmem %s942_s15, 32 }
  0xd4   : > { %p9931_p1 = scmp.ne.s32.totalorder %s942_s15, %s9930_s25  ;;  %p9938_p4 = scmp.lt.s32.totalorder %s942_s15, %s942_s15 }
  0xd5   : > { %p9939_p7 = scmp.lt.s32.totalorder %s9937_s17, %s9930_s25 }
  0xd6   : > { %p9933_p2 = pnand %p9931_p1, %p10664_p0 }
  0xd7   : > { %p9940_p8 = por %p9939_p7, %p9938_p4 }
  0xd8   : > { %p9934_p3 = pneg %p9933_p2 }
  0xda   : > { %p9941_p11 = pnand %p9940_p8, %p9934_p3 }
  0xdc   : > { %9944 = shalt.err (!%p9941_p11)
}
  0xdd   : > { %9523 = dma.hbm_to_vmem [thread:$0]  (!%p10652_p12), %s10501_s12, 16, %s942_s15, [#allocation21]  }
  0xde   : > { %s9945_s18 = scalar_lea.hbm %s12000_s4, 2048 }
  0xdf   : > { %p9946_p13 = scmp.ne.s32.totalorder %s12000_s4, %s9945_s18  ;;  %p9952_p9 = scmp.lt.u32.totalorder %s9945_s18, %s12000_s4 }
  0xe1   : > { %p9948_p6 = pnand %p9946_p13, %p10664_p0 }
  0xe3   : > { %p9949_p5 = pneg %p9948_p6 }
  0xe5   : > { %p9954_p10 = pnand %p9952_p9, %p9949_p5 }
  0xe7   : > { %9957 = shalt.err (!%p9954_p10)
}
  0xe8   : > { %s9958_s7 = scalar_lea.vmem %s992_s2, 2048  ;;  %p9966_p4 = scmp.lt.s32.totalorder %s992_s2, %s992_s2 }
  0xe9   : > { %p9959_p1 = scmp.ne.s32.totalorder %s992_s2, %s9958_s7  ;;  %p9967_p7 = scmp.lt.s32.totalorder %s9958_s7, %s9958_s7 }
  0xeb   : > { %p9961_p2 = pnand %p9959_p1, %p10664_p0  ;;  %p9968_p8 = por %p9967_p7, %p9966_p4 }
  0xed   : > { %p9962_p3 = pneg %p9961_p2 }
  0xef   : > { %p9969_p11 = pnand %p9968_p8, %p9962_p3 }
  0xf1   : > { %9972 = shalt.err (!%p9969_p11)
}
  0xf2   : > { %s12015_s11 = smov 128   ;;  %s10394_s15 = smov [#allocation26]  }
  0xf3   : > { %9529 = dma.hbm_to_vmem [thread:$0]  (!%p10652_p12), %s12000_s4, 2048, %s992_s2, [#allocation24], %s12015_s11, %s12015_s11, %s11955_s28  }
  0xf4   : > { %s1017_s23 = sshll.u32 %s10394_s15, 4  ;;  %s10395_s25 = smov [#allocation2]   ;;  %s1018_s23 = int_to_ptr.vmem [resolvable:$true] %s1017_s23 }
  0xf5   : > { %s808_s17 = sshll.u32 %s10395_s25, 4  ;;  %s9973_s18 = scalar_lea.hbm %s10566_s13, 2048  ;;  %s809_s17 = int_to_ptr.vmem [resolvable:$true] %s808_s17 }
  0xf6   : > { %p9974_p13 = scmp.ne.s32.totalorder %s10566_s13, %s9973_s18  ;;  %p9980_p9 = scmp.lt.u32.totalorder %s9973_s18, %s10566_s13 }
  0xf8   : > { %p9976_p6 = pnand %p9974_p13, %p10664_p0 }
  0xfa   : > { %p9977_p5 = pneg %p9976_p6 }
  0xfc   : > { %p9982_p10 = pnand %p9980_p9, %p9977_p5 }
  0xfe   : > { %9985 = shalt.err (!%p9982_p10)
}
  0xff   : > { %s9986_s7 = scalar_lea.vmem %s1018_s23, 2048  ;;  %p9994_p4 = scmp.lt.s32.totalorder %s1018_s23, %s1018_s23 }
 0x100   : > { %p9987_p1 = scmp.ne.s32.totalorder %s1018_s23, %s9986_s7  ;;  %p9995_p7 = scmp.lt.s32.totalorder %s9986_s7, %s9986_s7 }
 0x102   : > { %p9989_p2 = pnand %p9987_p1, %p10664_p0  ;;  %p9996_p8 = por %p9995_p7, %p9994_p4 }
 0x104   : > { %p9990_p3 = pneg %p9989_p2 }
 0x106   : > { %p9997_p11 = pnand %p9996_p8, %p9990_p3 }
 0x108   : > { %10000 = shalt.err (!%p9997_p11)
}
 0x109   : > { %9535 = dma.hbm_to_vmem [thread:$0]  (!%p10652_p12), %s10566_s13, 2048, %s1018_s23, [#allocation27], %s12015_s11, %s12015_s11, %s11955_s28  }
 0x10a   : > { %s10001_s2 = scalar_lea.hbm %s10436_s9, 128 }
 0x10b   : > { %p10002_p13 = scmp.ne.s32.totalorder %s10436_s9, %s10001_s2  ;;  %p10008_p9 = scmp.lt.u32.totalorder %s10001_s2, %s10436_s9 }
 0x10d   : > { %p10004_p6 = pnand %p10002_p13, %p10664_p0 }
 0x10f   : > { %p10005_p5 = pneg %p10004_p6 }
 0x111   : > { %p10010_p10 = pnand %p10008_p9, %p10005_p5 }
 0x113   : > { %10013 = shalt.err (!%p10010_p10)
}
 0x114   : > { %s10014_s15 = scalar_lea.vmem %s809_s17, 128  ;;  %p10022_p4 = scmp.lt.s32.totalorder %s809_s17, %s809_s17 }
 0x115   : > { %p10015_p1 = scmp.ne.s32.totalorder %s809_s17, %s10014_s15  ;;  %p10023_p7 = scmp.lt.s32.totalorder %s10014_s15, %s10014_s15 }
 0x117   : > { %p10017_p2 = pnand %p10015_p1, %p10664_p0  ;;  %p10024_p8 = por %p10023_p7, %p10022_p4 }
 0x119   : > { %p10018_p3 = pneg %p10017_p2 }
 0x11b   : > { %p10025_p11 = pnand %p10024_p8, %p10018_p3 }
 0x11d   : > { %10028 = shalt.err (!%p10025_p11)
}
 0x11e   : > { %9490 = dma.hbm_to_vmem [thread:$0]  (!%p10652_p12), %s10436_s9, 128, %s809_s17, [#allocation3]  }
 0x11f   : > { %s10396_s23 = smov [#allocation7]   ;;  %s10397_s18 = smov [#allocation10]  }
 0x120   : > { %s835_s25 = sshll.u32 %s10396_s23, 4  ;;  %s859_s7 = sshll.u32 %s10397_s18, 4  ;;  %s836_s25 = int_to_ptr.vmem [resolvable:$true] %s835_s25  ;;  %s860_s7 = int_to_ptr.vmem [resolvable:$true] %s859_s7 }
 0x121   : > { %s10029_s2 = scalar_lea.hbm %s10451_s21, 16 }
 0x122   : > { %p10030_p13 = scmp.ne.s32.totalorder %s10451_s21, %s10029_s2  ;;  %p10036_p9 = scmp.lt.u32.totalorder %s10029_s2, %s10451_s21 }
 0x124   : > { %p10032_p6 = pnand %p10030_p13, %p10664_p0 }
 0x126   : > { %p10033_p5 = pneg %p10032_p6 }
 0x128   : > { %p10038_p10 = pnand %p10036_p9, %p10033_p5 }
 0x12a   : > { %10041 = shalt.err (!%p10038_p10)
}
 0x12b   : > { %s10042_s15 = scalar_lea.vmem %s836_s25, 16  ;;  %s10049_s17 = scalar_lea.vmem %s836_s25, 32 }
 0x12c   : > { %p10043_p1 = scmp.ne.s32.totalorder %s836_s25, %s10042_s15  ;;  %p10050_p4 = scmp.lt.s32.totalorder %s836_s25, %s836_s25 }
 0x12d   : > { %p10051_p7 = scmp.lt.s32.totalorder %s10049_s17, %s10042_s15 }
 0x12e   : > { %p10045_p2 = pnand %p10043_p1, %p10664_p0 }
 0x12f   : > { %p10052_p8 = por %p10051_p7, %p10050_p4 }
 0x130   : > { %p10046_p3 = pneg %p10045_p2 }
 0x132   : > { %p10053_p11 = pnand %p10052_p8, %p10046_p3 }
 0x134   : > { %10056 = shalt.err (!%p10053_p11)
}
 0x135   : > { %9496 = dma.hbm_to_vmem [thread:$0]  (!%p10652_p12), %s10451_s21, 16, %s836_s25, [#allocation6]  }
 0x136   : > { %s10057_s23 = scalar_lea.hbm %s10461_s29, 16 }
 0x137   : > { %p10058_p13 = scmp.ne.s32.totalorder %s10461_s29, %s10057_s23  ;;  %p10064_p9 = scmp.lt.u32.totalorder %s10057_s23, %s10461_s29 }
 0x139   : > { %p10060_p6 = pnand %p10058_p13, %p10664_p0 }
 0x13b   : > { %p10061_p5 = pneg %p10060_p6 }
 0x13d   : > { %p10066_p10 = pnand %p10064_p9, %p10061_p5 }
 0x13f   : > { %10069 = shalt.err (!%p10066_p10)
}
 0x140   : > { %s10070_s18 = scalar_lea.vmem %s860_s7, 16  ;;  %s10077_s2 = scalar_lea.vmem %s860_s7, 32 }
 0x141   : > { %p10071_p1 = scmp.ne.s32.totalorder %s860_s7, %s10070_s18  ;;  %p10078_p4 = scmp.lt.s32.totalorder %s860_s7, %s860_s7 }
 0x142   : > { %p10079_p7 = scmp.lt.s32.totalorder %s10077_s2, %s10070_s18 }
 0x143   : > { %p10073_p2 = pnand %p10071_p1, %p10664_p0 }
 0x144   : > { %p10080_p8 = por %p10079_p7, %p10078_p4 }
 0x145   : > { %p10074_p3 = pneg %p10073_p2 }
 0x147   : > { %p10081_p11 = pnand %p10080_p8, %p10074_p3 }
 0x149   : > { %10084 = shalt.err (!%p10081_p11)
}
 0x14a   : > { %9502 = dma.hbm_to_vmem [thread:$0]  (!%p10652_p12), %s10461_s29, 16, %s860_s7, [#allocation9]  }
 0x14b   : > { %s10398_s25 = smov [#allocation13]   ;;  %s10399_s17 = smov [#allocation16]  }
 0x14c   : > { %s883_s15 = sshll.u32 %s10398_s25, 4  ;;  %s908_s23 = sshll.u32 %s10399_s17, 4  ;;  %s884_s15 = int_to_ptr.vmem [resolvable:$true] %s883_s15  ;;  %s909_s23 = int_to_ptr.vmem [resolvable:$true] %s908_s23 }
 0x14d   : > { %s10085_s28 = scalar_lea.hbm %s10471_s8, 16 }
 0x14e   : > { %p10086_p13 = scmp.ne.s32.totalorder %s10471_s8, %s10085_s28  ;;  %p10092_p9 = scmp.lt.u32.totalorder %s10085_s28, %s10471_s8 }
 0x150   : > { %p10088_p6 = pnand %p10086_p13, %p10664_p0 }
 0x152   : > { %p10089_p5 = pneg %p10088_p6 }
 0x154   : > { %p10094_p10 = pnand %p10092_p9, %p10089_p5 }
 0x156   : > { %10097 = shalt.err (!%p10094_p10)
}
 0x157   : > { %s10098_s18 = scalar_lea.vmem %s884_s15, 16  ;;  %s10105_s7 = scalar_lea.vmem %s884_s15, 32 }
 0x158   : > { %p10099_p1 = scmp.ne.s32.totalorder %s884_s15, %s10098_s18  ;;  %p10106_p4 = scmp.lt.s32.totalorder %s884_s15, %s884_s15 }
 0x159   : > { %p10107_p7 = scmp.lt.s32.totalorder %s10105_s7, %s10098_s18 }
 0x15a   : > { %p10101_p2 = pnand %p10099_p1, %p10664_p0 }
 0x15b   : > { %p10108_p8 = por %p10107_p7, %p10106_p4 }
 0x15c   : > { %p10102_p3 = pneg %p10101_p2 }
 0x15e   : > { %p10109_p11 = pnand %p10108_p8, %p10102_p3 }
 0x160   : > { %10112 = shalt.err (!%p10109_p11)
}
 0x161   : > { %9508 = dma.hbm_to_vmem [thread:$0]  (!%p10652_p12), %s10471_s8, 16, %s884_s15, [#allocation12]  }
 0x162   : > { %s10113_s28 = scalar_lea.hbm %s10486_s24, 128 }
 0x163   : > { %p10114_p13 = scmp.ne.s32.totalorder %s10486_s24, %s10113_s28  ;;  %p10120_p9 = scmp.lt.u32.totalorder %s10113_s28, %s10486_s24 }
 0x165   : > { %p10116_p6 = pnand %p10114_p13, %p10664_p0 }
 0x167   : > { %p10117_p5 = pneg %p10116_p6 }
 0x169   : > { %p10122_p10 = pnand %p10120_p9, %p10117_p5 }
 0x16b   : > { %10125 = shalt.err (!%p10122_p10)
}
 0x16c   : > { %s10126_s2 = scalar_lea.vmem %s909_s23, 128  ;;  %p10134_p4 = scmp.lt.s32.totalorder %s909_s23, %s909_s23 }
 0x16d   : > { %p10127_p1 = scmp.ne.s32.totalorder %s909_s23, %s10126_s2  ;;  %p10135_p7 = scmp.lt.s32.totalorder %s10126_s2, %s10126_s2 }
 0x16f   : > { %p10129_p2 = pnand %p10127_p1, %p10664_p0  ;;  %p10136_p8 = por %p10135_p7, %p10134_p4 }
 0x171   : > { %p10130_p3 = pneg %p10129_p2 }
 0x173   : > { %p10137_p11 = pnand %p10136_p8, %p10130_p3 }
 0x175   : > { %10140 = shalt.err (!%p10137_p11)
}
 0x176   : > { %9514 = dma.hbm_to_vmem [thread:$0]  (!%p10652_p12), %s10486_s24, 128, %s909_s23, [#allocation15]  }
 0x177   : > { %s10400_s25 = smov [#allocation19]   ;;  %s10401_s17 = smov [#allocation22]  }
 0x178   : > { %s930_s15 = sshll.u32 %s10400_s25, 4  ;;  %s975_s18 = sshll.u32 %s10401_s17, 4  ;;  %s931_s15 = int_to_ptr.vmem [resolvable:$true] %s930_s15  ;;  %s976_s18 = int_to_ptr.vmem [resolvable:$true] %s975_s18 }
 0x179   : > { %s10141_s7 = scalar_lea.hbm %s11999_s6, 128 }
 0x17a   : > { %p10142_p13 = scmp.ne.s32.totalorder %s11999_s6, %s10141_s7  ;;  %p10148_p9 = scmp.lt.u32.totalorder %s10141_s7, %s11999_s6 }
 0x17c   : > { %p10144_p6 = pnand %p10142_p13, %p10664_p0 }
 0x17e   : > { %p10145_p5 = pneg %p10144_p6 }
 0x180   : > { %p10150_p10 = pnand %p10148_p9, %p10145_p5 }
 0x182   : > { %10153 = shalt.err (!%p10150_p10)
}
 0x183   : > { %s10154_s28 = scalar_lea.vmem %s931_s15, 128  ;;  %p10162_p4 = scmp.lt.s32.totalorder %s931_s15, %s931_s15 }
 0x184   : > { %p10155_p1 = scmp.ne.s32.totalorder %s931_s15, %s10154_s28  ;;  %p10163_p7 = scmp.lt.s32.totalorder %s10154_s28, %s10154_s28 }
 0x186   : > { %p10157_p2 = pnand %p10155_p1, %p10664_p0  ;;  %p10164_p8 = por %p10163_p7, %p10162_p4 }
 0x188   : > { %p10158_p3 = pneg %p10157_p2 }
 0x18a   : > { %p10165_p11 = pnand %p10164_p8, %p10158_p3 }
 0x18c   : > { %10168 = shalt.err (!%p10165_p11)
}
 0x18d   : > { %s12016_s23 = sld [smem:[#allocation55_spill]] }
 0x18e   : > { %9520 = dma.hbm_to_vmem [thread:$0]  (!%p10652_p12), %s11999_s6, 128, %s931_s15, [#allocation18]  }
 0x193   : > { %s10169_s2 = scalar_lea.hbm %s12016_s23, 4096 }
 0x194   : > { %p10170_p13 = scmp.ne.s32.totalorder %s12016_s23, %s10169_s2  ;;  %p10176_p9 = scmp.lt.u32.totalorder %s10169_s2, %s12016_s23 }
 0x196   : > { %p10172_p6 = pnand %p10170_p13, %p10664_p0 }
 0x198   : > { %p10173_p5 = pneg %p10172_p6 }
 0x19a   : > { %p10178_p10 = pnand %p10176_p9, %p10173_p5 }
 0x19c   : > { %10181 = shalt.err (!%p10178_p10)
}
 0x19d   : > { %s10182_s25 = scalar_lea.vmem %s976_s18, 4096  ;;  %p10190_p4 = scmp.lt.s32.totalorder %s976_s18, %s976_s18 }
 0x19e   : > { %p10183_p1 = scmp.ne.s32.totalorder %s976_s18, %s10182_s25  ;;  %p10191_p7 = scmp.lt.s32.totalorder %s10182_s25, %s10182_s25 }
 0x1a0   : > { %p10185_p2 = pnand %p10183_p1, %p10664_p0  ;;  %p10192_p8 = por %p10191_p7, %p10190_p4 }
 0x1a2   : > { %p10186_p3 = pneg %p10185_p2 }
 0x1a4   : > { %p10193_p11 = pnand %p10192_p8, %p10186_p3 }
 0x1a6   : > { %10196 = shalt.err (!%p10193_p11)
}
 0x1a7   : > { %s12017_s15 = smov 8   ;;  %s12018_s17 = sld [smem:[#allocation58_spill]] }
 0x1a8   : > { %9526 = dma.hbm_to_vmem [thread:$0]  (!%p10652_p12), %s12016_s23, 4096, %s976_s18, [#allocation21], %s12015_s11, %s12015_s11, %s12017_s15  }
 0x1a9   : > { %s10402_s7 = smov [#allocation25]   ;;  %s10403_s2 = smov [#allocation28]  }
 0x1aa   : > { %s1004_s28 = sshll.u32 %s10402_s7, 4  ;;  %s1030_s3 = sshll.u32 %s10403_s2, 4  ;;  %s1005_s28 = int_to_ptr.vmem [resolvable:$true] %s1004_s28  ;;  %s1031_s3 = int_to_ptr.vmem [resolvable:$true] %s1030_s3 }
 0x1ad   : > { %s10197_s25 = scalar_lea.hbm %s12018_s17, 2048 }
 0x1ae   : > { %p10198_p13 = scmp.ne.s32.totalorder %s12018_s17, %s10197_s25  ;;  %p10204_p9 = scmp.lt.u32.totalorder %s10197_s25, %s12018_s17 }
 0x1b0   : > { %p10200_p6 = pnand %p10198_p13, %p10664_p0 }
 0x1b2   : > { %p10201_p5 = pneg %p10200_p6 }
 0x1b4   : > { %p10206_p10 = pnand %p10204_p9, %p10201_p5 }
 0x1b6   : > { %10209 = shalt.err (!%p10206_p10)
}
 0x1b7   : > { %s10210_s4 = scalar_lea.vmem %s1005_s28, 2048  ;;  %p10218_p4 = scmp.lt.s32.totalorder %s1005_s28, %s1005_s28 }
 0x1b8   : > { %p10211_p1 = scmp.ne.s32.totalorder %s1005_s28, %s10210_s4  ;;  %p10219_p7 = scmp.lt.s32.totalorder %s10210_s4, %s10210_s4 }
 0x1ba   : > { %p10213_p2 = pnand %p10211_p1, %p10664_p0  ;;  %p10220_p8 = por %p10219_p7, %p10218_p4 }
 0x1bc   : > { %p10214_p3 = pneg %p10213_p2 }
 0x1be   : > { %p10221_p11 = pnand %p10220_p8, %p10214_p3 }
 0x1c0   : > { %10224 = shalt.err (!%p10221_p11)
}
 0x1c1   : > { %s12019_s18 = sld [smem:[#allocation59_spill]] }
 0x1c2   : > { %9532 = dma.hbm_to_vmem [thread:$0]  (!%p10652_p12), %s12018_s17, 2048, %s1005_s28, [#allocation24], %s12015_s11, %s12015_s11, %s12017_s15  }
 0x1c7   : > { %s10225_s7 = scalar_lea.hbm %s12019_s18, 2048 }
 0x1c8   : > { %p10226_p13 = scmp.ne.s32.totalorder %s12019_s18, %s10225_s7  ;;  %p10232_p9 = scmp.lt.u32.totalorder %s10225_s7, %s12019_s18 }
 0x1ca   : > { %p10228_p6 = pnand %p10226_p13, %p10664_p0 }
 0x1cc   : > { %p10229_p5 = pneg %p10228_p6 }
 0x1ce   : > { %p10234_p10 = pnand %p10232_p9, %p10229_p5 }
 0x1d0   : > { %10237 = shalt.err (!%p10234_p10)
}
 0x1d1   : > { %s10238_s4 = scalar_lea.vmem %s1031_s3, 2048  ;;  %p10246_p4 = scmp.lt.s32.totalorder %s1031_s3, %s1031_s3 }
 0x1d2   : > { %p10239_p1 = scmp.ne.s32.totalorder %s1031_s3, %s10238_s4  ;;  %p10247_p7 = scmp.lt.s32.totalorder %s10238_s4, %s10238_s4 }
 0x1d4   : > { %p10241_p2 = pnand %p10239_p1, %p10664_p0  ;;  %p10248_p8 = por %p10247_p7, %p10246_p4 }
 0x1d6   : > { %p10242_p3 = pneg %p10241_p2 }
 0x1d8   : > { %p10249_p11 = pnand %p10248_p8, %p10242_p3 }
 0x1da   : > { %10252 = shalt.err (!%p10249_p11)
}
 0x1db   : > { %9538 = dma.hbm_to_vmem [thread:$0]  (!%p10652_p12), %s12019_s18, 2048, %s1031_s3, [#allocation27], %s12015_s11, %s12015_s11, %s12017_s15  }
 0x1dc   : > { %p12020_p13 = scmp.ne.s32.totalorder %s12012_s26, 0 }
 0x1de   : > { %1063 = sbr.rel (%p12020_p13) target bundleno = 9055 (0x235f), region = 148 }
 0x1e5   : > { %p12021_p6 = scmp.eq.s32.totalorder %s10614_s0, 0 }
 0x1e7   : > { %10298 = dma.done.wait (%p12021_p6), [#allocation3], 128   ;;  %p12022_p0 = pmov %p12021_p6 }
 0x1e9   : > { %10300 = vsyncadd (%p12022_p0), [#allocation3], 4294967168  ;;  %p12023_p5 = pmov %p12022_p0 }
 0x1ea   : > { %p12024_p9 = pmov %p12022_p0 }
 0x1eb   : > { %10302 = dma.done.wait (%p12023_p5), [#allocation6], 1040  }
 0x1ec   : > { %10304 = vsyncadd (%p12024_p9), [#allocation6], 4294966256  ;;  %p12025_p10 = pmov %p12022_p0 }
 0x1ed   : > { %p12026_p12 = pmov %p12022_p0 }
 0x1ee   : > { %10306 = dma.done.wait (%p12025_p10), [#allocation9], 1040  }
 0x1ef   : > { %10308 = vsyncadd (%p12026_p12), [#allocation9], 4294966256  ;;  %p12027_p1 = pmov %p12022_p0 }
 0x1f0   : > { %p12028_p2 = pmov %p12022_p0 }
 0x1f1   : > { %10310 = dma.done.wait (%p12027_p1), [#allocation12], 1040  }
 0x1f2   : > { %10312 = vsyncadd (%p12028_p2), [#allocation12], 4294966256  ;;  %p12029_p3 = pmov %p12022_p0 }
 0x1f3   : > { %p12030_p4 = pmov %p12022_p0 }
 0x1f4   : > { %10314 = dma.done.wait (%p12029_p3), [#allocation15], 144  }
 0x1f5   : > { %10316 = vsyncadd (%p12030_p4), [#allocation15], 4294967152  ;;  %p12031_p7 = pmov %p12022_p0 }
 0x1f6   : > { %p12032_p8 = pmov %p12022_p0 }
 0x1f7   : > { %10318 = dma.done.wait (%p12031_p7), [#allocation18], 144  }
 0x1f8   : > { %10320 = vsyncadd (%p12032_p8), [#allocation18], 4294967152  ;;  %p12033_p11 = pmov %p12022_p0 }
 0x1f9   : > { %p12034_p13 = pmov %p12022_p0 }
 0x1fa   : > { %10322 = dma.done.wait (%p12033_p11), [#allocation21], 4112  }
 0x1fb   : > { %10324 = vsyncadd (%p12034_p13), [#allocation21], 4294963184  ;;  %p12035_p6 = pmov %p12022_p0 }
 0x1fd   : > { %10326 = dma.done.wait (%p12035_p6), [#allocation24], 4096  }
 0x1fe   : > { %10328 = vsyncadd (%p12022_p0), [#allocation24], 4294963200  ;;  %p12036_p5 = pmov %p12022_p0 }
 0x1ff   : > { %p12037_p9 = pmov %p12022_p0 }
 0x200   : > { %10330 = dma.done.wait (%p12036_p5), [#allocation27], 4096  }
 0x201   : > { %10332 = vsyncadd (%p12037_p9), [#allocation27], 4294963200  ;;  %s12038_s3 = sld [smem:[#allocation40_spill]]  ;;  %p1209_p10 = scmp.lt.s32.totalorder %s10614_s0, 1  ;;  %vm1218_vm0 = vcmask 23552   ;;  %v1338_v11 = vlaneseq  ;;  %vm1353_vm2 = vcmask 130048  }
 0x202   : > { %vm8870_vm1 = vmpackc.low %vm1218_vm0, %vm1218_vm0  ;;  %v11959_v35 = vmov 0.0   ;;  %s12045_s11 = sld [smem:[#allocation41_spill]]  ;;  %s11972_s15 = smov 3  }
 0x203   : > { %s1210_s26 = scalar_select %p1209_p10, %s10614_s0, 1  ;;  %v1339_v12 = vshrl.u32 %v1338_v11, 7  ;;  %v1351_v26 = vand.u32 127, %v1338_v11 }
 0x204   : > { %s10406_s28 = smov 64   ;;  %s12048_s2 = sld [smem:[#allocation47_spill]] }
 0x205   : > { %s7990_s16 = sshll.u32 %s1210_s26, 4  ;;  %v10944_v13 = vsub.s32 0, %v1339_v12  ;;  %v10949_v27 = vcvt.s32.f32 %v1351_v26  ;;  %s12050_s7 = sld [smem:[#allocation49_spill]] }
 0x206   : > { %s12054_s26 = sld [smem:[#allocation48_spill]]  ;;  %s12072_s5 = sld [smem:[#allocation60_spill]] }
 0x207   : > { %s10912_s10 = scalar_lea.vmem %s12038_s3, %s7990_s16  ;;  %s10408_s3 = smov 67  }
 0x208   : > { %v10915_v0 = vld [vmem:[%s10912_s10] sm:$0xff]  ;;  %v10918_v1 = vld [vmem:[%s10912_s10 + $0x8] sm:$0xff]  ;;  %s12055_s16 = sld [smem:[#allocation51_spill]]  ;;  %p12077_p1 = scmp.ne.s32.totalorder %s12009_s22, 0 }
 0x209   : > { %v1216_v2 = vmul.f32 %v10915_v0, %v10915_v0  ;;  %v1217_v3 = vmul.f32 %v10918_v1, %v10918_v1  ;;  %v10928_v4 = vpack.c.bf16 %v10918_v1, %v10915_v0  ;;  %8380 = vmatprep.mubr.msk.f32.mxu0 %vm1218_vm0, %v10915_v0 }
 0x20a   : > { %s12049_s25 = smov %s12048_s2 }
 0x20b   : > { %v1219_v5 = vsel %vm1218_vm0, %v1216_v2, 0.0  ;;  %8871 = vmatprep.subr.msk.bf16.mxu0 %vm8870_vm1, %v10928_v4  ;;  %8876 = vmatprep.subr.bf16.mxu1 %v10928_v4  ;;  %v1222_v6 = vsel %vm1218_vm0, %v1217_v3, 0.0  ;;  %s12051_s4 = smov %s12050_s7 }
 0x20c   : > { %1220 = vadd.xlane.f32.xlu0 %v1219_v5  ;;  %8874 = vmatpush3.bf16.xpose.msk.msra.mxu0 %vm8870_vm1, %v10928_v4 }
 0x20d   : > { %8878 = vmatpush3.bf16.msra.mxu1 %v10928_v4  ;;  %8884 = vmatprep.subr.bf16.mxu0 %v10928_v4 }
 0x20e   : > { %8880 = vmatprep.subr.bf16.mxu1 %v10928_v4 }
 0x210   : > { %1223 = vadd.xlane.f32.xlu0 %v1222_v6 }
 0x213   : > { %8381 = vmatmul.mubr.msk.f32.vlgmr.msra.gmra.mrb[0].mxu0 %vm1218_vm0, %v10918_v1 }
 0x214   : > { %8886 = vmatpush3.bf16.msra.mxu0 %v10928_v4 }
 0x215   : > { %8892 = vmatprep.subr.bf16.mxu0 %v10928_v4 }
 0x299   : > { %v1221_v7 = vpop.xlane.xlu0 %1220 }
 0x29a   : > { %1306 = vxpose.xlu1.b32.start [1/2] (short) (narrow) %v1221_v7, 8 }
 0x29d   : > { %v1224_v8 = vpop.xlane.xlu0 %1223 }
 0x29e   : > { %1307 = vxpose.xlu1.b32.end [2/2] (short) (narrow) %v1224_v8, 8 }
 0x2e6   : > { %v8382_v9 = vpop.f32.mrb[0].mxu0 }
 0x2e7   : > { %v1297_v10 = vpop.f32.mrb[1].mxu0  ;;  %v1345_v15 = vmul.f32 2.0, %v8382_v9 }
 0x2e8   : > { %v1344_v17 = vmul.f32 2.0, %v1297_v10 }
 0x31a   : > { %v1322_v14 = vpop.trf.xlu1 }
 0x31b   : > { %v1341_v16 = vrot.slane %v1322_v14, %v10944_v13 }
 0x31d   : > { %v1342_v18 = vadd.f32 %v1341_v16, %v1221_v7  ;;  %v1343_v19 = vadd.f32 %v1341_v16, %v1224_v8 }
 0x31f   : > { %v1346_v20 = vsub.f32 %v1342_v18, %v1344_v17  ;;  %v1347_v21 = vsub.f32 %v1343_v19, %v1345_v15 }
 0x321   : > { %v1348_v22 = vmax.f32 %v1346_v20, 0.0  ;;  %v1349_v23 = vmax.f32 %v1347_v21, 0.0 }
 0x323   : > { %v1357_v24 = vsel %vm1353_vm2, %v1349_v23, inf  ;;  %v1354_v25 = vsel %vm1353_vm2, %v1348_v22, inf }
 0x324   : > { %1358 = vmin.xlane.f32.xlu1 %v1357_v24  ;;  %1355 = vmin.xlane.f32.xlu0 %v1354_v25 }
 0x3b1   : > { %v1359_v28 = vpop.xlane.xlu1 %1358  ;;  %v1356_v29 = vpop.xlane.xlu0 %1355 }
 0x3b2   : > { %vm1361_vm3 = vcmp.eq.f32.partialorder %v1349_v23, %v1359_v28  ;;  %vm1360_vm4 = vcmp.eq.f32.partialorder %v1348_v22, %v1356_v29 }
 0x3b3   : > { %v1362_v30 = vsel %vm1360_vm4, %v10949_v27, 16.0  ;;  %v1363_v32 = vsel %vm1361_vm3, %v10949_v27, 16.0 }
 0x3b4   : > { %v1364_v31 = vsel %vm1353_vm2, %v1362_v30, inf  ;;  %v1367_v33 = vsel %vm1353_vm2, %v1363_v32, inf }
 0x3b5   : > { %1365 = vmin.xlane.f32.xlu0 %v1364_v31 }
 0x3b9   : > { %1368 = vmin.xlane.f32.xlu0 %v1367_v33 }
 0x442   : > { %v1366_v34 = vpop.xlane.xlu0 %1365 }
 0x443   : > { %vm1370_vm5 = vcmp.eq.f32.partialorder %v10949_v27, %v1366_v34 }
 0x444   : > { %v10957_v36 = vsel %vm1370_vm5, 1.0, %v11959_v35  ;;  %v1376_v37 = vsel %vm1370_vm5, 1e+30, %v1348_v22 }
 0x445   : > { %8387 = vmatprep.mubr.msk.f32.mxu1 %vm1353_vm2, %v10957_v36  ;;  %v1378_v38 = vsel %vm1353_vm2, %v1376_v37, inf }
 0x446   : > { %1379 = vmin.xlane.f32.xlu0 %v1378_v38  ;;  %v1369_v39 = vpop.xlane.xlu0 %1368 }
 0x447   : > { %vm1371_vm6 = vcmp.eq.f32.partialorder %v10949_v27, %v1369_v39 }
 0x448   : > { %v10964_v40 = vsel %vm1371_vm6, 1.0, %v11959_v35  ;;  %v1377_v41 = vsel %vm1371_vm6, 1e+30, %v1349_v23 }
 0x449   : > { %8388 = vmatmul.mubr.msk.f32.vlgmr.msra.gmra.mrb[0].mxu1 %vm1353_vm2, %v10964_v40  ;;  %v1381_v42 = vsel %vm1353_vm2, %v1377_v41, inf }
 0x44a   : > { %1382 = vmin.xlane.f32.xlu0 %v1381_v42  ;;  %8882 = vmatpush3.bf16.msra.mxu1 %v10928_v4 }
 0x44b   : > { %8888 = vmatprep.subr.bf16.mxu1 %v10928_v4 }
 0x4d3   : > { %v1380_v43 = vpop.xlane.xlu0 %1379 }
 0x4d4   : > { %vm1384_vm7 = vcmp.eq.f32.partialorder %v1376_v37, %v1380_v43 }
 0x4d5   : > { %v1386_v44 = vsel %vm1384_vm7, %v10949_v27, 16.0 }
 0x4d6   : > { %v1388_v45 = vsel %vm1353_vm2, %v1386_v44, inf }
 0x4d7   : > { %1389 = vmin.xlane.f32.xlu0 %v1388_v45  ;;  %v1383_v46 = vpop.xlane.xlu0 %1382 }
 0x4d8   : > { %vm1385_vm8 = vcmp.eq.f32.partialorder %v1377_v41, %v1383_v46 }
 0x4d9   : > { %v1387_v47 = vsel %vm1385_vm8, %v10949_v27, 16.0 }
 0x4da   : > { %v1391_v48 = vsel %vm1353_vm2, %v1387_v47, inf }
 0x4db   : > { %1392 = vmin.xlane.f32.xlu0 %v1391_v48 }
 0x51c   : > { %v10975_v49 = vpop.f32.mrb[0].mxu1 }
 0x51d   : > { %v10977_v50 = vpop.f32.mrb[1].mxu1 }
 0x564   : > { %v1390_v51 = vpop.xlane.xlu0 %1389 }
 0x565   : > { %vm1394_vm9 = vcmp.eq.f32.partialorder %v10949_v27, %v1390_v51 }
 0x566   : > { %v10981_v52 = vsel %vm1394_vm9, 1.0, %v11959_v35  ;;  %v1400_v53 = vsel %vm1394_vm9, 1e+30, %v1376_v37 }
 0x567   : > { %8394 = vmatprep.mubr.msk.f32.mxu1 %vm1353_vm2, %v10981_v52  ;;  %v1402_v54 = vsel %vm1353_vm2, %v1400_v53, inf }
 0x568   : > { %1403 = vmin.xlane.f32.xlu0 %v1402_v54  ;;  %v1393_v55 = vpop.xlane.xlu0 %1392 }
 0x569   : > { %vm1395_vm10 = vcmp.eq.f32.partialorder %v10949_v27, %v1393_v55 }
 0x56a   : > { %v10988_v56 = vsel %vm1395_vm10, 1.0, %v11959_v35  ;;  %v1401_v57 = vsel %vm1395_vm10, 1e+30, %v1377_v41 }
 0x56b   : > { %8395 = vmatmul.mubr.msk.f32.vlgmr.msra.gmra.mrb[2].mxu1 %vm1353_vm2, %v10988_v56  ;;  %v1405_v58 = vsel %vm1353_vm2, %v1401_v57, inf }
 0x56c   : > { %1406 = vmin.xlane.f32.xlu0 %v1405_v58  ;;  %8890 = vmatpush3.bf16.msra.mxu1 %v10928_v4 }
 0x56d   : > { %8896 = vmatprep.subr.bf16.mxu1 %v10928_v4 }
 0x5f5   : > { %v1404_v59 = vpop.xlane.xlu0 %1403 }
 0x5f6   : > { %vm1408_vm11 = vcmp.eq.f32.partialorder %v1400_v53, %v1404_v59 }
 0x5f7   : > { %v1410_v60 = vsel %vm1408_vm11, %v10949_v27, 16.0 }
 0x5f8   : > { %v1412_v61 = vsel %vm1353_vm2, %v1410_v60, inf }
 0x5f9   : > { %1413 = vmin.xlane.f32.xlu0 %v1412_v61  ;;  %v1407_v62 = vpop.xlane.xlu0 %1406 }
 0x5fa   : > { %vm1409_vm12 = vcmp.eq.f32.partialorder %v1401_v57, %v1407_v62 }
 0x5fb   : > { %v1411_v63 = vsel %vm1409_vm12, %v10949_v27, 16.0 }
 0x5fc   : > { %v1415_v2 = vsel %vm1353_vm2, %v1411_v63, inf }
 0x5fd   : > { %1416 = vmin.xlane.f32.xlu1 %v1415_v2 }
 0x63e   : > { %v10999_v3 = vpop.f32.mrb[2].mxu1 }
 0x63f   : > { %12039 = vst [vmem:[#allocation67_spill] sm:$0xff] %v10999_v3  ;;  %v2606_v5 = vmax.f32 %v10975_v49, %v10999_v3  ;;  %v11003_v6 = vpop.f32.mrb[3].mxu1 }
 0x640   : > { %v2605_v7 = vmax.f32 %v10977_v50, %v11003_v6 }
 0x686   : > { %v1414_v8 = vpop.xlane.xlu0 %1413 }
 0x687   : > { %vm1418_vm13 = vcmp.eq.f32.partialorder %v10949_v27, %v1414_v8 }
 0x688   : > { %v11009_v9 = vsel %vm1418_vm13, 1.0, %v11959_v35  ;;  %v1424_v10 = vsel %vm1418_vm13, 1e+30, %v1400_v53 }
 0x689   : > { %8401 = vmatprep.mubr.msk.f32.mxu0 %vm1353_vm2, %v11009_v9  ;;  %v1426_v11 = vsel %vm1353_vm2, %v1424_v10, inf }
 0x68a   : > { %v1417_v12 = vpop.xlane.xlu1 %1416  ;;  %1427 = vmin.xlane.f32.xlu0 %v1426_v11 }
 0x68b   : > { %vm1419_vm14 = vcmp.eq.f32.partialorder %v10949_v27, %v1417_v12 }
 0x68c   : > { %v11016_v14 = vsel %vm1419_vm14, 1.0, %v11959_v35  ;;  %v1425_v15 = vsel %vm1419_vm14, 1e+30, %v1401_v57 }
 0x68d   : > { %8402 = vmatmul.mubr.msk.f32.vlgmr.msra.gmra.mrb[2].mxu0 %vm1353_vm2, %v11016_v14  ;;  %v1429_v16 = vsel %vm1353_vm2, %v1425_v15, inf }
 0x68e   : > { %1430 = vmin.xlane.f32.xlu1 %v1429_v16  ;;  %8894 = vmatpush3.bf16.msra.mxu0 %v10928_v4 }
 0x68f   : > { %8900 = vmatprep.subr.bf16.mxu0 %v10928_v4 }
 0x717   : > { %v1428_v17 = vpop.xlane.xlu0 %1427 }
 0x718   : > { %vm1432_vm15 = vcmp.eq.f32.partialorder %v1424_v10, %v1428_v17 }
 0x719   : > { %v1434_v18 = vsel %vm1432_vm15, %v10949_v27, 16.0 }
 0x71a   : > { %v1436_v19 = vsel %vm1353_vm2, %v1434_v18, inf }
 0x71b   : > { %v1431_v20 = vpop.xlane.xlu1 %1430  ;;  %1437 = vmin.xlane.f32.xlu0 %v1436_v19 }
 0x71c   : > { %vm1433_vm1 = vcmp.eq.f32.partialorder %v1425_v15, %v1431_v20 }
 0x71d   : > { %v1435_v21 = vsel %vm1433_vm1, %v10949_v27, 16.0 }
 0x71e   : > { %v1439_v22 = vsel %vm1353_vm2, %v1435_v21, inf }
 0x71f   : > { %1440 = vmin.xlane.f32.xlu1 %v1439_v22 }
 0x760   : > { %v11027_v23 = vpop.f32.mrb[2].mxu0 }
 0x761   : > { %12040 = vst [vmem:[#allocation68_spill] sm:$0xff] %v11027_v23  ;;  %v2608_v24 = vmax.f32 %v2606_v5, %v11027_v23  ;;  %v11030_v25 = vpop.f32.mrb[3].mxu0 }
 0x762   : > { %12041 = vst [vmem:[#allocation69_spill] sm:$0xff] %v11030_v25  ;;  %v2607_v26 = vmax.f32 %v2605_v7, %v11030_v25 }
 0x7a8   : > { %v1438_v28 = vpop.xlane.xlu0 %1437 }
 0x7a9   : > { %vm1442_vm3 = vcmp.eq.f32.partialorder %v10949_v27, %v1438_v28 }
 0x7aa   : > { %v11035_v29 = vsel %vm1442_vm3, 1.0, %v11959_v35  ;;  %v1448_v30 = vsel %vm1442_vm3, 1e+30, %v1424_v10  ;;  %vm2228_vm3 = vcmask 64512  }
 0x7ab   : > { %8408 = vmatprep.mubr.msk.f32.mxu1 %vm1353_vm2, %v11035_v29  ;;  %v1450_v31 = vsel %vm1353_vm2, %v1448_v30, inf }
 0x7ac   : > { %v1441_v32 = vpop.xlane.xlu1 %1440  ;;  %1451 = vmin.xlane.f32.xlu0 %v1450_v31 }
 0x7ad   : > { %vm1443_vm4 = vcmp.eq.f32.partialorder %v10949_v27, %v1441_v32 }
 0x7ae   : > { %v11042_v33 = vsel %vm1443_vm4, 1.0, %v11959_v35  ;;  %v1449_v34 = vsel %vm1443_vm4, 1e+30, %v1425_v15 }
 0x7af   : > { %8409 = vmatmul.mubr.msk.f32.vlgmr.msra.gmra.mrb[4].mxu1 %vm1353_vm2, %v11042_v33  ;;  %v1453_v37 = vsel %vm1353_vm2, %v1449_v34, inf }
 0x7b0   : > { %1454 = vmin.xlane.f32.xlu1 %v1453_v37  ;;  %8898 = vmatpush3.bf16.msra.mxu1 %v10928_v4 }
 0x7b1   : > { %8904 = vmatprep.subr.bf16.mxu1 %v10928_v4 }
 0x839   : > { %v11049_v38 = vpop.xlane.xlu0 %1451 }
 0x83a   : > { %vm1456_vm5 = vcmp.eq.f32.partialorder %v1448_v30, %v11049_v38  ;;  %9727 = vrsqrt.f32 %v11049_v38 }
 0x83b   : > { %v1458_v39 = vsel %vm1456_vm5, %v10949_v27, 16.0 }
 0x83c   : > { %v1460_v41 = vsel %vm1353_vm2, %v1458_v39, inf }
 0x83d   : > { %v11054_v42 = vpop.xlane.xlu1 %1454  ;;  %1461 = vmin.xlane.f32.xlu0 %v1460_v41 }
 0x83e   : > { %vm1457_vm6 = vcmp.eq.f32.partialorder %v1449_v34, %v11054_v42  ;;  %9729 = vrsqrt.f32 %v11054_v42 }
 0x83f   : > { %v1459_v43 = vsel %vm1457_vm6, %v10949_v27, 16.0 }
 0x840   : > { %v1463_v44 = vsel %vm1353_vm2, %v1459_v43, inf }
 0x841   : > { %1464 = vmin.xlane.f32.xlu1 %v1463_v44 }
 0x882   : > { %v11059_v45 = vpop.f32.mrb[4].mxu1 }
 0x883   : > { %12042 = vst [vmem:[#allocation70_spill] sm:$0xff] %v11059_v45  ;;  %v2610_v46 = vmax.f32 %v2608_v24, %v11059_v45  ;;  %v11062_v47 = vpop.f32.mrb[5].mxu1 }
 0x884   : > { %v2609_v48 = vmax.f32 %v2607_v26, %v11062_v47 }
 0x8ca   : > { %v1462_v51 = vpop.xlane.xlu0 %1461 }
 0x8cb   : > { %vm1466_vm7 = vcmp.eq.f32.partialorder %v10949_v27, %v1462_v51 }
 0x8cc   : > { %v11067_v53 = vsel %vm1466_vm7, 1.0, %v11959_v35  ;;  %v1472_v54 = vsel %vm1466_vm7, 1e+30, %v1448_v30 }
 0x8cd   : > { %8415 = vmatprep.mubr.msk.f32.mxu0 %vm1353_vm2, %v11067_v53  ;;  %v1474_v55 = vsel %vm1353_vm2, %v1472_v54, inf }
 0x8ce   : > { %v1465_v57 = vpop.xlane.xlu1 %1464  ;;  %1475 = vmin.xlane.f32.xlu0 %v1474_v55 }
 0x8cf   : > { %vm1467_vm8 = vcmp.eq.f32.partialorder %v10949_v27, %v1465_v57 }
 0x8d0   : > { %v11074_v58 = vsel %vm1467_vm8, 1.0, %v11959_v35  ;;  %v1473_v59 = vsel %vm1467_vm8, 1e+30, %v1449_v34  ;;  %v2220_v34 = vld [vmem:[#allocation2] sm:$0xff]  ;;  %vm2325_vm8 = vcmask 523264  }
 0x8d1   : > { %8416 = vmatmul.mubr.msk.f32.vlgmr.msra.gmra.mrb[4].mxu0 %vm1353_vm2, %v11074_v58  ;;  %v1477_v60 = vsel %vm1353_vm2, %v1473_v59, inf }
 0x8d2   : > { %1478 = vmin.xlane.f32.xlu1 %v1477_v60  ;;  %8902 = vmatpush3.bf16.msra.mxu0 %v10928_v4 }
 0x8d3   : > { %8439 = vmatprep.subr.mxu0 %v2220_v34 }
 0x95b   : > { %v1476_v61 = vpop.xlane.xlu0 %1475 }
 0x95c   : > { %vm1480_vm9 = vcmp.eq.f32.partialorder %v1472_v54, %v1476_v61 }
 0x95d   : > { %v1482_v62 = vsel %vm1480_vm9, %v10949_v27, 16.0  ;;  %vm1546_vm9 = vcmp.eq.f32.partialorder %v11049_v38, inf }
 0x95e   : > { %v1484_v63 = vsel %vm1353_vm2, %v1482_v62, inf }
 0x95f   : > { %v1479_v2 = vpop.xlane.xlu1 %1478  ;;  %1485 = vmin.xlane.f32.xlu0 %v1484_v63  ;;  %v2310_v63 = vld [vmem:[#allocation5] sm:$0xff] }
 0x960   : > { %vm1481_vm10 = vcmp.eq.f32.partialorder %v1473_v59, %v1479_v2  ;;  %v2311_v2 = vld [vmem:[#allocation5 + $0x8] sm:$0xff] }
 0x961   : > { %v1483_v5 = vsel %vm1481_vm10, %v10949_v27, 16.0  ;;  %vm2631_vm10 = vcmask 48128  }
 0x962   : > { %v1487_v7 = vsel %vm1353_vm2, %v1483_v5, inf  ;;  %v8907_v5 = vpack.c.bf16 %v2311_v2, %v2310_v63  ;;  %v2409_v2 = vld [vmem:[#allocation8] sm:$0xff] }
 0x963   : > { %1488 = vmin.xlane.f32.xlu1 %v1487_v7 }
 0x9a4   : > { %v11084_v8 = vpop.f32.mrb[4].mxu0 }
 0x9a5   : > { %12043 = vst [vmem:[#allocation71_spill] sm:$0xff] %v11084_v8  ;;  %v11087_v10 = vmax.f32 %v2610_v46, %v11084_v8  ;;  %v11089_v11 = vpop.f32.mrb[5].mxu0 }
 0x9a6   : > { %v11092_v12 = vmax.f32 %v2609_v48, %v11089_v11 }
 0x9a7   : > { %v2620_v7 = vsub.f32 %v11087_v10, %v10918_v1 }
 0x9ec   : > { %v1486_v15 = vpop.xlane.xlu0 %1485 }
 0x9ed   : > { %vm1490_vm11 = vcmp.eq.f32.partialorder %v10949_v27, %v1486_v15  ;;  %v2619_v15 = vsub.f32 %v11092_v12, %v10915_v0 }
 0x9ee   : > { %v11096_v16 = vsel %vm1490_vm11, 1.0, %v11959_v35  ;;  %v1496_v17 = vsel %vm1490_vm11, 1e+30, %v1472_v54  ;;  %vm1548_vm11 = vcmp.eq.f32.partialorder %v11049_v38, 0.0 }
 0x9ef   : > { %8422 = vmatprep.mubr.msk.f32.mxu1 %vm1353_vm2, %v11096_v16  ;;  %v1498_v18 = vsel %vm1353_vm2, %v1496_v17, inf }
 0x9f0   : > { %v1489_v19 = vpop.xlane.xlu1 %1488  ;;  %1499 = vmin.xlane.f32.xlu0 %v1498_v18 }
 0x9f1   : > { %vm1491_vm12 = vcmp.eq.f32.partialorder %v10949_v27, %v1489_v19 }
 0x9f2   : > { %v11103_v20 = vsel %vm1491_vm12, 1.0, %v11959_v35  ;;  %v1497_v21 = vsel %vm1491_vm12, 1e+30, %v1473_v59  ;;  %vm1553_vm12 = vcmp.eq.f32.partialorder %v11054_v42, inf }
 0x9f3   : > { %8423 = vmatmul.mubr.msk.f32.vlgmr.msra.gmra.mrb[6].mxu1 %vm1353_vm2, %v11103_v20  ;;  %v1501_v22 = vsel %vm1353_vm2, %v1497_v21, inf }
 0x9f4   : > { %1502 = vmin.xlane.f32.xlu1 %v1501_v22  ;;  %8906 = vmatpush3.bf16.msra.mxu1 %v10928_v4 }
 0x9f5   : > { %8908 = vmatprep.subr.bf16.mxu1 %v8907_v5 }
 0xa7d   : > { %v1500_v24 = vpop.xlane.xlu0 %1499 }
 0xa7e   : > { %vm1504_vm13 = vcmp.eq.f32.partialorder %v1496_v17, %v1500_v24 }
 0xa7f   : > { %v1506_v26 = vsel %vm1504_vm13, %v10949_v27, 16.0  ;;  %vm2634_vm13 = vcmask 56320  }
 0xa80   : > { %v1508_v28 = vsel %vm1353_vm2, %v1506_v26, inf }
 0xa81   : > { %v1503_v30 = vpop.xlane.xlu1 %1502  ;;  %1509 = vmin.xlane.f32.xlu0 %v1508_v28 }
 0xa82   : > { %vm1505_vm14 = vcmp.eq.f32.partialorder %v1497_v21, %v1503_v30  ;;  %v7867_v30 = vld [vmem:[%s12045_s11] ss:$0 sm:$0xff]  ;;  %s12056_s11 = sld [smem:[#allocation50_spill]] }
 0xa83   : > { %v1507_v31 = vsel %vm1505_vm14, %v10949_v27, 16.0  ;;  %vm1555_vm14 = vcmp.eq.f32.partialorder %v11054_v42, 0.0 }
 0xa84   : > { %v1511_v32 = vsel %vm1353_vm2, %v1507_v31, inf }
 0xa85   : > { %1512 = vmin.xlane.f32.xlu1 %v1511_v32 }
 0xac6   : > { %v11113_v37 = vpop.f32.mrb[6].mxu1 }
 0xac7   : > { %12044 = vst [vmem:[#allocation72_spill] sm:$0xff] %v11113_v37  ;;  %v11115_v39 = vpop.f32.mrb[7].mxu1 }
 0xac8   : > { %v2613_v18 = vmax.f32 %v11092_v12, %v11115_v39  ;;  %v2312_v12 = vld [vmem:[#allocation5 + $0x10] sm:$0xff] }
 0xb0e   : > { %v1510_v4 = vpop.xlane.xlu0 %1509 }
 0xb0f   : > { %vm1514_vm15 = vcmp.eq.f32.partialorder %v10949_v27, %v1510_v4 }
 0xb10   : > { %v11119_v41 = vsel %vm1514_vm15, 1.0, %v11959_v35  ;;  %v1520_v43 = vsel %vm1514_vm15, 1e+30, %v1496_v17  ;;  %v2614_v17 = vmax.f32 %v11087_v10, %v11113_v37 }
 0xb11   : > { %8429 = vmatprep.mubr.msk.f32.mxu0 %vm1353_vm2, %v11119_v41  ;;  %v1522_v44 = vsel %vm1353_vm2, %v1520_v43, inf }
 0xb12   : > { %v1513_v46 = vpop.xlane.xlu1 %1512  ;;  %1523 = vmin.xlane.f32.xlu0 %v1522_v44 }
 0xb13   : > { %vm1515_vm1 = vcmp.eq.f32.partialorder %v10949_v27, %v1513_v46 }
 0xb14   : > { %v11126_v48 = vsel %vm1515_vm1, 1.0, %v11959_v35  ;;  %v1521_v51 = vsel %vm1515_vm1, 1e+30, %v1497_v21 }
 0xb15   : > { %8430 = vmatmul.mubr.msk.f32.vlgmr.msra.gmra.mrb[6].mxu0 %vm1353_vm2, %v11126_v48  ;;  %v1525_v54 = vsel %vm1353_vm2, %v1521_v51, inf }
 0xb16   : > { %1526 = vmin.xlane.f32.xlu1 %v1525_v54  ;;  %8440 = vmatpush3.msra.mxu0 %v2220_v34  ;;  %v2313_v34 = vld [vmem:[#allocation5 + $0x18] sm:$0xff]  ;;  %v2315_v54 = vld [vmem:[#allocation5 + $0x28] sm:$0xff] }
 0xb17   : > { %8441 = vmatprep.mubr.msk.f32.mxu0 %vm2228_vm3, %v10915_v0  ;;  %v8911_v44 = vpack.c.bf16 %v2313_v34, %v2312_v12  ;;  %v11180_v34 = vld [vmem:[#allocation16] sm:$0xff] }
 0xb19   : > { %8442 = vmatmul.mubr.msk.f32.vlgmr.msra.gmra.mrb[8].mxu0 %vm2228_vm3, %v10918_v1 }
 0xb9f   : > { %v11135_v55 = vpop.xlane.xlu0 %1523 }
 0xba0   : > { %vm1528_vm4 = vcmp.eq.f32.partialorder %v1520_v43, %v11135_v55  ;;  %vm1560_vm1 = vcmp.eq.f32.partialorder %v11135_v55, inf }
 0xba1   : > { %v1530_v57 = vsel %vm1528_vm4, %v10949_v27, 16.0 }
 0xba2   : > { %v1532_v59 = vsel %vm1353_vm2, %v1530_v57, inf }
 0xba3   : > { %v11140_v60 = vpop.xlane.xlu1 %1526  ;;  %1533 = vmin.xlane.f32.xlu0 %v1532_v59  ;;  %v2316_v59 = vld [vmem:[#allocation5 + $0x30] sm:$0xff] }
 0xba4   : > { %vm1529_vm5 = vcmp.eq.f32.partialorder %v1521_v51, %v11140_v60  ;;  %v2314_v51 = vld [vmem:[#allocation5 + $0x20] sm:$0xff]  ;;  %9731 = vrsqrt.f32 %v11140_v60  ;;  %vm1567_vm15 = vcmp.eq.f32.partialorder %v11140_v60, inf  ;;  %vm1569_vm4 = vcmp.eq.f32.partialorder %v11140_v60, 0.0 }
 0xba5   : > { %v1531_v61 = vsel %vm1529_vm5, %v10949_v27, 16.0  ;;  %v8915_v57 = vpack.c.bf16 %v2315_v54, %v2314_v51  ;;  %v2510_v54 = vld [vmem:[#allocation11 + $0x18] sm:$0xff]  ;;  %9733 = vrsqrt.f32 %v11135_v55  ;;  %vm1562_vm5 = vcmp.eq.f32.partialorder %v11135_v55, 0.0 }
 0xba6   : > { %v1535_v62 = vsel %vm1353_vm2, %v1531_v61, inf  ;;  %v2317_v61 = vld [vmem:[#allocation5 + $0x38] sm:$0xff] }
 0xba7   : > { %1536 = vmin.xlane.f32.xlu1 %v1535_v62 }
 0xbb8   : > { %2625 = vrot.lane.b32.xlu1 %v2620_v7, %s11972_s15  ;;  %v2410_v7 = vld [vmem:[#allocation8 + $0x8] sm:$0xff] }
 0xbb9   : > { %2623 = vrot.lane.b32.xlu0 %v2619_v15, %s11972_s15  ;;  %v8923_v15 = vpack.c.bf16 %v2410_v7, %v2409_v2 }
 0xbbb   : > { %8924 = vmatprep.subr.bf16.mxu0 %v8923_v15 }
 0xbbc   : > { %8926 = vmatpush3.bf16.msra.mxu0 %v8923_v15 }
 0xbe8   : > { %v11155_v19 = vpop.f32.mrb[6].mxu0 }
 0xbe9   : > { %12046 = vst [vmem:[#allocation73_spill] sm:$0xff] %v11155_v19  ;;  %v11158_v21 = vmax.f32 %v2614_v17, %v11155_v19  ;;  %v11160_v22 = vpop.f32.mrb[7].mxu0  ;;  %v2412_v17 = vld [vmem:[#allocation8 + $0x18] sm:$0xff] }
 0xbea   : > { %v11163_v24 = vmax.f32 %v2613_v18, %v11160_v22  ;;  %v2413_v18 = vld [vmem:[#allocation8 + $0x20] sm:$0xff] }
 0xbec   : > { %v8443_v26 = vpop.f32.mrb[8].mxu0 }
 0xbed   : > { %v2299_v28 = vpop.f32.mrb[9].mxu0  ;;  %v2305_v62 = vadd.f32 %v8443_v26, %v7867_v30  ;;  %v2415_v26 = vld [vmem:[#allocation8 + $0x30] sm:$0xff] }
 0xbee   : > { %v2300_v32 = vadd.f32 %v7867_v30, %v2299_v28  ;;  %v2416_v30 = vld [vmem:[#allocation8 + $0x38] sm:$0xff] }
 0xbef   : > { %v2309_v63 = vmax.f32 %v2305_v62, 0.0  ;;  %v8935_v12 = vpack.c.bf16 %v2416_v30, %v2415_v26  ;;  %v1549_v30 = vand.u32 2147483648, %v11049_v38 }
 0xbf0   : > { %v2308_v43 = vmax.f32 %v2300_v32, 0.0 }
 0xc30   : > { %v1534_v31 = vpop.xlane.xlu0 %1533 }
 0xc31   : > { %vm1538_vm6 = vcmp.eq.f32.partialorder %v10949_v27, %v1534_v31  ;;  %v2414_v31 = vld [vmem:[#allocation8 + $0x28] sm:$0xff] }
 0xc32   : > { %v11168_v10 = vsel %vm1538_vm6, 1.0, %v11959_v35  ;;  %v8931_v32 = vpack.c.bf16 %v2414_v31, %v2413_v18 }
 0xc33   : > { %8436 = vmatprep.mubr.msk.f32.mxu1 %vm1353_vm2, %v11168_v10 }
 0xc34   : > { %v1537_v4 = vpop.xlane.xlu1 %1536  ;;  %v2624_v18 = vpop.permute.xlu0 %2623 }
 0xc35   : > { %vm1539_vm7 = vcmp.eq.f32.partialorder %v10949_v27, %v1537_v4  ;;  %v8919_v27 = vpack.c.bf16 %v2317_v61, %v2316_v59  ;;  %v2507_v4 = vld [vmem:[#allocation11] sm:$0xff] }
 0xc36   : > { %v11174_v46 = vsel %vm1539_vm7, 1.0, %v11959_v35  ;;  %v2511_v61 = vld [vmem:[#allocation11 + $0x20] sm:$0xff] }
 0xc37   : > { %8437 = vmatmul.mubr.msk.f32.vlgmr.msra.gmra.mrb[8].mxu1 %vm1353_vm2, %v11174_v46 }
 0xc38   : > { %8910 = vmatpush3.bf16.msra.mxu1 %v8907_v5  ;;  %8460 = vmatprep.mubr.msk.f32.mxu1 %vm2325_vm8, %v2308_v43  ;;  %v2411_v5 = vld [vmem:[#allocation8 + $0x10] sm:$0xff] }
 0xc39   : > { %8912 = vmatprep.subr.bf16.mxu1 %v8911_v44  ;;  %v8927_v28 = vpack.c.bf16 %v2412_v17, %v2411_v5  ;;  %v2508_v43 = vld [vmem:[#allocation11 + $0x8] sm:$0xff] }
 0xc3a   : > { %v8939_v51 = vpack.c.bf16 %v2508_v43, %v2507_v4  ;;  %v2626_v4 = vpop.permute.xlu1 %2625 }
 0xc3b   : > { %8928 = vmatprep.subr.bf16.mxu0 %v8927_v28 }
 0xc3c   : > { %8914 = vmatpush3.bf16.msra.mxu1 %v8911_v44  ;;  %8930 = vmatpush3.bf16.msra.mxu0 %v8927_v28  ;;  %v2509_v44 = vld [vmem:[#allocation11 + $0x10] sm:$0xff]  ;;  %v7870_v28 = vld [vmem:[#allocation7] ss:$0 sm:$0xff] }
 0xc3d   : > { %8916 = vmatprep.subr.bf16.mxu1 %v8915_v57  ;;  %8932 = vmatprep.subr.bf16.mxu0 %v8931_v32  ;;  %v8943_v59 = vpack.c.bf16 %v2510_v54, %v2509_v44 }
 0xc40   : > { %8918 = vmatpush3.bf16.msra.mxu1 %v8915_v57  ;;  %8934 = vmatpush3.bf16.msra.mxu0 %v8931_v32 }
 0xc41   : > { %8920 = vmatprep.subr.bf16.mxu1 %v8919_v27  ;;  %8936 = vmatprep.subr.bf16.mxu0 %v8935_v12 }
 0xc44   : > { %8922 = vmatpush3.bf16.msra.mxu1 %v8919_v27  ;;  %8938 = vmatpush3.bf16.msra.mxu0 %v8935_v12  ;;  %v2512_v27 = vld [vmem:[#allocation11 + $0x28] sm:$0xff]  ;;  %v2629_v12 = vsel %vm1218_vm0, %v10915_v0, %v2624_v18 }
 0xc45   : > { %8501 = vmatprep.subr.mxu0 %v11180_v34  ;;  %8940 = vmatprep.subr.bf16.mxu1 %v8939_v51  ;;  %v8947_v15 = vpack.c.bf16 %v2512_v27, %v2511_v61  ;;  %v1556_v61 = vand.u32 2147483648, %v11054_v42 }
 0xc47   : > { %8461 = vmatmul.mubr.msk.f32.vlgmr.msra.gmra.mrb[10].mxu1 %vm2325_vm8, %v2309_v63 }
 0xc48   : > { %8942 = vmatpush3.bf16.msra.mxu1 %v8939_v51 }
 0xc49   : > { %8944 = vmatprep.subr.bf16.mxu1 %v8943_v59 }
 0xc4c   : > { %8946 = vmatpush3.bf16.msra.mxu1 %v8943_v59 }
 0xc4d   : > { %8948 = vmatprep.subr.bf16.mxu1 %v8947_v15 }
 0xc50   : > { %8950 = vmatpush3.bf16.msra.mxu1 %v8947_v15  ;;  %v2748_v15 = vld [vmem:[#allocation19] sm:$0xff] }
 0xd0a   : > { %v11184_v57 = vpop.f32.mrb[8].mxu1 }
 0xd0b   : > { %12047 = vst [vmem:[#allocation74_spill] sm:$0xff] %v11184_v57  ;;  %v2618_v62 = vmax.f32 %v11158_v21, %v11184_v57  ;;  %v11188_v63 = vpop.f32.mrb[9].mxu1  ;;  %v9728_v21 = vpop.eup %9727 }
 0xd0c   : > { %v2617_v2 = vmax.f32 %v11163_v24, %v11188_v63  ;;  %v9730_v24 = vpop.eup %9729  ;;  %v1545_v17 = vmul.f32 %v9728_v21, %v11049_v38 }
 0xd0d   : > { %v2733_v7 = vsub.f32 %v2618_v62, %v10918_v1  ;;  %v1552_v31 = vmul.f32 %v9730_v24, %v11054_v42  ;;  %v2630_v62 = vsel %vm1218_vm0, %v10918_v1, %v2626_v4  ;;  %v2513_v24 = vld [vmem:[#allocation11 + $0x30] sm:$0xff] }
 0xd0e   : > { %v2732_v5 = vsub.f32 %v2617_v2, %v10915_v0  ;;  %v1547_v32 = vsel %vm1546_vm9, %v11049_v38, %v1545_v17  ;;  %v2514_v17 = vld [vmem:[#allocation11 + $0x38] sm:$0xff] }
 0xd0f   : > { %2738 = vrot.lane.b32.xlu0 %v2733_v7, %s11972_s15  ;;  %v11210_v54 = vsel %vm1548_vm11, %v1549_v30, %v1547_v32  ;;  %v1554_v59 = vsel %vm1553_vm12, %v11054_v42, %v1552_v31  ;;  %v8951_v18 = vpack.c.bf16 %v2514_v17, %v2513_v24  ;;  %v1570_v30 = vand.u32 2147483648, %v11140_v60 }
 0xd10   : > { %2736 = vrot.lane.b32.xlu1 %v2732_v5, %s11972_s15  ;;  %v2632_v27 = vsel %vm2631_vm10, %v2629_v12, %v11210_v54  ;;  %v11219_v7 = vsel %vm1555_vm14, %v1556_v61, %v1554_v59  ;;  %vm3246_vm12 = vcmask 547840  }
 0xd11   : > { %v2633_v5 = vsel %vm2631_vm10, %v2630_v62, %v11219_v7  ;;  %v2635_v21 = vsel %vm2634_vm13, %v2632_v27, 0.0  ;;  %8952 = vmatprep.subr.bf16.mxu1 %v8951_v18 }
 0xd12   : > { %v2636_v42 = vsel %vm2634_vm13, %v2633_v5, 0.0  ;;  %8954 = vmatpush3.bf16.msra.mxu1 %v8951_v18 }
 0xd13   : > { %2845 = vrot.lane.b32.xlu0 %v10918_v1, %s10406_s28 }
 0xd14   : > { %2843 = vrot.lane.b32.xlu1 %v10915_v0, %s10406_s28 }
 0xd1a   : > { %v8462_v26 = vpop.f32.mrb[10].mxu1 }
 0xd1b   : > { %v2404_v43 = vadd.f32 %v8462_v26, %v7870_v28  ;;  %v2398_v44 = vpop.f32.mrb[11].mxu1 }
 0xd1c   : > { %v2399_v51 = vadd.f32 %v7870_v28, %v2398_v44  ;;  %v9732_v28 = vpop.eup %9731 }
 0xd1d   : > { %v2408_v38 = vmax.f32 %v2404_v43, 0.0  ;;  %v9734_v31 = vpop.eup %9733  ;;  %v1566_v32 = vmul.f32 %v9732_v28, %v11140_v60  ;;  %v1563_v43 = vand.u32 2147483648, %v11135_v55 }
 0xd1e   : > { %v2407_v2 = vmax.f32 %v2399_v51, 0.0 }
 0xd1f   : > { %v1568_v26 = vsel %vm1567_vm15, %v11140_v60, %v1566_v32 }
 0xd20   : > { %8479 = vmatprep.mubr.msk.f32.mxu0 %vm2325_vm8, %v2407_v2  ;;  %v11241_v44 = vsel %vm1569_vm4, %v1570_v30, %v1568_v26 }
 0xd21   : > { %8480 = vmatmul.mubr.msk.f32.vlgmr.msra.gmra.mrb[10].mxu0 %vm2325_vm8, %v2408_v38 }
 0xd22   : > { %8503 = vmatprep.mubr.msk.f32.mxu0 %vm2228_vm3, %v2635_v21  ;;  %8502 = vmatpush3.msra.mxu0 %v11180_v34  ;;  %v1559_v34 = vmul.f32 %v9734_v31, %v11135_v55 }
 0xd23   : > { %8506 = vmatprep.subr.mxu0 %v2748_v15 }
 0xd24   : > { %v1561_v12 = vsel %vm1560_vm1, %v11135_v55, %v1559_v34 }
 0xd25   : > { %8504 = vmatmul.mubr.msk.f32.vlgmr.msra.gmra.mrb[12].mxu0 %vm2228_vm3, %v2636_v42  ;;  %v11248_v27 = vsel %vm1562_vm5, %v1563_v43, %v1561_v12 }
 0xd26   : > { %8507 = vmatpush3.msra.mxu0 %v2748_v15 }
 0xd81   : > { %v2739_v4 = vpop.permute.xlu0 %2738 }
 0xd82   : > { %v2743_v51 = vsel %vm1218_vm0, %v10918_v1, %v2739_v4  ;;  %v2737_v59 = vpop.permute.xlu1 %2736  ;;  %v7873_v1 = vld [vmem:[#allocation10] ss:$0 sm:$0xff] }
 0xd83   : > { %v2745_v61 = vsel %vm2631_vm10, %v2743_v51, %v11241_v44  ;;  %v2742_v62 = vsel %vm1218_vm0, %v10915_v0, %v2737_v59  ;;  %v7879_v0 = vld [vmem:[#allocation17] ss:$0 sm:$0xff] }
 0xd84   : > { %v2744_v60 = vsel %vm2631_vm10, %v2742_v62, %v11248_v27  ;;  %v2747_v38 = vsel %vm2634_vm13, %v2745_v61, 0.0  ;;  %v7882_v61 = vld [vmem:[#allocation20] ss:$0 sm:$0xff] }
 0xd85   : > { %v2746_v2 = vsel %vm2634_vm13, %v2744_v60, 0.0  ;;  %v2846_v34 = vpop.permute.xlu0 %2845 }
 0xd86   : > { %8508 = vmatprep.mubr.msk.f32.mxu0 %vm2228_vm3, %v2746_v2  ;;  %v2844_v30 = vpop.permute.xlu1 %2843 }
 0xd87   : > { %8509 = vmatmul.mubr.msk.f32.vlgmr.msra.gmra.mrb[14].mxu0 %vm2228_vm3, %v2747_v38 }
 0xd88   : > { %8515 = vmatprep.mubr.msk.f32.mxu0 %vm1353_vm2, %v10957_v36 }
 0xdf4   : > { %v8481_v55 = vpop.f32.mrb[10].mxu0 }
 0xdf5   : > { %v2502_v15 = vadd.f32 %v8481_v55, %v7873_v1  ;;  %v2496_v5 = vpop.f32.mrb[11].mxu0 }
 0xdf6   : > { %v2497_v21 = vadd.f32 %v7873_v1, %v2496_v5 }
 0xdf7   : > { %v2506_v17 = vmax.f32 %v2502_v15, 0.0 }
 0xdf8   : > { %v2505_v42 = vmax.f32 %v2497_v21, 0.0  ;;  %v8505_v24 = vpop.f32.mrb[12].mxu0 }
 0xdf9   : > { %v2723_v18 = vadd.f32 %v8505_v24, %v7879_v0  ;;  %v2717_v28 = vpop.f32.mrb[13].mxu0  ;;  %v11961_v24 = vmov 0.0|0.0  }
 0xdfa   : > { %v2718_v31 = vadd.f32 %v7879_v0, %v2717_v28  ;;  %8498 = vmatprep.mubr.msk.f32.mxu1 %vm2325_vm8, %v2505_v42 }
 0xdfb   : > { %vm2727_vm6 = vcmp.ge.f32.partialorder %v2723_v18, 0.0  ;;  %v2729_v32 = vmul.f32 0.2, %v2723_v18  ;;  %8499 = vmatmul.mubr.msk.f32.vlgmr.msra.gmra.mrb[12].mxu1 %vm2325_vm8, %v2506_v17  ;;  %v3253_v17 = vld [vmem:[%s12048_s2] sm:$0xff]  ;;  %s12057_s2 = sld [smem:[#allocation53_spill]] }
 0xdfc   : > { %vm2726_vm7 = vcmp.ge.f32.partialorder %v2718_v31, 0.0  ;;  %v2728_v26 = vmul.f32 0.2, %v2718_v31  ;;  %8529 = vmatprep.mubr.msk.f32.mxu1 %vm1353_vm2, %v11009_v9 }
 0xdfd   : > { %v2731_v12 = vsel %vm2727_vm6, %v2723_v18, %v2729_v32  ;;  %v3254_v18 = vld [vmem:[%s12049_s25 + $0x8] sm:$0xff]  ;;  %v3256_v32 = vld [vmem:[%s12049_s25 + $0x18] sm:$0xff] }
 0xdfe   : > { %v11265_v4 = vsel %vm2325_vm8, %v2731_v12, %v2846_v34  ;;  %v2730_v43 = vsel %vm2726_vm7, %v2718_v31, %v2728_v26  ;;  %v8976_v28 = vpack.c.bf16 %v3254_v18, %v3253_v17  ;;  %v3255_v31 = vld [vmem:[%s12049_s25 + $0x10] sm:$0xff]  ;;  %v3257_v26 = vld [vmem:[%s12049_s25 + $0x20] sm:$0xff]  ;;  %v3266_v17 = vld [vmem:[%s12049_s25 + $0x68] sm:$0xff] }
 0xdff   : > { %v11268_v51 = vsel %vm2325_vm8, %v2730_v43, %v2844_v30  ;;  %v3259_v43 = vld [vmem:[%s12049_s25 + $0x30] sm:$0xff] }
 0xe00   : > { %v8955_v59 = vpack.c.bf16 %v11265_v4, %v11268_v51 }
 0xe02   : > { %8956 = vmatprep.subr.bf16.mxu0 %v8955_v59  ;;  %8964 = vmatprep.subr.bf16.mxu1 %v8955_v59 }
 0xe03   : > { %8958 = vmatpush3.bf16.msra.mxu0 %v8955_v59  ;;  %8966 = vmatpush3.bf16.msra.mxu1 %v8955_v59 }
 0xe04   : > { %8960 = vmatprep.subr.bf16.mxu0 %v8955_v59  ;;  %8972 = vmatprep.subr.bf16.mxu1 %v8955_v59 }
 0xe06   : > { %8516 = vmatmul.mubr.msk.f32.vlgmr.msra.gmra.mrb[16].mxu0 %vm1353_vm2, %v10964_v40  ;;  %8530 = vmatmul.mubr.msk.f32.vlgmr.msra.gmra.mrb[14].mxu1 %vm1353_vm2, %v11016_v14 }
 0xe07   : > { %8962 = vmatpush3.bf16.msra.mxu0 %v8955_v59  ;;  %8522 = vmatprep.mubr.msk.f32.mxu0 %vm1353_vm2, %v10981_v52 }
 0xe08   : > { %8974 = vmatpush3.bf16.msra.mxu1 %v8955_v59  ;;  %8543 = vmatprep.mubr.msk.f32.mxu1 %vm1353_vm2, %v11067_v53 }
 0xe09   : > { %8968 = vmatprep.subr.bf16.mxu0 %v8955_v59 }
 0xe0a   : > { %8523 = vmatmul.mubr.msk.f32.vlgmr.msra.gmra.mrb[18].mxu0 %vm1353_vm2, %v10988_v56 }
 0xe0b   : > { %8544 = vmatmul.mubr.msk.f32.vlgmr.msra.gmra.mrb[16].mxu1 %vm1353_vm2, %v11074_v58  ;;  %8970 = vmatpush3.bf16.msra.mxu0 %v8955_v59  ;;  %v3260_v59 = vld [vmem:[%s12049_s25 + $0x38] sm:$0xff] }
 0xe0c   : > { %8536 = vmatprep.mubr.msk.f32.mxu0 %vm1353_vm2, %v11035_v29  ;;  %8550 = vmatprep.mubr.msk.f32.mxu1 %vm1353_vm2, %v10957_v36 }
 0xe0d   : > { %8975 = vmatprep.subr.bf16.mxu0 %v11961_v24 }
 0xe0e   : > { %8537 = vmatmul.mubr.msk.f32.vlgmr.msra.gmra.mrb[20].mxu0 %vm1353_vm2, %v11042_v33 }
 0xe0f   : > { %8977 = vmatpush1.bf16.msra.mxu0 %v8976_v28  ;;  %v3267_v28 = vld [vmem:[%s12049_s25 + $0x70] sm:$0xff] }
 0xe10   : > { %8978 = vmatprep.subr.bf16.mxu0 %v11961_v24 }
 0xe5a   : > { %v8510_v62 = vpop.f32.mrb[14].mxu0 }
 0xe5b   : > { %v2834_v60 = vadd.f32 %v8510_v62, %v7882_v61  ;;  %v2828_v2 = vpop.f32.mrb[15].mxu0  ;;  %v3261_v62 = vld [vmem:[%s12049_s25 + $0x40] sm:$0xff] }
 0xe5c   : > { %v2829_v38 = vadd.f32 %v7882_v61, %v2828_v2  ;;  %v8985_v61 = vpack.c.bf16 %v3260_v59, %v3259_v43  ;;  %v3269_v59 = vld [vmem:[%s12049_s25 + $0x80] sm:$0xff] }
 0xe5d   : > { %vm2838_vm9 = vcmp.ge.f32.partialorder %v2834_v60, 0.0  ;;  %v2840_v1 = vmul.f32 0.2, %v2834_v60 }
 0xe5e   : > { %vm2837_vm11 = vcmp.ge.f32.partialorder %v2829_v38, 0.0  ;;  %v2839_v55 = vmul.f32 0.2, %v2829_v38 }
 0xe5f   : > { %v2842_v15 = vsel %vm2838_vm9, %v2834_v60, %v2840_v1  ;;  %v3262_v60 = vld [vmem:[%s12049_s25 + $0x48] sm:$0xff] }
 0xe60   : > { %v11291_v5 = vsel %vm2325_vm8, %v2842_v15, %v2846_v34  ;;  %v2841_v21 = vsel %vm2837_vm11, %v2829_v38, %v2839_v55  ;;  %v8979_v34 = vpack.c.bf16 %v3256_v32, %v3255_v31  ;;  %v8988_v2 = vpack.c.bf16 %v3262_v60, %v3261_v62  ;;  %v3263_v55 = vld [vmem:[%s12049_s25 + $0x50] sm:$0xff]  ;;  %v3264_v15 = vld [vmem:[%s12049_s25 + $0x58] sm:$0xff] }
 0xe61   : > { %v11294_v0 = vsel %vm2325_vm8, %v2841_v21, %v2844_v30  ;;  %v3258_v30 = vld [vmem:[%s12049_s25 + $0x28] sm:$0xff]  ;;  %v8991_v21 = vpack.c.bf16 %v3264_v15, %v3263_v55  ;;  %v3268_v31 = vld [vmem:[%s12049_s25 + $0x78] sm:$0xff]  ;;  %vm5929_vm11 = vcmask 261120  }
 0xe62   : > { %v8999_v42 = vpack.c.bf16 %v11291_v5, %v11294_v0  ;;  %8980 = vmatpush1.bf16.msra.mxu0 %v8979_v34  ;;  %v8982_v12 = vpack.c.bf16 %v3258_v30, %v3257_v26  ;;  %v8997_v26 = vpack.c.bf16 %v3268_v31, %v3267_v28  ;;  %v3994_v31 = vld [vmem:[%s12050_s7] sm:$0xff]  ;;  %s12059_s7 = sld [smem:[#allocation52_spill]] }
 0xe63   : > { %8981 = vmatprep.subr.bf16.mxu0 %v11961_v24 }
 0xe64   : > { %9000 = vmatprep.subr.bf16.mxu1 %v8999_v42 }
 0xe65   : > { %9002 = vmatpush3.bf16.msra.mxu1 %v8999_v42 }
 0xe66   : > { %9004 = vmatprep.subr.bf16.mxu1 %v8999_v42  ;;  %8983 = vmatpush1.bf16.msra.mxu0 %v8982_v12 }
 0xe67   : > { %8984 = vmatprep.subr.bf16.mxu0 %v11961_v24 }
 0xe68   : > { %8551 = vmatmul.mubr.msk.f32.vlgmr.msra.gmra.mrb[18].mxu1 %vm1353_vm2, %v10964_v40 }
 0xe69   : > { %9006 = vmatpush3.bf16.msra.mxu1 %v8999_v42  ;;  %8557 = vmatprep.mubr.msk.f32.mxu1 %vm1353_vm2, %v10981_v52 }
 0xe6a   : > { %9008 = vmatprep.subr.bf16.mxu1 %v8999_v42  ;;  %8986 = vmatpush1.bf16.msra.mxu0 %v8985_v61 }
 0xe6b   : > { %8987 = vmatprep.subr.bf16.mxu0 %v11961_v24 }
 0xe6c   : > { %8558 = vmatmul.mubr.msk.f32.vlgmr.msra.gmra.mrb[20].mxu1 %vm1353_vm2, %v10988_v56 }
 0xe6d   : > { %9010 = vmatpush3.bf16.msra.mxu1 %v8999_v42  ;;  %8564 = vmatprep.mubr.msk.f32.mxu1 %vm1353_vm2, %v11009_v9 }
 0xe6e   : > { %9012 = vmatprep.subr.bf16.mxu1 %v8999_v42  ;;  %8989 = vmatpush1.bf16.msra.mxu0 %v8988_v2 }
 0xe6f   : > { %8990 = vmatprep.subr.bf16.mxu0 %v11961_v24 }
 0xe70   : > { %8565 = vmatmul.mubr.msk.f32.vlgmr.msra.gmra.mrb[22].mxu1 %vm1353_vm2, %v11016_v14 }
 0xe71   : > { %9014 = vmatpush3.bf16.msra.mxu1 %v8999_v42  ;;  %8571 = vmatprep.mubr.msk.f32.mxu1 %vm1353_vm2, %v11035_v29 }
 0xe72   : > { %9016 = vmatprep.subr.bf16.mxu1 %v8999_v42  ;;  %8992 = vmatpush1.bf16.msra.mxu0 %v8991_v21 }
 0xe73   : > { %8993 = vmatprep.subr.bf16.mxu0 %v11961_v24 }
 0xe74   : > { %8572 = vmatmul.mubr.msk.f32.vlgmr.msra.gmra.mrb[24].mxu1 %vm1353_vm2, %v11042_v33 }
 0xe75   : > { %9018 = vmatpush3.bf16.msra.mxu1 %v8999_v42  ;;  %8578 = vmatprep.mubr.msk.f32.mxu1 %vm1353_vm2, %v11067_v53 }
 0xe76   : > { %9020 = vmatprep.subr.bf16.mxu1 %v8999_v42 }
 0xe78   : > { %8579 = vmatmul.mubr.msk.f32.vlgmr.msra.gmra.mrb[26].mxu1 %vm1353_vm2, %v11074_v58 }
 0xe79   : > { %9022 = vmatpush3.bf16.msra.mxu1 %v8999_v42  ;;  %8585 = vmatprep.mubr.msk.f32.mxu1 %vm1353_vm2, %v11096_v16 }
 0xe7a   : > { %9024 = vmatprep.subr.bf16.mxu1 %v8999_v42 }
 0xe7c   : > { %8586 = vmatmul.mubr.msk.f32.vlgmr.msra.gmra.mrb[28].mxu1 %vm1353_vm2, %v11103_v20 }
 0xe7d   : > { %9026 = vmatpush3.bf16.msra.mxu1 %v8999_v42  ;;  %8592 = vmatprep.mubr.msk.f32.mxu1 %vm1353_vm2, %v11119_v41 }
 0xe7e   : > { %9028 = vmatprep.subr.bf16.mxu1 %v8999_v42 }
 0xe80   : > { %8593 = vmatmul.mubr.msk.f32.vlgmr.msra.gmra.mrb[30].mxu1 %vm1353_vm2, %v11126_v48 }
 0xe81   : > { %9030 = vmatpush3.bf16.msra.mxu1 %v8999_v42  ;;  %8599 = vmatprep.mubr.msk.f32.mxu1 %vm1353_vm2, %v11168_v10  ;;  %v3265_v42 = vld [vmem:[%s12049_s25 + $0x60] sm:$0xff] }
 0xe82   : > { %9031 = vmatprep.subr.bf16.mxu1 %v11961_v24  ;;  %v8994_v18 = vpack.c.bf16 %v3266_v17, %v3265_v42 }
 0xe84   : > { %8600 = vmatmul.mubr.msk.f32.vlgmr.msra.gmra.mrb[32].mxu1 %vm1353_vm2, %v11174_v46  ;;  %8995 = vmatpush1.bf16.msra.mxu0 %v8994_v18 }
 0xe85   : > { %8996 = vmatprep.subr.bf16.mxu0 %v11961_v24 }
 0xe88   : > { %8998 = vmatpush1.bf16.msra.mxu0 %v8997_v26  ;;  %v3995_v26 = vld [vmem:[%s12051_s4 + $0x8] sm:$0xff] }
 0xe89   : > { %3315 = vmatprep.subr.mxu0 %v11959_v35  ;;  %v3996_v35 = vld [vmem:[%s12051_s4 + $0x10] sm:$0xff]  ;;  %v9032_v23 = vpack.c.bf16 %v3995_v26, %v3994_v31 }
 0xe8a   : > { %v4008_v26 = vld [vmem:[%s12051_s4 + $0x70] sm:$0xff] }
 0xe8b   : > { %9033 = vmatpush1.bf16.msra.mxu1 %v9032_v23  ;;  %v4001_v23 = vld [vmem:[%s12051_s4 + $0x38] sm:$0xff] }
 0xe8c   : > { %3316 = vmatpush1.msra.mxu0 %v3269_v59  ;;  %v12052_v59 = vmov 0.0|0.0  }
 0xe8d   : > { %9034 = vmatprep.subr.bf16.mxu1 %v12052_v59 }
 0xece   : > { %v11344_v38 = vpop.f32.mrb[12].mxu1 }
 0xecf   : > { %v11346_v1 = vpop.f32.mrb[13].mxu1 }
 0xed9   : > { %v8517_v32 = vpop.f32.mrb[16].mxu0  ;;  %v8531_v34 = vpop.f32.mrb[14].mxu1 }
 0xeda   : > { %v2919_v30 = vpop.f32.mrb[17].mxu0  ;;  %v3069_v12 = vpop.f32.mrb[15].mxu1 }
 0xedd   : > { %v8524_v43 = vpop.f32.mrb[18].mxu0 }
 0xede   : > { %v3229_v61 = vmax.f32 %v8517_v32, %v8524_v43  ;;  %v8545_v62 = vpop.f32.mrb[16].mxu1  ;;  %v2994_v60 = vpop.f32.mrb[19].mxu0  ;;  %v3997_v32 = vld [vmem:[%s12051_s4 + $0x18] sm:$0xff] }
 0xedf   : > { %v3228_v2 = vmax.f32 %v2919_v30, %v2994_v60  ;;  %v3219_v55 = vpop.f32.mrb[17].mxu1  ;;  %v3999_v60 = vld [vmem:[%s12051_s4 + $0x28] sm:$0xff] }
 0xee0   : > { %v3231_v15 = vmax.f32 %v3229_v61, %v8531_v34  ;;  %v9035_v34 = vpack.c.bf16 %v3997_v32, %v3996_v35  ;;  %v3998_v61 = vld [vmem:[%s12051_s4 + $0x20] sm:$0xff]  ;;  %v4000_v35 = vld [vmem:[%s12051_s4 + $0x30] sm:$0xff]  ;;  %v4009_v32 = vld [vmem:[%s12051_s4 + $0x78] sm:$0xff] }
 0xee1   : > { %v8538_v21 = vpop.f32.mrb[20].mxu0  ;;  %v3230_v42 = vmax.f32 %v3228_v2, %v3069_v12  ;;  %v4002_v2 = vld [vmem:[%s12051_s4 + $0x40] sm:$0xff] }
 0xee2   : > { %v3233_v17 = vmax.f32 %v3231_v15, %v8538_v21  ;;  %v3144_v18 = vpop.f32.mrb[21].mxu0  ;;  %9036 = vmatpush1.bf16.msra.mxu1 %v9035_v34  ;;  %v4004_v21 = vld [vmem:[%s12051_s4 + $0x50] sm:$0xff] }
 0xee3   : > { %v3232_v28 = vmax.f32 %v3230_v42, %v3144_v18  ;;  %9037 = vmatprep.subr.bf16.mxu1 %v12052_v59  ;;  %v4005_v42 = vld [vmem:[%s12051_s4 + $0x58] sm:$0xff]  ;;  %v4006_v18 = vld [vmem:[%s12051_s4 + $0x60] sm:$0xff] }
 0xee4   : > { %v3235_v24 = vmax.f32 %v3233_v17, %v8545_v62  ;;  %v9038_v62 = vpack.c.bf16 %v3999_v60, %v3998_v61  ;;  %v9047_v17 = vpack.c.bf16 %v4005_v42, %v4004_v21 }
 0xee5   : > { %v3234_v43 = vmax.f32 %v3232_v28, %v3219_v55  ;;  %v4003_v55 = vld [vmem:[%s12051_s4 + $0x48] sm:$0xff] }
 0xee6   : > { %v3237_v30 = vsub.f32 %v3235_v24, %v11265_v4  ;;  %9039 = vmatpush1.bf16.msra.mxu1 %v9038_v62  ;;  %v9041_v24 = vpack.c.bf16 %v4001_v23, %v4000_v35  ;;  %v9044_v15 = vpack.c.bf16 %v4003_v55, %v4002_v2  ;;  %v4007_v28 = vld [vmem:[%s12051_s4 + $0x68] sm:$0xff] }
 0xee7   : > { %v3236_v12 = vsub.f32 %v3234_v43, %v11268_v51  ;;  %9040 = vmatprep.subr.bf16.mxu1 %v12052_v59  ;;  %v9050_v31 = vpack.c.bf16 %v4007_v28, %v4006_v18  ;;  %v9053_v43 = vpack.c.bf16 %v4009_v32, %v4008_v26 }
 0xee8   : > { %3242 = vrot.lane.b32.xlu0 %v3237_v30, %s10408_s3  ;;  %v12053_v30 = vmov 0.0  }
 0xee9   : > { %3240 = vrot.lane.b32.xlu1 %v3236_v12, %s10408_s3 }
 0xeea   : > { %9042 = vmatpush1.bf16.msra.mxu1 %v9041_v24 }
 0xeeb   : > { %9043 = vmatprep.subr.bf16.mxu1 %v12052_v59 }
 0xeec   : > { %4109 = vrot.lane.b32.xlu0 %v11265_v4, %s10406_s28 }
 0xeed   : > { %4107 = vrot.lane.b32.xlu1 %v11268_v51, %s10406_s28 }
 0xeee   : > { %9045 = vmatpush1.bf16.msra.mxu1 %v9044_v15 }
 0xeef   : > { %9046 = vmatprep.subr.bf16.mxu1 %v12052_v59 }
 0xef2   : > { %9048 = vmatpush1.bf16.msra.mxu1 %v9047_v17 }
 0xef3   : > { %9049 = vmatprep.subr.bf16.mxu1 %v12052_v59 }
 0xef6   : > { %9051 = vmatpush1.bf16.msra.mxu1 %v9050_v31 }
 0xef7   : > { %9052 = vmatprep.subr.bf16.mxu1 %v12052_v59 }
 0xefa   : > { %9054 = vmatpush1.bf16.msra.mxu1 %v9053_v43 }
 0xefb   : > { %4056 = vmatprep.subr.mxu1 %v12053_v30 }
 0xf3b   : > { %v8552_v34 = vpop.f32.mrb[18].mxu1 }
 0xf3c   : > { %v3430_v12 = vpop.f32.mrb[19].mxu1 }
 0xf3f   : > { %v8559_v61 = vpop.f32.mrb[20].mxu1 }
 0xf40   : > { %v3965_v60 = vmax.f32 %v8552_v34, %v8559_v61  ;;  %v3505_v62 = vpop.f32.mrb[21].mxu1  ;;  %v4010_v34 = vld [vmem:[%s12051_s4 + $0x80] sm:$0xff] }
 0xf41   : > { %v3964_v35 = vmax.f32 %v3430_v12, %v3505_v62  ;;  %4057 = vmatpush1.msra.mxu1 %v4010_v34 }
 0xf43   : > { %v8566_v23 = vpop.f32.mrb[22].mxu1 }
 0xf44   : > { %v3967_v24 = vmax.f32 %v3965_v60, %v8566_v23  ;;  %v3580_v2 = vpop.f32.mrb[23].mxu1 }
 0xf45   : > { %v3966_v55 = vmax.f32 %v3964_v35, %v3580_v2 }
 0xf47   : > { %v8573_v15 = vpop.f32.mrb[24].mxu1 }
 0xf48   : > { %v3969_v21 = vmax.f32 %v3967_v24, %v8573_v15  ;;  %v3655_v42 = vpop.f32.mrb[25].mxu1 }
 0xf49   : > { %v3968_v17 = vmax.f32 %v3966_v55, %v3655_v42 }
 0xf4b   : > { %v8580_v18 = vpop.f32.mrb[26].mxu1 }
 0xf4c   : > { %v3971_v59 = vmax.f32 %v3969_v21, %v8580_v18  ;;  %v3730_v28 = vpop.f32.mrb[27].mxu1 }
 0xf4d   : > { %v3970_v31 = vmax.f32 %v3968_v17, %v3730_v28 }
 0xf4f   : > { %v8587_v26 = vpop.f32.mrb[28].mxu1 }
 0xf50   : > { %v3973_v32 = vmax.f32 %v3971_v59, %v8587_v26  ;;  %v3805_v43 = vpop.f32.mrb[29].mxu1 }
 0xf51   : > { %v3972_v25 = vmax.f32 %v3970_v31, %v3805_v43 }
 0xf53   : > { %v8594_v12 = vpop.f32.mrb[30].mxu1 }
 0xf54   : > { %v3975_v61 = vmax.f32 %v3973_v32, %v8594_v12  ;;  %v3880_v62 = vpop.f32.mrb[31].mxu1 }
 0xf55   : > { %v3974_v60 = vmax.f32 %v3972_v25, %v3880_v62 }
 0xf57   : > { %v8601_v23 = vpop.f32.mrb[32].mxu1 }
 0xf58   : > { %v3977_v35 = vmax.f32 %v3975_v61, %v8601_v23  ;;  %v3955_v2 = vpop.f32.mrb[33].mxu1 }
 0xf59   : > { %v3976_v24 = vmax.f32 %v3974_v60, %v3955_v2 }
 0xf5a   : > { %v3979_v55 = vsub.f32 %v3977_v35, %v11291_v5  ;;  %v3243_v15 = vpop.permute.xlu0 %3242  ;;  %v7895_v35 = vld [vmem:[%s12054_s26] ss:$0 sm:$0xff]  ;;  %s12060_s26 = sld [smem:[#allocation54_spill]] }
 0xf5b   : > { %v3978_v21 = vsub.f32 %v3976_v24, %v11294_v0  ;;  %v3241_v42 = vpop.permute.xlu1 %3240  ;;  %v3250_v17 = vsel %vm2631_vm10, %v3243_v15, %v11219_v7  ;;  %v3248_v43 = vsel %vm3246_vm12, %v11265_v4, %v3243_v15 }
 0xf5c   : > { %v3249_v18 = vsel %vm2631_vm10, %v3241_v42, %v11210_v54  ;;  %3984 = vrot.lane.b32.xlu0 %v3979_v55, %s10408_s3  ;;  %v3247_v59 = vsel %vm3246_vm12, %v11268_v51, %v3241_v42  ;;  %v3252_v31 = vsel %vm2634_vm13, %v3250_v17, 0.0 }
 0xf5d   : > { %v3251_v25 = vsel %vm2634_vm13, %v3249_v18, 0.0  ;;  %3982 = vrot.lane.b32.xlu1 %v3978_v21, %s10408_s3  ;;  %s12058_s3 = smov %s12057_s2 }
 0xf5e   : > { %v11403_v28 = vpop.permute.xlu0 %4109  ;;  %7896 = vmatprep.mubr.msk.f32.mxu0 %vm2228_vm3, %v3251_v25 }
 0xf5f   : > { %3348 = vmatmul.mubr.f32.vlgmr.msra.gmra.mrb[22].mxu0 %v3247_v59  ;;  %v11407_v26 = vpop.permute.xlu1 %4107 }
 0xf60   : > { %v9055_v32 = vpack.c.bf16 %v11403_v28, %v11407_v26  ;;  %7897 = vmatprep.mubr.msk.f32.mxu0 %vm2228_vm3, %v3252_v31 }
 0xf62   : > { %9056 = vmatprep.subr.bf16.mxu0 %v9055_v32 }
 0xf63   : > { %3353 = vmatmul.mubr.f32.gmra.mrb[24].mxu0 %v3248_v43 }
 0xf64   : > { %4189 = vmatprep.mubr.f32.mxu0 %v12053_v30 }
 0xfce   : > { %v3985_v51 = vpop.permute.xlu0 %3984 }
 0xfcf   : > { %v3983_v34 = vpop.permute.xlu1 %3982  ;;  %v3991_v12 = vsel %vm2631_vm10, %v3985_v51, %v11241_v44  ;;  %v3989_v23 = vsel %vm3246_vm12, %v11291_v5, %v3985_v51 }
 0xfd0   : > { %v3990_v61 = vsel %vm2631_vm10, %v3983_v34, %v11248_v27  ;;  %v3988_v60 = vsel %vm3246_vm12, %v11294_v0, %v3983_v34  ;;  %v3993_v4 = vsel %vm2634_vm13, %v3991_v12, 0.0  ;;  %vm11698_vm12 = vmpackc.low %vm5929_vm11, %vm5929_vm11 }
 0xfd1   : > { %v3992_v62 = vsel %vm2634_vm13, %v3990_v61, 0.0 }
 0xfd2   : > { %7915 = vmatprep.mubr.msk.f32.mxu1 %vm2228_vm3, %v3992_v62  ;;  %v4570_v62 = vld [vmem:[%s12055_s16 + $0x80] sm:$0xff] }
 0xfd3   : > { %4089 = vmatmul.mubr.f32.vlgmr.msra.gmra.mrb[34].mxu1 %v3988_v60  ;;  %v4571_v60 = vld [vmem:[%s12055_s16 + $0x88] sm:$0xff] }
 0xfd4   : > { %7916 = vmatprep.mubr.msk.f32.mxu1 %vm2228_vm3, %v3993_v4  ;;  %v4554_v4 = vld [vmem:[%s12055_s16] sm:$0xff] }
 0xfd7   : > { %4094 = vmatmul.mubr.f32.gmra.mrb[36].mxu1 %v3989_v23  ;;  %v9075_v23 = vpack.c.bf16 %v4571_v60, %v4570_v62  ;;  %v4577_v62 = vld [vmem:[%s12055_s16 + $0xb8] sm:$0xff] }
 0xfd9   : > { %9076 = vmatprep.subr.bf16.mxu1 %v9075_v23  ;;  %v4560_v23 = vld [vmem:[%s12055_s16 + $0x30] sm:$0xff] }
0x1032   : > { %v3349_v2 = vpop.f32.mrb[22].mxu0 }
0x1033   : > { %v3350_v24 = vadd.f32 %v7895_v35, %v3349_v2  ;;  %v3351_v55 = vpop.f32.mrb[23].mxu0  ;;  %v4572_v2 = vld [vmem:[%s12055_s16 + $0x90] sm:$0xff] }
0x1035   : > { %v3360_v15 = vmul.f32 0.2, %v3350_v24  ;;  %vm3358_vm14 = vcmp.ge.f32.partialorder %v3350_v24, 0.0 }
0x1036   : > { %v3354_v21 = vpop.f32.mrb[24].mxu0 }
0x1037   : > { %v3355_v42 = vadd.f32 %v7895_v35, %v3354_v21  ;;  %v3356_v17 = vpop.f32.mrb[25].mxu0  ;;  %v3362_v18 = vsel %vm3358_vm14, %v3350_v24, %v3360_v15  ;;  %v4555_v35 = vld [vmem:[%s12055_s16 + $0x8] sm:$0xff]  ;;  %v4573_v24 = vld [vmem:[%s12055_s16 + $0x98] sm:$0xff]  ;;  %v4556_v21 = vld [vmem:[%s12055_s16 + $0x10] sm:$0xff]  ;;  %vm6758_vm14 = vcmask 785408  }
0x1038   : > { %v11430_v31 = vsel %vm2325_vm8, %v3362_v18, %v11407_v26  ;;  %v9077_v55 = vpack.c.bf16 %v4555_v35, %v4554_v4  ;;  %v9079_v15 = vpack.c.bf16 %v4573_v24, %v4572_v2  ;;  %v4574_v17 = vld [vmem:[%s12055_s16 + $0xa0] sm:$0xff]  ;;  %v4575_v18 = vld [vmem:[%s12055_s16 + $0xa8] sm:$0xff]  ;;  %v4561_v35 = vld [vmem:[%s12055_s16 + $0x38] sm:$0xff] }
0x1039   : > { %vm3359_vm15 = vcmp.ge.f32.partialorder %v3355_v42, 0.0  ;;  %v3361_v25 = vmul.f32 0.2, %v3355_v42  ;;  %v4578_v2 = vld [vmem:[%s12055_s16 + $0xc0] sm:$0xff]  ;;  %v4579_v24 = vld [vmem:[%s12055_s16 + $0xc8] sm:$0xff] }
0x103a   : > { %9078 = vmatpush3.bf16.msra.mxu1 %v9077_v55  ;;  %v9089_v55 = vpack.c.bf16 %v4561_v35, %v4560_v23  ;;  %v4566_v23 = vld [vmem:[%s12055_s16 + $0x60] sm:$0xff]  ;;  %v4567_v35 = vld [vmem:[%s12055_s16 + $0x68] sm:$0xff] }
0x103b   : > { %v3363_v59 = vsel %vm3359_vm15, %v3355_v42, %v3361_v25  ;;  %v4557_v42 = vld [vmem:[%s12055_s16 + $0x18] sm:$0xff]  ;;  %9080 = vmatprep.subr.bf16.mxu1 %v9079_v15  ;;  %v9091_v15 = vpack.c.bf16 %v4579_v24, %v4578_v2  ;;  %v4584_v2 = vld [vmem:[%s12055_s16 + $0xf0] sm:$0xff]  ;;  %v9101_v57 = vpack.c.bf16 %v4567_v35, %v4566_v23  ;;  %vm7107_vm15 = vcmask 15360  }
0x103c   : > { %v11434_v43 = vsel %vm2325_vm8, %v3363_v59, %v11403_v28  ;;  %v9081_v25 = vpack.c.bf16 %v4557_v42, %v4556_v21  ;;  %v9083_v59 = vpack.c.bf16 %v4575_v18, %v4574_v17  ;;  %v4562_v21 = vld [vmem:[%s12055_s16 + $0x40] sm:$0xff]  ;;  %v4563_v42 = vld [vmem:[%s12055_s16 + $0x48] sm:$0xff]  ;;  %v4580_v17 = vld [vmem:[%s12055_s16 + $0xd0] sm:$0xff] }
0x103d   : > { %v9057_v51 = vpack.c.bf16 %v11434_v43, %v11430_v31  ;;  %v4581_v18 = vld [vmem:[%s12055_s16 + $0xd8] sm:$0xff] }
0x103e   : > { %9082 = vmatpush3.bf16.msra.mxu1 %v9081_v25  ;;  %v9093_v25 = vpack.c.bf16 %v4563_v42, %v4562_v21  ;;  %v4585_v24 = vld [vmem:[%s12055_s16 + $0xf8] sm:$0xff] }
0x103f   : > { %9058 = vmatpush1.bf16.msra.mxu0 %v9057_v51  ;;  %9084 = vmatprep.subr.bf16.mxu1 %v9083_v59  ;;  %v9095_v59 = vpack.c.bf16 %v4581_v18, %v4580_v17  ;;  %v4569_v21 = vld [vmem:[%s12055_s16 + $0x78] sm:$0xff] }
0x1040   : > { %9060 = vmatprep.subr.bf16.mxu0 %v9055_v32 }
0x1042   : > { %7917 = vmatmul.mubr.msk.f32.vlgmr.msra.gmra.mrb[26].mxu0 %vm1353_vm2, %v10957_v36 }
0x1043   : > { %9062 = vmatpush1.bf16.msra.mxu0 %v9057_v51  ;;  %4195 = vmatprep.mubr.f32.mxu0 %v12053_v30 }
0x1044   : > { %9064 = vmatprep.subr.bf16.mxu0 %v9055_v32 }
0x1046   : > { %7918 = vmatmul.mubr.msk.f32.gmra.mrb[28].mxu0 %vm1353_vm2, %v10964_v40 }
0x1047   : > { %4266 = vmatprep.mubr.f32.mxu0 %v12053_v30 }
0x104a   : > { %7919 = vmatmul.mubr.msk.f32.vlgmr.msra.gmra.mrb[30].mxu0 %vm1353_vm2, %v10981_v52 }
0x104b   : > { %9066 = vmatpush1.bf16.msra.mxu0 %v9057_v51  ;;  %4272 = vmatprep.mubr.f32.mxu0 %v12053_v30 }
0x104c   : > { %9068 = vmatprep.subr.bf16.mxu0 %v9055_v32 }
0x104e   : > { %7920 = vmatmul.mubr.msk.f32.gmra.mrb[32].mxu0 %vm1353_vm2, %v10988_v56 }
0x104f   : > { %4343 = vmatprep.mubr.f32.mxu0 %v12053_v30 }
0x1052   : > { %7921 = vmatmul.mubr.msk.f32.vlgmr.msra.gmra.mrb[34].mxu0 %vm1353_vm2, %v11009_v9 }
0x1053   : > { %9070 = vmatpush1.bf16.msra.mxu0 %v9057_v51  ;;  %4349 = vmatprep.mubr.f32.mxu0 %v12053_v30 }
0x1054   : > { %9072 = vmatprep.subr.bf16.mxu0 %v9055_v32 }
0x1056   : > { %7922 = vmatmul.mubr.msk.f32.gmra.mrb[36].mxu0 %vm1353_vm2, %v11016_v14 }
0x1057   : > { %4420 = vmatprep.mubr.f32.mxu0 %v12053_v30 }
0x105a   : > { %7923 = vmatmul.mubr.msk.f32.vlgmr.msra.gmra.mrb[38].mxu0 %vm1353_vm2, %v11035_v29 }
0x105b   : > { %9074 = vmatpush1.bf16.msra.mxu0 %v9057_v51  ;;  %4426 = vmatprep.mubr.f32.mxu0 %v12053_v30  ;;  %v4558_v51 = vld [vmem:[%s12055_s16 + $0x20] sm:$0xff] }
0x105e   : > { %7924 = vmatmul.mubr.msk.f32.gmra.mrb[40].mxu0 %vm1353_vm2, %v11042_v33 }
0x105f   : > { %4497 = vmatprep.mubr.f32.mxu0 %v12053_v30 }
0x1062   : > { %7925 = vmatmul.mubr.msk.f32.vlgmr.msra.gmra.mrb[42].mxu0 %vm1353_vm2, %v11067_v53 }
0x1063   : > { %4503 = vmatprep.mubr.f32.mxu0 %v12053_v30 }
0x1066   : > { %7926 = vmatmul.mubr.msk.f32.gmra.mrb[44].mxu0 %vm1353_vm2, %v11074_v58 }
0x10a6   : > { %v11467_v32 = vpop.f32.mrb[34].mxu1 }
0x10a7   : > { %v4092_v34 = vpop.f32.mrb[35].mxu1 }
0x10a8   : > { %v4559_v34 = vld [vmem:[%s12055_s16 + $0x28] sm:$0xff] }
0x10a9   : > { %v9085_v60 = vpack.c.bf16 %v4559_v34, %v4558_v51  ;;  %v4564_v51 = vld [vmem:[%s12055_s16 + $0x50] sm:$0xff]  ;;  %v4565_v34 = vld [vmem:[%s12055_s16 + $0x58] sm:$0xff] }
0x10aa   : > { %v11469_v12 = vpop.f32.mrb[36].mxu1 }
0x10ab   : > { %v4097_v61 = vpop.f32.mrb[37].mxu1  ;;  %9086 = vmatpush3.bf16.msra.mxu1 %v9085_v60  ;;  %v9097_v60 = vpack.c.bf16 %v4565_v34, %v4564_v51 }
0x10ac   : > { %v4576_v61 = vld [vmem:[%s12055_s16 + $0xb0] sm:$0xff] }
0x10ad   : > { %v9087_v4 = vpack.c.bf16 %v4577_v62, %v4576_v61  ;;  %v4582_v61 = vld [vmem:[%s12055_s16 + $0xe0] sm:$0xff]  ;;  %v4583_v62 = vld [vmem:[%s12055_s16 + $0xe8] sm:$0xff] }
0x10af   : > { %9088 = vmatprep.subr.bf16.mxu1 %v9087_v4  ;;  %v9099_v4 = vpack.c.bf16 %v4583_v62, %v4582_v61 }
0x10b0   : > { %9090 = vmatpush3.bf16.msra.mxu1 %v9089_v55  ;;  %v9103_v55 = vpack.c.bf16 %v4585_v24, %v4584_v2 }
0x10b1   : > { %9092 = vmatprep.subr.bf16.mxu1 %v9091_v15  ;;  %v4568_v15 = vld [vmem:[%s12055_s16 + $0x70] sm:$0xff] }
0x10b2   : > { %v9105_v42 = vpack.c.bf16 %v4569_v21, %v4568_v15 }
0x10b4   : > { %9094 = vmatpush3.bf16.msra.mxu1 %v9093_v25 }
0x10b5   : > { %9096 = vmatprep.subr.bf16.mxu1 %v9095_v59 }
0x10b8   : > { %9098 = vmatpush3.bf16.msra.mxu1 %v9097_v60 }
0x10b9   : > { %9100 = vmatprep.subr.bf16.mxu1 %v9099_v4 }
0x10bc   : > { %9102 = vmatpush3.bf16.msra.mxu1 %v9101_v57 }
0x10bd   : > { %9104 = vmatprep.subr.bf16.mxu1 %v9103_v55 }
0x10c0   : > { %9106 = vmatpush3.bf16.msra.mxu1 %v9105_v42 }
0x1115   : > { %v4191_v17 = vpop.f32.mrb[26].mxu0 }
0x1116   : > { %v4193_v18 = vpop.f32.mrb[27].mxu0 }
0x1119   : > { %v4197_v25 = vpop.f32.mrb[28].mxu0 }
0x111a   : > { %v4199_v51 = vpop.f32.mrb[29].mxu0 }
0x111d   : > { %v4268_v59 = vpop.f32.mrb[30].mxu0 }
0x111e   : > { %v4510_v34 = vmax.f32 %v4191_v17, %v4268_v59  ;;  %v4270_v61 = vpop.f32.mrb[31].mxu0 }
0x111f   : > { %v4511_v62 = vmax.f32 %v4193_v18, %v4270_v61 }
0x1121   : > { %v4274_v19 = vpop.f32.mrb[32].mxu0 }
0x1122   : > { %v4512_v37 = vmax.f32 %v4197_v25, %v4274_v19  ;;  %v4276_v60 = vpop.f32.mrb[33].mxu0  ;;  %v4586_v19 = vld [vmem:[%s12055_s16 + $0x100] sm:$0xff] }
0x1123   : > { %v4513_v23 = vmax.f32 %v4199_v51, %v4276_v60  ;;  %8602 = vmatprep.subr.mxu0 %v4586_v19 }
0x1124   : > { %8603 = vmatpush3.msra.mxu0 %v4586_v19 }
0x1125   : > { %v4345_v4 = vpop.f32.mrb[34].mxu0 }
0x1126   : > { %v4514_v35 = vmax.f32 %v4510_v34, %v4345_v4  ;;  %v4347_v2 = vpop.f32.mrb[35].mxu0 }
0x1127   : > { %v4515_v57 = vmax.f32 %v4511_v62, %v4347_v2 }
0x1129   : > { %v4351_v24 = vpop.f32.mrb[36].mxu0 }
0x112a   : > { %v4516_v55 = vmax.f32 %v4512_v37, %v4351_v24  ;;  %v4353_v15 = vpop.f32.mrb[37].mxu0 }
0x112b   : > { %v4517_v21 = vmax.f32 %v4513_v23, %v4353_v15 }
0x112d   : > { %v4422_v42 = vpop.f32.mrb[38].mxu0 }
0x112e   : > { %v4518_v8 = vmax.f32 %v4514_v35, %v4422_v42  ;;  %v4424_v45 = vpop.f32.mrb[39].mxu0 }
0x112f   : > { %v4519_v3 = vmax.f32 %v4515_v57, %v4424_v45 }
0x1131   : > { %v4428_v17 = vpop.f32.mrb[40].mxu0 }
0x1132   : > { %v4520_v59 = vmax.f32 %v4516_v55, %v4428_v17  ;;  %v4430_v18 = vpop.f32.mrb[41].mxu0 }
0x1133   : > { %v4521_v61 = vmax.f32 %v4517_v21, %v4430_v18 }
0x1135   : > { %v4499_v25 = vpop.f32.mrb[42].mxu0 }
0x1136   : > { %v4522_v51 = vmax.f32 %v4518_v8, %v4499_v25  ;;  %v4501_v34 = vpop.f32.mrb[43].mxu0 }
0x1137   : > { %v4523_v62 = vmax.f32 %v4519_v3, %v4501_v34  ;;  %v7914_v3 = vld [vmem:[%s12056_s11] ss:$0 sm:$0xff]  ;;  %s11971_s11 = smov 96  }
0x1138   : > { %v4526_v37 = vsub.f32 %v4522_v51, %v11430_v31  ;;  %v4091_v8 = vadd.f32 %v7914_v3, %v11467_v32  ;;  %v4096_v55 = vadd.f32 %v7914_v3, %v11469_v12 }
0x1139   : > { %v4527_v60 = vsub.f32 %v4523_v62, %v11407_v26  ;;  %v4505_v23 = vpop.f32.mrb[44].mxu0  ;;  %v5433_v62 = vld [vmem:[%s12058_s3 + $0x28] sm:$0xff] }
0x113a   : > { %v4524_v4 = vmax.f32 %v4520_v59, %v4505_v23  ;;  %4534 = vrot.lane.b32.xlu1 %v4526_v37, %s11972_s15  ;;  %v4507_v45 = vpop.f32.mrb[45].mxu0  ;;  %vm4099_vm1 = vcmp.ge.f32.partialorder %v4091_v8, 0.0  ;;  %v4102_v32 = vmul.f32 0.2, %v4096_v55  ;;  %vm4100_vm4 = vcmp.ge.f32.partialorder %v4096_v55, 0.0  ;;  %v5450_v37 = vld [vmem:[%s12058_s3 + $0xb0] sm:$0xff] }
0x113b   : > { %v4525_v35 = vmax.f32 %v4521_v61, %v4507_v45  ;;  %4536 = vrot.lane.b32.xlu0 %v4527_v60, %s11972_s15  ;;  %v5451_v60 = vld [vmem:[%s12058_s3 + $0xb8] sm:$0xff]  ;;  %v5434_v45 = vld [vmem:[%s12058_s3 + $0x30] sm:$0xff] }
0x113c   : > { %v4528_v2 = vsub.f32 %v4524_v4, %v11434_v43  ;;  %v4104_v25 = vsel %vm4100_vm4, %v4096_v55, %v4102_v32  ;;  %v9151_v4 = vpack.c.bf16 %v5451_v60, %v5450_v37  ;;  %v5437_v55 = vld [vmem:[%s12058_s3 + $0x48] sm:$0xff]  ;;  %vm7115_vm4 = vcmask 39936  }
0x113d   : > { %v4529_v57 = vsub.f32 %v4525_v35, %v11403_v28  ;;  %v5435_v35 = vld [vmem:[%s12058_s3 + $0x38] sm:$0xff]  ;;  %v5457_v32 = vld [vmem:[%s12058_s3 + $0xe8] sm:$0xff] }
0x113e   : > { %4538 = vrot.lane.b32.xlu1 %v4528_v2, %s11972_s15  ;;  %v5452_v2 = vld [vmem:[%s12058_s3 + $0xc0] sm:$0xff]  ;;  %v9153_v3 = vpack.c.bf16 %v5435_v35, %v5434_v45 }
0x113f   : > { %4540 = vrot.lane.b32.xlu0 %v4529_v57, %s11972_s15  ;;  %v5453_v57 = vld [vmem:[%s12058_s3 + $0xc8] sm:$0xff] }
0x1142   : > { %4117 = vrot.lane.b32.xlu1 %v11294_v0, %s10406_s28  ;;  %v4101_v0 = vmul.f32 0.2, %v4091_v8 }
0x1143   : > { %4119 = vrot.lane.b32.xlu0 %v11291_v5, %s10406_s28 }
0x11ac   : > { %v4535_v24 = vpop.permute.xlu1 %4534 }
0x11ad   : > { %v4537_v15 = vpop.permute.xlu0 %4536  ;;  %v4548_v21 = vsel %vm1218_vm0, %v11407_v26, %v4535_v24 }
0x11ae   : > { %v4542_v42 = vsel %vm1218_vm0, %v4535_v24, %v4537_v15  ;;  %4664 = vmatprep.mubr.f32.mxu1 %v4548_v21  ;;  %v5436_v24 = vld [vmem:[%s12058_s3 + $0x40] sm:$0xff]  ;;  %v5454_v15 = vld [vmem:[%s12058_s3 + $0xd0] sm:$0xff]  ;;  %v5455_v21 = vld [vmem:[%s12058_s3 + $0xd8] sm:$0xff] }
0x11af   : > { %v4550_v17 = vsel %vm2631_vm10, %v4542_v42, %v11210_v54  ;;  %4665 = vmatmul.mubr.f32.vlgmr.msra.gmra.mrb[38].mxu1 %v11430_v31  ;;  %v4103_v31 = vsel %vm4099_vm1, %v4091_v8, %v4101_v0  ;;  %v9155_v8 = vpack.c.bf16 %v5453_v57, %v5452_v2  ;;  %v9157_v42 = vpack.c.bf16 %v5437_v55, %v5436_v24  ;;  %v5438_v0 = vld [vmem:[%s12058_s3 + $0x50] sm:$0xff] }
0x11b0   : > { %v4539_v5 = vpop.permute.xlu1 %4538  ;;  %v4552_v59 = vsel %vm2634_vm13, %v4550_v17, 0.0  ;;  %v9159_v17 = vpack.c.bf16 %v5455_v21, %v5454_v15  ;;  %vm7112_vm1 = vcmask 31744  }
0x11b1   : > { %v4541_v18 = vpop.permute.xlu0 %4540  ;;  %8604 = vmatprep.mubr.msk.f32.mxu0 %vm2228_vm3, %v4552_v59  ;;  %v4549_v26 = vsel %vm1218_vm0, %v11403_v28, %v4539_v5  ;;  %v5456_v59 = vld [vmem:[%s12058_s3 + $0xe0] sm:$0xff] }
0x11b2   : > { %v4543_v12 = vsel %vm1218_vm0, %v4539_v5, %v4541_v18  ;;  %4669 = vmatprep.mubr.f32.mxu1 %v4549_v26  ;;  %v5439_v5 = vld [vmem:[%s12058_s3 + $0x58] sm:$0xff]  ;;  %v9163_v26 = vpack.c.bf16 %v5457_v32, %v5456_v59 }
0x11b3   : > { %v4551_v54 = vsel %vm2631_vm10, %v4543_v12, %v11219_v7  ;;  %4670 = vmatmul.mubr.f32.gmra.mrb[40].mxu1 %v11434_v43  ;;  %v9161_v18 = vpack.c.bf16 %v5439_v5, %v5438_v0  ;;  %v5440_v12 = vld [vmem:[%s12058_s3 + $0x60] sm:$0xff] }
0x11b4   : > { %v4553_v61 = vsel %vm2634_vm13, %v4551_v54, 0.0  ;;  %v11534_v19 = vpop.permute.xlu1 %4117  ;;  %5051 = vmatprep.mubr.f32.mxu1 %v12053_v30  ;;  %v5441_v54 = vld [vmem:[%s12058_s3 + $0x68] sm:$0xff] }
0x11b5   : > { %v11539_v28 = vsel %vm2325_vm8, %v4103_v31, %v11534_v19  ;;  %v11541_v51 = vpop.permute.xlu0 %4119  ;;  %8605 = vmatmul.mubr.msk.f32.vlgmr.msra.gmra.mrb[46].mxu0 %vm2228_vm3, %v4553_v61  ;;  %v5458_v31 = vld [vmem:[%s12058_s3 + $0xf0] sm:$0xff]  ;;  %v5459_v61 = vld [vmem:[%s12058_s3 + $0xf8] sm:$0xff] }
0x11b6   : > { %v11546_v7 = vsel %vm2325_vm8, %v4104_v25, %v11541_v51  ;;  %v9107_v43 = vpack.c.bf16 %v11541_v51, %v11534_v19  ;;  %4820 = vmatprep.mubr.f32.mxu0 %v12053_v30  ;;  %v9165_v25 = vpack.c.bf16 %v5441_v54, %v5440_v12 }
0x11b7   : > { %v9109_v34 = vpack.c.bf16 %v11546_v7, %v11539_v28 }
0x11b8   : > { %9108 = vmatprep.subr.bf16.mxu0 %v9107_v43  ;;  %9120 = vmatprep.subr.bf16.mxu1 %v9107_v43 }
0x11b9   : > { %9110 = vmatpush1.bf16.msra.mxu0 %v9109_v34  ;;  %9122 = vmatpush1.bf16.msra.mxu1 %v9109_v34 }
0x11ba   : > { %9112 = vmatprep.subr.bf16.mxu0 %v9107_v43  ;;  %9128 = vmatprep.subr.bf16.mxu1 %v9107_v43 }
0x11bc   : > { %7930 = vmatmul.mubr.msk.f32.vlgmr.msra.gmra.mrb[48].mxu0 %vm1353_vm2, %v10957_v36  ;;  %7936 = vmatmul.mubr.msk.f32.vlgmr.msra.gmra.mrb[42].mxu1 %vm1353_vm2, %v11035_v29  ;;  %v10409_v36 = vmov 0   ;;  %v5446_v29 = vld [vmem:[%s12058_s3 + $0x90] sm:$0xff] }
0x11bd   : > { %9114 = vmatpush1.bf16.msra.mxu0 %v9109_v34  ;;  %9130 = vmatpush1.bf16.msra.mxu1 %v9109_v34 }
0x11be   : > { %9116 = vmatprep.subr.bf16.mxu0 %v9107_v43  ;;  %9136 = vmatprep.subr.bf16.mxu1 %v9107_v43 }
0x11bf   : > { %4826 = vmatprep.mubr.f32.mxu0 %v12053_v30  ;;  %5057 = vmatprep.mubr.f32.mxu1 %v12053_v30 }
0x11c0   : > { %7931 = vmatmul.mubr.msk.f32.gmra.mrb[50].mxu0 %vm1353_vm2, %v10964_v40  ;;  %7937 = vmatmul.mubr.msk.f32.gmra.mrb[44].mxu1 %vm1353_vm2, %v11042_v33  ;;  %v5444_v40 = vld [vmem:[%s12057_s2 + $0x80] sm:$0xff]  ;;  %v5447_v33 = vld [vmem:[%s12058_s3 + $0x98] sm:$0xff]  ;;  %s10411_s2 = smov 32  }
0x11c1   : > { %4897 = vmatprep.mubr.f32.mxu0 %v12053_v30  ;;  %5205 = vmatprep.mubr.f32.mxu1 %v12053_v30 }
0x11c2   : > { %9679 = vset.pattern.permute.xlu1 %v10409_v36  ;;  %9680 = vset.pattern.permute.xlu0 %v10409_v36  ;;  %v5443_v36 = vld [vmem:[%s12058_s3 + $0x78] sm:$0xff] }
0x11c4   : > { %7932 = vmatmul.mubr.msk.f32.vlgmr.msra.gmra.mrb[52].mxu0 %vm1353_vm2, %v10981_v52  ;;  %7940 = vmatmul.mubr.msk.f32.vlgmr.msra.gmra.mrb[46].mxu1 %vm1353_vm2, %v11096_v16  ;;  %v5445_v52 = vld [vmem:[%s12058_s3 + $0x88] sm:$0xff]  ;;  %v5430_v16 = vld [vmem:[%s12058_s3 + $0x10] sm:$0xff] }
0x11c5   : > { %9118 = vmatpush1.bf16.msra.mxu0 %v9109_v34  ;;  %9138 = vmatpush1.bf16.msra.mxu1 %v9109_v34 }
0x11c6   : > { %9124 = vmatprep.subr.bf16.mxu0 %v9107_v43  ;;  %4903 = vmatprep.mubr.f32.mxu0 %v12053_v30 }
0x11c7   : > { %5211 = vmatprep.mubr.f32.mxu1 %v12053_v30 }
0x11c8   : > { %7933 = vmatmul.mubr.msk.f32.gmra.mrb[54].mxu0 %vm1353_vm2, %v10988_v56  ;;  %7941 = vmatmul.mubr.msk.f32.gmra.mrb[48].mxu1 %vm1353_vm2, %v11103_v20  ;;  %v5428_v56 = vld [vmem:[%s12058_s3] sm:$0xff]  ;;  %v5431_v20 = vld [vmem:[%s12058_s3 + $0x18] sm:$0xff] }
0x11c9   : > { %4974 = vmatprep.mubr.f32.mxu0 %v12053_v30  ;;  %5359 = vmatprep.mubr.f32.mxu1 %v12053_v30 }
0x11cc   : > { %7934 = vmatmul.mubr.msk.f32.vlgmr.msra.gmra.mrb[56].mxu0 %vm1353_vm2, %v11009_v9  ;;  %7944 = vmatmul.mubr.msk.f32.vlgmr.msra.gmra.mrb[50].mxu1 %vm1353_vm2, %v11168_v10  ;;  %v9139_v9 = vpack.c.bf16 %v5445_v52, %v5444_v40  ;;  %v9145_v10 = vpack.c.bf16 %v5431_v20, %v5430_v16 }
0x11cd   : > { %9126 = vmatpush1.bf16.msra.mxu0 %v9109_v34  ;;  %4980 = vmatprep.mubr.f32.mxu0 %v12053_v30 }
0x11ce   : > { %9132 = vmatprep.subr.bf16.mxu0 %v9107_v43  ;;  %5365 = vmatprep.mubr.f32.mxu1 %v12053_v30  ;;  %v9167_v43 = vpack.c.bf16 %v5459_v61, %v5458_v31 }
0x11d0   : > { %7935 = vmatmul.mubr.msk.f32.gmra.mrb[58].mxu0 %vm1353_vm2, %v11016_v14  ;;  %7945 = vmatmul.mubr.msk.f32.gmra.mrb[52].mxu1 %vm1353_vm2, %v11174_v46  ;;  %v5429_v14 = vld [vmem:[%s12058_s3 + $0x8] sm:$0xff] }
0x11d1   : > { %5128 = vmatprep.mubr.f32.mxu0 %v12053_v30 }
0x11d4   : > { %7938 = vmatmul.mubr.msk.f32.vlgmr.msra.gmra.mrb[60].mxu0 %vm1353_vm2, %v11067_v53  ;;  %v9141_v53 = vpack.c.bf16 %v5429_v14, %v5428_v56  ;;  %v7927_v14 = vld [vmem:[%s12059_s7] ss:$0 sm:$0xff]  ;;  %s10412_s7 = smov 125  }
0x11d5   : > { %9134 = vmatpush1.bf16.msra.mxu0 %v9109_v34  ;;  %5134 = vmatprep.mubr.f32.mxu0 %v12053_v30  ;;  %v5442_v34 = vld [vmem:[%s12058_s3 + $0x70] sm:$0xff] }
0x11d6   : > { %9140 = vmatprep.subr.bf16.mxu0 %v9139_v9  ;;  %v9169_v40 = vpack.c.bf16 %v5443_v36, %v5442_v34 }
0x11d8   : > { %7939 = vmatmul.mubr.msk.f32.gmra.mrb[62].mxu0 %vm1353_vm2, %v11074_v58  ;;  %v9143_v58 = vpack.c.bf16 %v5447_v33, %v5446_v29 }
0x11d9   : > { %5282 = vmatprep.mubr.f32.mxu0 %v12053_v30 }
0x11dc   : > { %7942 = vmatmul.mubr.msk.f32.vlgmr.msra.gmra.mrb[64].mxu0 %vm1353_vm2, %v11119_v41  ;;  %v5448_v41 = vld [vmem:[%s12058_s3 + $0xa0] sm:$0xff] }
0x11dd   : > { %5288 = vmatprep.mubr.f32.mxu0 %v12053_v30  ;;  %9142 = vmatpush3.bf16.msra.mxu0 %v9141_v53  ;;  %v5432_v30 = vld [vmem:[%s12058_s3 + $0x20] sm:$0xff] }
0x11de   : > { %9144 = vmatprep.subr.bf16.mxu0 %v9143_v58  ;;  %v9149_v23 = vpack.c.bf16 %v5433_v62, %v5432_v30 }
0x11e0   : > { %7943 = vmatmul.mubr.msk.f32.gmra.mrb[66].mxu0 %vm1353_vm2, %v11126_v48  ;;  %v5449_v48 = vld [vmem:[%s12058_s3 + $0xa8] sm:$0xff] }
0x11e1   : > { %v9147_v46 = vpack.c.bf16 %v5449_v48, %v5448_v41  ;;  %9146 = vmatpush3.bf16.msra.mxu0 %v9145_v10 }
0x11e3   : > { %9148 = vmatprep.subr.bf16.mxu0 %v9147_v46 }
0x11e5   : > { %9150 = vmatpush3.bf16.msra.mxu0 %v9149_v23 }
0x11e6   : > { %9152 = vmatprep.subr.bf16.mxu0 %v9151_v4 }
0x11e9   : > { %9154 = vmatpush3.bf16.msra.mxu0 %v9153_v3 }
0x11ea   : > { %9156 = vmatprep.subr.bf16.mxu0 %v9155_v8 }
0x11ed   : > { %9158 = vmatpush3.bf16.msra.mxu0 %v9157_v42 }
0x11ee   : > { %9160 = vmatprep.subr.bf16.mxu0 %v9159_v17 }
0x11f1   : > { %9162 = vmatpush3.bf16.msra.mxu0 %v9161_v18 }
0x11f2   : > { %9164 = vmatprep.subr.bf16.mxu0 %v9163_v26 }
0x11f5   : > { %9166 = vmatpush3.bf16.msra.mxu0 %v9165_v25 }
0x11f6   : > { %9168 = vmatprep.subr.bf16.mxu0 %v9167_v43 }
0x11f9   : > { %9170 = vmatpush3.bf16.msra.mxu0 %v9169_v40 }
0x1282   : > { %v8151_v52 = vpop.f32.mrb[38].mxu1 }
0x1283   : > { %v8152_v56 = vpop.f32.mrb[39].mxu1 }
0x1284   : > { %v8153_v9 = vadd.f32 %v8152_v56, %v8151_v52 }
0x1286   : > { %v8154_v29 = vpop.f32.mrb[40].mxu1  ;;  %v4667_v16 = vadd.f32 %v8153_v9, %v7927_v14 }
0x1287   : > { %v8155_v33 = vpop.f32.mrb[41].mxu1 }
0x1288   : > { %v8156_v53 = vadd.f32 %v8155_v33, %v8154_v29  ;;  %v8606_v58 = vpop.f32.mrb[46].mxu0 }
0x1289   : > { %v4741_v20 = vpop.f32.mrb[47].mxu0 }
0x128a   : > { %v4672_v41 = vadd.f32 %v8156_v53, %v7927_v14  ;;  %v11632_v48 = vadd.f32 %v4741_v20, %v4667_v16 }
0x128c   : > { %v11634_v10 = vadd.f32 %v8606_v58, %v4672_v41  ;;  %vm4750_vm6 = vcmp.ge.f32.partialorder %v11632_v48, 0.0 }
0x128e   : > { %vm4751_vm5 = vcmp.ge.f32.partialorder %v11634_v10, 0.0 }
0x128f   : > { %v4822_v46 = vpop.f32.mrb[48].mxu0  ;;  %v5053_v30 = vpop.f32.mrb[42].mxu1 }
0x1290   : > { %v4824_v62 = vpop.f32.mrb[49].mxu0  ;;  %v5055_v37 = vpop.f32.mrb[43].mxu1 }
0x1293   : > { %v4828_v60 = vpop.f32.mrb[50].mxu0  ;;  %v5059_v23 = vpop.f32.mrb[44].mxu1 }
0x1294   : > { %v4830_v4 = vpop.f32.mrb[51].mxu0  ;;  %v5061_v45 = vpop.f32.mrb[45].mxu1 }
0x1297   : > { %v4899_v35 = vpop.f32.mrb[52].mxu0  ;;  %v5207_v2 = vpop.f32.mrb[46].mxu1 }
0x1298   : > { %v5372_v57 = vmax.f32 %v4822_v46, %v4899_v35  ;;  %v4901_v3 = vpop.f32.mrb[53].mxu0  ;;  %v5209_v8 = vpop.f32.mrb[47].mxu1 }
0x1299   : > { %v5373_v24 = vmax.f32 %v4824_v62, %v4901_v3 }
0x129b   : > { %v4905_v55 = vpop.f32.mrb[54].mxu0  ;;  %v5213_v15 = vpop.f32.mrb[48].mxu1 }
0x129c   : > { %v5374_v21 = vmax.f32 %v4828_v60, %v4905_v55  ;;  %v4907_v42 = vpop.f32.mrb[55].mxu0  ;;  %v5215_v17 = vpop.f32.mrb[49].mxu1  ;;  %v5460_v60 = vld [vmem:[%s12058_s3 + $0x100] sm:$0xff] }
0x129d   : > { %v5375_v0 = vmax.f32 %v4830_v4, %v4907_v42  ;;  %8607 = vmatprep.subr.mxu1 %v5460_v60 }
0x129e   : > { %8608 = vmatpush3.msra.mxu1 %v5460_v60 }
0x129f   : > { %v4976_v5 = vpop.f32.mrb[56].mxu0  ;;  %v5361_v59 = vpop.f32.mrb[50].mxu1 }
0x12a0   : > { %v5376_v32 = vmax.f32 %v5372_v57, %v4976_v5  ;;  %v4978_v18 = vpop.f32.mrb[57].mxu0  ;;  %v5363_v26 = vpop.f32.mrb[51].mxu1  ;;  %v5630_v5 = vld [vmem:[%s10586_s20] sm:$0x1] }
0x12a1   : > { %v5377_v12 = vmax.f32 %v5373_v24, %v4978_v18  ;;  %v11648_v18 = vrot.slane %v5630_v5, %v10944_v13 }
0x12a2   : > { %v5380_v54 = vmax.f32 %v5376_v32, %v5053_v30 }
0x12a3   : > { %v4982_v31 = vpop.f32.mrb[58].mxu0  ;;  %v5367_v61 = vpop.f32.mrb[52].mxu1  ;;  %v5381_v25 = vmax.f32 %v5377_v12, %v5055_v37  ;;  %v5642_v12 = vsub.f32 1.0, %v5630_v5  ;;  %v5839_v5 = vld [vmem:[#allocation26 + $0x8] sm:$0xff] }
0x12a4   : > { %v5378_v43 = vmax.f32 %v5374_v21, %v4982_v31  ;;  %v4984_v34 = vpop.f32.mrb[59].mxu0  ;;  %v5369_v36 = vpop.f32.mrb[53].mxu1  ;;  %v5748_v31 = vld [vmem:[#allocation25 + $0x8] sm:$0xff] }
0x12a5   : > { %v5379_v40 = vmax.f32 %v5375_v0, %v4984_v34  ;;  %v5750_v34 = vld [vmem:[#allocation25 + $0x18] sm:$0xff] }
0x12a6   : > { %v5382_v52 = vmax.f32 %v5378_v43, %v5059_v23  ;;  %v5656_v23 = vld [vmem:[#allocation23] sm:$0xff]  ;;  %v5749_v43 = vld [vmem:[#allocation25 + $0x10] sm:$0xff] }
0x12a7   : > { %v5130_v56 = vpop.f32.mrb[60].mxu0  ;;  %v5383_v9 = vmax.f32 %v5379_v40, %v5061_v45  ;;  %v5657_v45 = vld [vmem:[#allocation23 + $0x8] sm:$0xff] }
0x12a8   : > { %v5384_v14 = vmax.f32 %v5380_v54, %v5130_v56  ;;  %v5132_v29 = vpop.f32.mrb[61].mxu0  ;;  %v11637_v24 = vpack.c.bf16 %v5657_v45, %v5656_v23  ;;  %v5747_v54 = vld [vmem:[#allocation25] sm:$0xff]  ;;  %v5665_v23 = vld [vmem:[#allocation23 + $0x48] sm:$0xff] }
0x12a9   : > { %v5385_v33 = vmax.f32 %v5381_v25, %v5132_v29  ;;  %v5647_v25 = vrot.slane %v5642_v12, %v10944_v13  ;;  %v5751_v56 = vld [vmem:[#allocation25 + $0x20] sm:$0xff]  ;;  %v5841_v12 = vld [vmem:[#allocation26 + $0x18] sm:$0xff] }
0x12aa   : > { %v5388_v53 = vmax.f32 %v5384_v14, %v5207_v2  ;;  %9172 = vmatprep.subr.bf16.mxu1 %v11637_v24  ;;  %v7876_v14 = vld [vmem:[#allocation13] ss:$0 sm:$0xff] }
0x12ab   : > { %v5136_v58 = vpop.f32.mrb[62].mxu0  ;;  %v5389_v16 = vmax.f32 %v5385_v33, %v5209_v8 }
0x12ac   : > { %v5386_v20 = vmax.f32 %v5382_v52, %v5136_v58  ;;  %v5138_v41 = vpop.f32.mrb[63].mxu0  ;;  %v9207_v52 = vpack.c.bf16 %v5750_v34, %v5749_v43  ;;  %v5754_v34 = vld [vmem:[#allocation25 + $0x38] sm:$0xff] }
0x12ad   : > { %v5387_v46 = vmax.f32 %v5383_v9, %v5138_v41  ;;  %v5752_v9 = vld [vmem:[#allocation25 + $0x28] sm:$0xff]  ;;  %v5659_v41 = vld [vmem:[#allocation23 + $0x18] sm:$0xff] }
0x12ae   : > { %v5390_v30 = vmax.f32 %v5386_v20, %v5213_v15  ;;  %v9211_v58 = vpack.c.bf16 %v5752_v9, %v5751_v56  ;;  %v5658_v20 = vld [vmem:[#allocation23 + $0x10] sm:$0xff]  ;;  %v5755_v9 = vld [vmem:[#allocation25 + $0x40] sm:$0xff] }
0x12af   : > { %v5284_v62 = vpop.f32.mrb[64].mxu0  ;;  %v5391_v37 = vmax.f32 %v5387_v46, %v5215_v17 }
0x12b0   : > { %v5392_v4 = vmax.f32 %v5388_v53, %v5284_v62  ;;  %v5286_v35 = vpop.f32.mrb[65].mxu0 }
0x12b1   : > { %v5393_v57 = vmax.f32 %v5389_v16, %v5286_v35  ;;  %v11663_v16 = vadd.f32 %v7876_v14, %v11346_v1  ;;  %v5663_v35 = vld [vmem:[#allocation23 + $0x38] sm:$0xff] }
0x12b2   : > { %v5396_v3 = vmax.f32 %v5392_v4, %v5361_v59  ;;  %v5662_v4 = vld [vmem:[#allocation23 + $0x30] sm:$0xff] }
0x12b3   : > { %v5397_v2 = vmax.f32 %v5393_v57, %v5363_v26  ;;  %v5290_v8 = vpop.f32.mrb[66].mxu0  ;;  %v2603_v1 = vmax.f32 %v11663_v16, 0.0  ;;  %v5664_v57 = vld [vmem:[#allocation23 + $0x40] sm:$0xff] }
0x12b4   : > { %v5394_v55 = vmax.f32 %v5390_v30, %v5290_v8  ;;  %v5292_v21 = vpop.f32.mrb[67].mxu0  ;;  %v5400_v15 = vsub.f32 %v5396_v3, %v11539_v28  ;;  %v9175_v30 = vpack.c.bf16 %v5659_v41, %v5658_v20  ;;  %v9187_v45 = vpack.c.bf16 %v5665_v23, %v5664_v57  ;;  %v5666_v3 = vld [vmem:[#allocation23 + $0x50] sm:$0xff]  ;;  %v5668_v8 = vld [vmem:[#allocation23 + $0x60] sm:$0xff]  ;;  %v5849_v41 = vld [vmem:[#allocation26 + $0x58] sm:$0xff] }
0x12b5   : > { %v5395_v42 = vmax.f32 %v5391_v37, %v5292_v21  ;;  %v5401_v32 = vsub.f32 %v5397_v2, %v11534_v19  ;;  %v5661_v37 = vld [vmem:[#allocation23 + $0x28] sm:$0xff]  ;;  %v5667_v2 = vld [vmem:[#allocation23 + $0x58] sm:$0xff] }
0x12b6   : > { %v5398_v17 = vmax.f32 %v5394_v55, %v5367_v61  ;;  %5408 = vrot.lane.b32.xlu1 %v5400_v15, %s11972_s15  ;;  %v9203_v61 = vpack.c.bf16 %v5748_v31, %v5747_v54  ;;  %v5669_v55 = vld [vmem:[#allocation23 + $0x68] sm:$0xff]  ;;  %v5670_v15 = vld [vmem:[#allocation23 + $0x70] sm:$0xff]  ;;  %v5853_v57 = vld [vmem:[#allocation26 + $0x78] sm:$0xff] }
0x12b7   : > { %v5399_v0 = vmax.f32 %v5395_v42, %v5369_v36  ;;  %v9195_v21 = vpack.c.bf16 %v5669_v55, %v5668_v8  ;;  %v5671_v42 = vld [vmem:[#allocation23 + $0x78] sm:$0xff] }
0x12b8   : > { %v5402_v59 = vsub.f32 %v5398_v17, %v11546_v7  ;;  %9204 = vmatprep.subr.bf16.mxu0 %v9203_v61  ;;  %v9199_v17 = vpack.c.bf16 %v5671_v42, %v5670_v15 }
0x12b9   : > { %v5403_v26 = vsub.f32 %v5399_v0, %v11541_v51  ;;  %v5838_v0 = vld [vmem:[#allocation26] sm:$0xff] }
0x12ba   : > { %5410 = vrot.lane.b32.xlu1 %v5401_v32, %s11972_s15  ;;  %5412 = vrot.lane.b32.xlu0 %v5402_v59, %s11972_s15  ;;  %v11678_v32 = vadd.f32 %v11344_v38, %v7876_v14  ;;  %v9235_v59 = vpack.c.bf16 %v5839_v5, %v5838_v0  ;;  %v5753_v38 = vld [vmem:[#allocation25 + $0x30] sm:$0xff]  ;;  %v5756_v14 = vld [vmem:[#allocation25 + $0x48] sm:$0xff]  ;;  %v4753_v0 = vmul.f32 0.2, %v11634_v10 }
0x12bc   : > { %v2604_v54 = vmax.f32 %v11678_v32, 0.0 }
0x12be   : > { %5637 = vperm.xlu1 %9679, %v11648_v18   ;;  %5414 = vrot.lane.b32.xlu0 %v5403_v26, %s11972_s15  ;;  %v5840_v26 = vld [vmem:[#allocation26 + $0x10] sm:$0xff]  ;;  %s10415_s15 = smov 2  }
0x12bf   : > { %v9239_v31 = vpack.c.bf16 %v5841_v12, %v5840_v26  ;;  %v4752_v26 = vmul.f32 0.2, %v11632_v48 }
0x12c2   : > { %5649 = vperm.xlu0 %9680, %v5647_v25   ;;  %v5843_v25 = vld [vmem:[#allocation26 + $0x28] sm:$0xff] }
0x1328   : > { %v5409_v36 = vpop.permute.xlu1 %5408 }
0x1329   : > { %v5422_v40 = vsel %vm1218_vm0, %v11534_v19, %v5409_v36 }
0x132a   : > { %5538 = vmatprep.mubr.f32.mxu0 %v5422_v40  ;;  %v9215_v40 = vpack.c.bf16 %v5754_v34, %v5753_v38  ;;  %v4755_v38 = vsel %vm4751_vm5, %v11634_v10, %v4753_v0  ;;  %vm7150_vm5 = vcmask 72704  }
0x132b   : > { %5539 = vmatmul.mubr.f32.vlgmr.msra.gmra.mrb[68].mxu0 %v11539_v28 }
0x132c   : > { %v5411_v29 = vpop.permute.xlu1 %5410  ;;  %v5413_v33 = vpop.permute.xlu0 %5412  ;;  %9206 = vmatpush3.bf16.msra.mxu0 %v9203_v61  ;;  %v5842_v61 = vld [vmem:[#allocation26 + $0x20] sm:$0xff] }
0x132d   : > { %v5416_v13 = vsel %vm1218_vm0, %v5409_v36, %v5411_v29  ;;  %v5423_v53 = vsel %vm1218_vm0, %v11541_v51, %v5413_v33  ;;  %9208 = vmatprep.subr.bf16.mxu0 %v9207_v52  ;;  %v9243_v43 = vpack.c.bf16 %v5843_v25, %v5842_v61  ;;  %v5844_v36 = vld [vmem:[#allocation26 + $0x30] sm:$0xff]  ;;  %v5846_v29 = vld [vmem:[#allocation26 + $0x40] sm:$0xff] }
0x132e   : > { %v5424_v19 = vsel %vm2631_vm10, %v5416_v13, %v11248_v27  ;;  %5543 = vmatprep.mubr.f32.mxu0 %v5423_v53  ;;  %v5847_v13 = vld [vmem:[#allocation26 + $0x48] sm:$0xff] }
0x132f   : > { %5544 = vmatmul.mubr.f32.gmra.mrb[70].mxu0 %v11546_v7  ;;  %v5426_v28 = vsel %vm2634_vm13, %v5424_v19, 0.0  ;;  %v5660_v7 = vld [vmem:[#allocation23 + $0x20] sm:$0xff]  ;;  %v9251_v53 = vpack.c.bf16 %v5847_v13, %v5846_v29  ;;  %v5758_v19 = vld [vmem:[#allocation25 + $0x58] sm:$0xff] }
0x1330   : > { %8609 = vmatprep.mubr.msk.f32.mxu1 %vm2228_vm3, %v5426_v28  ;;  %v5415_v46 = vpop.permute.xlu0 %5414  ;;  %9210 = vmatpush3.bf16.msra.mxu0 %v9207_v52  ;;  %v9179_v60 = vpack.c.bf16 %v5661_v37, %v5660_v7  ;;  %v5845_v52 = vld [vmem:[#allocation26 + $0x38] sm:$0xff]  ;;  %v5848_v28 = vld [vmem:[#allocation26 + $0x50] sm:$0xff]  ;;  %v5851_v7 = vld [vmem:[#allocation26 + $0x68] sm:$0xff] }
0x1331   : > { %v5417_v51 = vsel %vm1218_vm0, %v5413_v33, %v5415_v46  ;;  %9212 = vmatprep.subr.bf16.mxu0 %v9211_v58  ;;  %v9247_v56 = vpack.c.bf16 %v5845_v52, %v5844_v36  ;;  %v9219_v33 = vpack.c.bf16 %v5756_v14, %v5755_v9  ;;  %v9255_v46 = vpack.c.bf16 %v5849_v41, %v5848_v28 }
0x1332   : > { %v5425_v27 = vsel %vm2631_vm10, %v5417_v51, %v11241_v44  ;;  %v9183_v44 = vpack.c.bf16 %v5663_v35, %v5662_v4  ;;  %v5759_v51 = vld [vmem:[#allocation25 + $0x60] sm:$0xff]  ;;  %v5762_v4 = vld [vmem:[#allocation25 + $0x78] sm:$0xff]  ;;  %v5852_v35 = vld [vmem:[#allocation26 + $0x70] sm:$0xff]  ;;  %v4754_v36 = vsel %vm4750_vm6, %v11632_v48, %v4752_v26 }
0x1333   : > { %v5427_v62 = vsel %vm2634_vm13, %v5425_v27, 0.0  ;;  %v5760_v27 = vld [vmem:[#allocation25 + $0x68] sm:$0xff]  ;;  %v9263_v23 = vpack.c.bf16 %v5853_v57, %v5852_v35 }
0x1334   : > { %8610 = vmatmul.mubr.msk.f32.vlgmr.msra.gmra.mrb[54].mxu1 %vm2228_vm3, %v5427_v62  ;;  %9214 = vmatpush3.bf16.msra.mxu0 %v9211_v58  ;;  %v5757_v58 = vld [vmem:[#allocation25 + $0x50] sm:$0xff]  ;;  %v9227_v62 = vpack.c.bf16 %v5760_v27, %v5759_v51 }
0x1335   : > { %9174 = vmatpush3.bf16.msra.mxu1 %v11637_v24  ;;  %8644 = vmatprep.mubr.f32.mxu1 %v2603_v1  ;;  %v9191_v24 = vpack.c.bf16 %v5667_v2, %v5666_v3  ;;  %v9223_v20 = vpack.c.bf16 %v5758_v19, %v5757_v58 }
0x1336   : > { %9176 = vmatprep.subr.bf16.mxu1 %v9175_v30  ;;  %9216 = vmatprep.subr.bf16.mxu0 %v9215_v40 }
0x1338   : > { %9218 = vmatpush3.bf16.msra.mxu0 %v9215_v40 }
0x1339   : > { %9178 = vmatpush3.bf16.msra.mxu1 %v9175_v30  ;;  %9220 = vmatprep.subr.bf16.mxu0 %v9219_v33  ;;  %v5850_v30 = vld [vmem:[#allocation26 + $0x60] sm:$0xff] }
0x133a   : > { %9180 = vmatprep.subr.bf16.mxu1 %v9179_v60  ;;  %v9259_v37 = vpack.c.bf16 %v5851_v7, %v5850_v30 }
0x133c   : > { %9222 = vmatpush3.bf16.msra.mxu0 %v9219_v33 }
0x133d   : > { %9182 = vmatpush3.bf16.msra.mxu1 %v9179_v60  ;;  %9224 = vmatprep.subr.bf16.mxu0 %v9223_v20  ;;  %v5761_v60 = vld [vmem:[#allocation25 + $0x70] sm:$0xff] }
0x133e   : > { %9184 = vmatprep.subr.bf16.mxu1 %v9183_v44 }
0x1340   : > { %9226 = vmatpush3.bf16.msra.mxu0 %v9223_v20 }
0x1341   : > { %9186 = vmatpush3.bf16.msra.mxu1 %v9183_v44  ;;  %9228 = vmatprep.subr.bf16.mxu0 %v9227_v62  ;;  %v9231_v44 = vpack.c.bf16 %v5762_v4, %v5761_v60  ;;  %v5650_v25 = vpop.permute.xlu0 %5649 }
0x1342   : > { %9188 = vmatprep.subr.bf16.mxu1 %v9187_v45 }
0x1344   : > { %9230 = vmatpush3.bf16.msra.mxu0 %v9227_v62 }
0x1345   : > { %9190 = vmatpush3.bf16.msra.mxu1 %v9187_v45  ;;  %9232 = vmatprep.subr.bf16.mxu0 %v9231_v44 }
0x1346   : > { %9192 = vmatprep.subr.bf16.mxu1 %v9191_v24 }
0x1348   : > { %9234 = vmatpush3.bf16.msra.mxu0 %v9231_v44 }
0x1349   : > { %9194 = vmatpush3.bf16.msra.mxu1 %v9191_v24 }
0x134a   : > { %9196 = vmatprep.subr.bf16.mxu1 %v9195_v21 }
0x134d   : > { %9198 = vmatpush3.bf16.msra.mxu1 %v9195_v21  ;;  %v7946_v21 = vld [vmem:[%s12060_s26] ss:$0 sm:$0xff]  ;;  %s10413_s26 = smov 127  }
0x134e   : > { %9200 = vmatprep.subr.bf16.mxu1 %v9199_v17 }
0x1351   : > { %9202 = vmatpush3.bf16.msra.mxu1 %v9199_v17 }
0x1352   : > { %9236 = vmatprep.subr.bf16.mxu1 %v9235_v59 }
0x1354   : > { %8645 = vmatmul.mubr.f32.vlgmr.msra.gmra.mrb[56].mxu1 %v2604_v54 }
0x1355   : > { %9238 = vmatpush3.bf16.msra.mxu1 %v9235_v59 }
0x1356   : > { %9240 = vmatprep.subr.bf16.mxu1 %v9239_v31 }
0x1359   : > { %9242 = vmatpush3.bf16.msra.mxu1 %v9239_v31  ;;  %v5638_v31 = vpop.permute.xlu1 %5637 }
0x135a   : > { %9244 = vmatprep.subr.bf16.mxu1 %v9243_v43  ;;  %v5641_v40 = vmul.f32 %v5638_v31, %v4755_v38  ;;  %v5640_v9 = vmul.f32 %v5638_v31, %v4754_v36 }
0x135d   : > { %9246 = vmatpush3.bf16.msra.mxu1 %v9243_v43 }
0x135e   : > { %9248 = vmatprep.subr.bf16.mxu1 %v9247_v56 }
0x1361   : > { %9250 = vmatpush3.bf16.msra.mxu1 %v9247_v56 }
0x1362   : > { %9252 = vmatprep.subr.bf16.mxu1 %v9251_v53 }
0x1365   : > { %9254 = vmatpush3.bf16.msra.mxu1 %v9251_v53 }
0x1366   : > { %9256 = vmatprep.subr.bf16.mxu1 %v9255_v46 }
0x1369   : > { %9258 = vmatpush3.bf16.msra.mxu1 %v9255_v46 }
0x136a   : > { %9260 = vmatprep.subr.bf16.mxu1 %v9259_v37 }
0x136d   : > { %9262 = vmatpush3.bf16.msra.mxu1 %v9259_v37 }
0x136e   : > { %9264 = vmatprep.subr.bf16.mxu1 %v9263_v23 }
0x1371   : > { %9266 = vmatpush3.bf16.msra.mxu1 %v9263_v23 }
0x13fe   : > { %v8192_v45 = vpop.f32.mrb[68].mxu0 }
0x13ff   : > { %v8193_v3 = vpop.f32.mrb[69].mxu0 }
0x1400   : > { %v8194_v2 = vadd.f32 %v8193_v3, %v8192_v45 }
0x1402   : > { %v8195_v24 = vpop.f32.mrb[70].mxu0  ;;  %v5541_v17 = vadd.f32 %v8194_v2, %v7946_v21 }
0x1403   : > { %v8196_v8 = vpop.f32.mrb[71].mxu0 }
0x1404   : > { %v8197_v55 = vadd.f32 %v8196_v8, %v8195_v24 }
0x1406   : > { %v5546_v15 = vadd.f32 %v8197_v55, %v7946_v21 }
0x1407   : > { %v8611_v42 = vpop.f32.mrb[54].mxu1 }
0x1408   : > { %v5621_v5 = vadd.f32 %v8611_v42, %v5546_v15  ;;  %v5615_v59 = vpop.f32.mrb[55].mxu1 }
0x1409   : > { %v5616_v12 = vadd.f32 %v5615_v59, %v5541_v17 }
0x140a   : > { %v5627_v61 = vmul.f32 0.2, %v5621_v5  ;;  %vm5625_vm7 = vcmp.ge.f32.partialorder %v5621_v5, 0.0 }
0x140b   : > { %v5626_v43 = vmul.f32 0.2, %v5616_v12  ;;  %vm5624_vm9 = vcmp.ge.f32.partialorder %v5616_v12, 0.0 }
0x140c   : > { %v5629_v34 = vsel %vm5625_vm7, %v5621_v5, %v5627_v61 }
0x140d   : > { %v5628_v52 = vsel %vm5624_vm9, %v5616_v12, %v5626_v43  ;;  %v5653_v56 = vmul.f32 %v5650_v25, %v5629_v34 }
0x140e   : > { %v5652_v14 = vmul.f32 %v5650_v25, %v5628_v52 }
0x140f   : > { %v5655_v29 = vadd.f32 %v5653_v56, %v5641_v40 }
0x1410   : > { %v5654_v33 = vadd.f32 %v5652_v14, %v5640_v9 }
0x1412   : > { %8679 = vmatprep.mubr.f32.mxu0 %v5654_v33  ;;  %8714 = vmatprep.mubr.f32.mxu1 %v5654_v33 }
0x1413   : > { %8680 = vmatmul.mubr.f32.vlgmr.msra.gmra.mrb[72].mxu0 %v5655_v29  ;;  %8715 = vmatmul.mubr.f32.vlgmr.msra.gmra.mrb[58].mxu1 %v5655_v29 }
0x1427   : > { %v11690_v13 = vpop.f32.mrb[56].mxu1 }
0x1428   : > { %v11692_v53 = vpop.f32.mrb[57].mxu1 }
0x1429   : > { %8721 = vmatprep.mubr.msk.f32.mxu0 %vm5929_vm11, %v11692_v53 }
0x14e6   : > { %v8681_v48 = vpop.f32.mrb[72].mxu0  ;;  %v8716_v10 = vpop.f32.mrb[58].mxu1 }
0x14e7   : > { %v5829_v58 = vpop.f32.mrb[73].mxu0  ;;  %v5920_v19 = vpop.f32.mrb[59].mxu1 }
0x14e8   : > { %v9267_v20 = vpack.c.bf16 %v8681_v48, %v5829_v58  ;;  %v9273_v41 = vpack.c.bf16 %v8716_v10, %v5920_v19  ;;  %v11702_v46 = vpack.i.bf16 %v8681_v48, %v5829_v58  ;;  %v11704_v51 = vpack.i.bf16 %v8716_v10, %v5920_v19 }
0x14ea   : > { %9269 = vmatprep.subr.msk.bf16.mxu0 %vm11698_vm12, %v9267_v20 }
0x14eb   : > { %9272 = vmatpush3.bf16.xpose.msk.msra.mxu0 %vm11698_vm12, %v9267_v20 }
0x14ec   : > { %9274 = vmatprep.subr.bf16.mxu0 %v9273_v41 }
0x14f2   : > { %8722 = vmatmul.mubr.msk.f32.vlgmr.msra.gmra.mrb[74].mxu0 %vm5929_vm11, %v11690_v13 }
0x14f3   : > { %9276 = vmatpush3.bf16.msra.mxu0 %v9273_v41 }
0x15c5   : > { %v8723_v27 = vpop.f32.mrb[74].mxu0 }
0x15c6   : > { %v6018_v30 = vmul.f32 0.17677669, %v8723_v27  ;;  %v6008_v62 = vpop.f32.mrb[75].mxu0 }
0x15c7   : > { %v6017_v7 = vmul.f32 0.17677669, %v6008_v62 }
0x15c8   : > { %v6022_v37 = vsel %vm1353_vm2, %v6018_v30, -inf }
0x15c9   : > { %6023 = vmax.xlane.f32.xlu0 %v6022_v37  ;;  %v6019_v60 = vsel %vm1353_vm2, %v6017_v7, -inf }
0x15ca   : > { %6020 = vmax.xlane.f32.xlu1 %v6019_v60 }
0x15db   : > { %9682 = vrot.lane.b32.xlu1 %v11702_v46, %s11971_s11 }
0x1656   : > { %v6024_v4 = vpop.xlane.xlu0 %6023 }
0x1657   : > { %v6026_v35 = vsub.f32 %v6018_v30, %v6024_v4  ;;  %v6021_v44 = vpop.xlane.xlu1 %6020 }
0x1658   : > { %v6025_v57 = vsub.f32 %v6017_v7, %v6021_v44 }
0x1659   : > { %v6029_v23 = vmul.f32 1.442695, %v6026_v35 }
0x165a   : > { %v6027_v45 = vmul.f32 1.442695, %v6025_v57 }
0x165b   : > { %9735 = vpow2.f32 %v6029_v23  ;;  %v9683_v3 = vpop.permute.xlu1 %9682 }
0x165c   : > { %9737 = vpow2.f32 %v6027_v45  ;;  %v9685_v2 = vunpack.i.h.bf16 %v9683_v3  ;;  %v9684_v24 = vunpack.i.l.bf16 %v9683_v3 }
0x165e   : > { %v9277_v8 = vpack.c.bf16 %v9685_v2, %v9684_v24 }
0x1660   : > { %9279 = vmatprep.subr.msk.bf16.mxu0 %vm11698_vm12, %v9277_v8 }
0x1665   : > { %v9736_v55 = vpop.eup %9735 }
0x1666   : > { %v9738_v21 = vpop.eup %9737  ;;  %v6034_v15 = vsel %vm1353_vm2, %v9736_v55, 0.0 }
0x1667   : > { %6035 = vadd.xlane.f32.xlu0 %v6034_v15  ;;  %v6031_v42 = vsel %vm1353_vm2, %v9738_v21, 0.0 }
0x1668   : > { %6032 = vadd.xlane.f32.xlu1 %v6031_v42 }
0x1679   : > { %6124 = vrot.lane.b32.xlu1 %v11690_v13, %s11971_s11 }
0x167d   : > { %6122 = vrot.lane.b32.xlu0 %v11692_v53, %s11971_s11 }
0x16f4   : > { %v6036_v17 = vpop.xlane.xlu0 %6035 }
0x16f5   : > { %9739 = vrcp.f32 %v6036_v17  ;;  %v6033_v0 = vpop.xlane.xlu1 %6032 }
0x16f6   : > { %9741 = vrcp.f32 %v6033_v0 }
0x16f8   : > { %v6123_v31 = vpop.permute.xlu0 %6122 }
0x16f9   : > { %v6125_v61 = vpop.permute.xlu1 %6124 }
0x16ff   : > { %v9740_v5 = vpop.eup %9739 }
0x1700   : > { %v9742_v59 = vpop.eup %9741  ;;  %v6040_v12 = vmul.f32 %v9740_v5, %v9736_v55 }
0x1701   : > { %v6039_v26 = vmul.f32 %v9742_v59, %v9738_v21 }
0x1703   : > { %8728 = vmatprep.mubr.msk.f32.mxu0 %vm1353_vm2, %v6039_v26 }
0x1704   : > { %8729 = vmatmul.mubr.msk.f32.vlgmr.msra.gmra.mrb[76].mxu0 %vm1353_vm2, %v6040_v12 }
0x1705   : > { %9282 = vmatpush3.bf16.xpose.msk.msra.mxu0 %vm11698_vm12, %v9277_v8  ;;  %8735 = vmatprep.mubr.msk.f32.mxu0 %vm5929_vm11, %v6123_v31 }
0x170c   : > { %8736 = vmatmul.mubr.msk.f32.vlgmr.msra.gmra.mrb[78].mxu0 %vm5929_vm11, %v6125_v61 }
0x17d7   : > { %v11730_v25 = vpop.f32.mrb[76].mxu0 }
0x17d8   : > { %v11732_v43 = vpop.f32.mrb[77].mxu0 }
0x17df   : > { %v8737_v38 = vpop.f32.mrb[78].mxu0 }
0x17e0   : > { %v6214_v34 = vmul.f32 0.17677669, %v8737_v38  ;;  %v6204_v36 = vpop.f32.mrb[79].mxu0 }
0x17e1   : > { %v6213_v40 = vmul.f32 0.17677669, %v6204_v36 }
0x17e2   : > { %v6218_v52 = vsel %vm1353_vm2, %v6214_v34, -inf }
0x17e3   : > { %6219 = vmax.xlane.f32.xlu0 %v6218_v52  ;;  %v6215_v56 = vsel %vm1353_vm2, %v6213_v40, -inf }
0x17e4   : > { %6216 = vmax.xlane.f32.xlu1 %v6215_v56 }
0x1870   : > { %v6220_v9 = vpop.xlane.xlu0 %6219 }
0x1871   : > { %v6222_v14 = vsub.f32 %v6214_v34, %v6220_v9  ;;  %v6217_v29 = vpop.xlane.xlu1 %6216 }
0x1872   : > { %v6221_v33 = vsub.f32 %v6213_v40, %v6217_v29 }
0x1873   : > { %v6225_v48 = vmul.f32 1.442695, %v6222_v14 }
0x1874   : > { %v6223_v10 = vmul.f32 1.442695, %v6221_v33 }
0x1875   : > { %9743 = vpow2.f32 %v6225_v48 }
0x1876   : > { %9745 = vpow2.f32 %v6223_v10 }
0x187f   : > { %v9744_v58 = vpop.eup %9743 }
0x1880   : > { %v9746_v19 = vpop.eup %9745  ;;  %v6230_v20 = vsel %vm1353_vm2, %v9744_v58, 0.0 }
0x1881   : > { %6231 = vadd.xlane.f32.xlu1 %v6230_v20  ;;  %v6227_v41 = vsel %vm1353_vm2, %v9746_v19, 0.0 }
0x1882   : > { %6228 = vadd.xlane.f32.xlu0 %v6227_v41 }
0x1892   : > { %9692 = vrot.lane.b32.xlu1 %v11702_v46, %s10406_s28 }
0x1896   : > { %6326 = vrot.lane.b32.xlu1 %v11692_v53, %s10406_s28 }
0x1898   : > { %9687 = vrot.lane.b32.xlu0 %v11704_v51, %s11971_s11  ;;  %s10414_s11 = smov 1  }
0x189c   : > { %6328 = vrot.lane.b32.xlu0 %v11690_v13, %s10406_s28 }
0x190e   : > { %v6232_v27 = vpop.xlane.xlu1 %6231 }
0x190f   : > { %9747 = vrcp.f32 %v6232_v27  ;;  %v6229_v30 = vpop.xlane.xlu0 %6228 }
0x1910   : > { %9749 = vrcp.f32 %v6229_v30 }
0x1912   : > { %v9693_v62 = vpop.permute.xlu1 %9692 }
0x1913   : > { %v9688_v7 = vpop.permute.xlu0 %9687  ;;  %v9695_v37 = vunpack.i.h.bf16 %v9693_v62  ;;  %v9694_v60 = vunpack.i.l.bf16 %v9693_v62 }
0x1914   : > { %v9690_v4 = vunpack.i.h.bf16 %v9688_v7  ;;  %v9689_v35 = vunpack.i.l.bf16 %v9688_v7 }
0x1915   : > { %v9287_v57 = vpack.c.bf16 %v9695_v37, %v9694_v60 }
0x1916   : > { %v9283_v44 = vpack.c.bf16 %v9690_v4, %v9689_v35  ;;  %v6327_v24 = vpop.permute.xlu1 %6326 }
0x1917   : > { %v6329_v8 = vpop.permute.xlu0 %6328 }
0x1918   : > { %9284 = vmatprep.subr.bf16.mxu1 %v9283_v44 }
0x1919   : > { %v9748_v23 = vpop.eup %9747  ;;  %9286 = vmatpush3.bf16.msra.mxu1 %v9283_v44 }
0x191a   : > { %v9750_v45 = vpop.eup %9749  ;;  %9289 = vmatprep.subr.msk.bf16.mxu1 %vm11698_vm12, %v9287_v57  ;;  %v6236_v2 = vmul.f32 %v9748_v23, %v9744_v58 }
0x191b   : > { %v6235_v3 = vmul.f32 %v9750_v45, %v9746_v19 }
0x191d   : > { %8742 = vmatprep.mubr.msk.f32.mxu1 %vm1353_vm2, %v6235_v3 }
0x191e   : > { %8743 = vmatmul.mubr.msk.f32.vlgmr.msra.gmra.mrb[60].mxu1 %vm1353_vm2, %v6236_v2 }
0x191f   : > { %8749 = vmatprep.mubr.msk.f32.mxu1 %vm5929_vm11, %v6327_v24 }
0x1922   : > { %9292 = vmatpush3.bf16.xpose.msk.msra.mxu1 %vm11698_vm12, %v9287_v57 }
0x1929   : > { %8750 = vmatmul.mubr.msk.f32.vlgmr.msra.gmra.mrb[62].mxu1 %vm5929_vm11, %v6329_v8 }
0x19f1   : > { %v11754_v55 = vpop.f32.mrb[60].mxu1 }
0x19f2   : > { %v11756_v21 = vpop.f32.mrb[61].mxu1 }
0x19f3   : > { %v9711_v15 = vpack.i.bf16 %v11754_v55, %v11756_v21 }
0x19fc   : > { %v8751_v42 = vpop.f32.mrb[62].mxu1 }
0x19fd   : > { %v6418_v17 = vmul.f32 0.17677669, %v8751_v42  ;;  %v6408_v0 = vpop.f32.mrb[63].mxu1 }
0x19fe   : > { %v6417_v5 = vmul.f32 0.17677669, %v6408_v0 }
0x19ff   : > { %v6422_v59 = vsel %vm1353_vm2, %v6418_v17, -inf }
0x1a00   : > { %6423 = vmax.xlane.f32.xlu0 %v6422_v59  ;;  %v6419_v26 = vsel %vm1353_vm2, %v6417_v5, -inf }
0x1a01   : > { %6420 = vmax.xlane.f32.xlu1 %v6419_v26 }
0x1a8d   : > { %v6424_v12 = vpop.xlane.xlu0 %6423 }
0x1a8e   : > { %v6426_v31 = vsub.f32 %v6418_v17, %v6424_v12  ;;  %v6421_v61 = vpop.xlane.xlu1 %6420 }
0x1a8f   : > { %v6425_v38 = vsub.f32 %v6417_v5, %v6421_v61  ;;  %v9776_v61 = vld [vmem:[%s10912_s10 + $0x8] sm:$0xff] }
0x1a90   : > { %v6429_v34 = vmul.f32 1.442695, %v6426_v31  ;;  %v9775_v31 = vld [vmem:[%s10912_s10] sm:$0xff]  ;;  %s11974_s10 = smov 5  }
0x1a91   : > { %v6427_v36 = vmul.f32 1.442695, %v6425_v38 }
0x1a92   : > { %9751 = vpow2.f32 %v6429_v34 }
0x1a93   : > { %9753 = vpow2.f32 %v6427_v36  ;;  %v6763_v36 = vld [vmem:[#allocation28 + $0x10] sm:$0xff] }
0x1a9c   : > { %v9752_v40 = vpop.eup %9751 }
0x1a9d   : > { %v9754_v52 = vpop.eup %9753  ;;  %v6434_v56 = vsel %vm1353_vm2, %v9752_v40, 0.0 }
0x1a9e   : > { %6435 = vadd.xlane.f32.xlu1 %v6434_v56  ;;  %v6431_v9 = vsel %vm1353_vm2, %v9754_v52, 0.0 }
0x1a9f   : > { %6432 = vadd.xlane.f32.xlu0 %v6431_v9  ;;  %v6765_v9 = vld [vmem:[#allocation28 + $0x20] sm:$0xff] }
0x1aaf   : > { %9702 = vrot.lane.b32.xlu1 %v11702_v46, %s10411_s2 }
0x1ab3   : > { %6528 = vrot.lane.b32.xlu1 %v11692_v53, %s10411_s2 }
0x1ab5   : > { %9697 = vrot.lane.b32.xlu0 %v11704_v51, %s10406_s28 }
0x1ab9   : > { %6530 = vrot.lane.b32.xlu0 %v11690_v13, %s10411_s2 }
0x1b2b   : > { %v6436_v14 = vpop.xlane.xlu1 %6435 }
0x1b2c   : > { %9755 = vrcp.f32 %v6436_v14  ;;  %v6433_v29 = vpop.xlane.xlu0 %6432  ;;  %v6766_v14 = vld [vmem:[#allocation28 + $0x28] sm:$0xff] }
0x1b2d   : > { %9757 = vrcp.f32 %v6433_v29  ;;  %v9315_v29 = vpack.c.bf16 %v6766_v14, %v6765_v9  ;;  %v6878_v9 = vld [vmem:[#allocation22 + $0xd0] sm:$0xff]  ;;  %v6879_v14 = vld [vmem:[#allocation22 + $0xd8] sm:$0xff] }
0x1b2f   : > { %v9703_v33 = vpop.permute.xlu1 %9702 }
0x1b30   : > { %v9698_v48 = vpop.permute.xlu0 %9697  ;;  %v9705_v10 = vunpack.i.h.bf16 %v9703_v33  ;;  %v9704_v58 = vunpack.i.l.bf16 %v9703_v33  ;;  %v6767_v33 = vld [vmem:[#allocation28 + $0x30] sm:$0xff] }
0x1b31   : > { %v9700_v19 = vunpack.i.h.bf16 %v9698_v48  ;;  %v9699_v20 = vunpack.i.l.bf16 %v9698_v48  ;;  %v6768_v48 = vld [vmem:[#allocation28 + $0x38] sm:$0xff] }
0x1b32   : > { %v9297_v41 = vpack.c.bf16 %v9705_v10, %v9704_v58  ;;  %v9319_v10 = vpack.c.bf16 %v6768_v48, %v6767_v33  ;;  %v6769_v58 = vld [vmem:[#allocation28 + $0x40] sm:$0xff]  ;;  %v9359_v33 = vpack.c.bf16 %v6879_v14, %v6878_v9  ;;  %v6862_v48 = vld [vmem:[#allocation22 + $0x50] sm:$0xff] }
0x1b33   : > { %v9293_v46 = vpack.c.bf16 %v9700_v19, %v9699_v20  ;;  %v6529_v62 = vpop.permute.xlu1 %6528  ;;  %v6770_v19 = vld [vmem:[#allocation28 + $0x48] sm:$0xff] }
0x1b34   : > { %v6531_v7 = vpop.permute.xlu0 %6530  ;;  %v9323_v20 = vpack.c.bf16 %v6770_v19, %v6769_v58  ;;  %v6880_v58 = vld [vmem:[#allocation22 + $0xe0] sm:$0xff]  ;;  %v6881_v19 = vld [vmem:[#allocation22 + $0xe8] sm:$0xff] }
0x1b35   : > { %9294 = vmatprep.subr.bf16.mxu0 %v9293_v46 }
0x1b36   : > { %v9756_v53 = vpop.eup %9755  ;;  %9296 = vmatpush3.bf16.msra.mxu0 %v9293_v46  ;;  %v6771_v46 = vld [vmem:[#allocation28 + $0x50] sm:$0xff] }
0x1b37   : > { %v9758_v27 = vpop.eup %9757  ;;  %9299 = vmatprep.subr.msk.bf16.mxu0 %vm11698_vm12, %v9297_v41  ;;  %v6440_v30 = vmul.f32 %v9756_v53, %v9752_v40 }
0x1b38   : > { %v6439_v13 = vmul.f32 %v9758_v27, %v9754_v52  ;;  %v6764_v52 = vld [vmem:[#allocation28 + $0x18] sm:$0xff]  ;;  %v6773_v27 = vld [vmem:[#allocation28 + $0x60] sm:$0xff] }
0x1b39   : > { %v9311_v56 = vpack.c.bf16 %v6764_v52, %v6763_v36  ;;  %v6860_v52 = vld [vmem:[#allocation22 + $0x40] sm:$0xff] }
0x1b3a   : > { %8756 = vmatprep.mubr.msk.f32.mxu0 %vm1353_vm2, %v6439_v13  ;;  %v6774_v13 = vld [vmem:[#allocation28 + $0x68] sm:$0xff] }
0x1b3b   : > { %8757 = vmatmul.mubr.msk.f32.vlgmr.msra.gmra.mrb[80].mxu0 %vm1353_vm2, %v6440_v30  ;;  %v9331_v30 = vpack.c.bf16 %v6774_v13, %v6773_v27  ;;  %v6882_v27 = vld [vmem:[#allocation22 + $0xf0] sm:$0xff]  ;;  %v6883_v13 = vld [vmem:[#allocation22 + $0xf8] sm:$0xff] }
0x1b3c   : > { %8763 = vmatprep.mubr.msk.f32.mxu0 %vm5929_vm11, %v6529_v62  ;;  %v6775_v62 = vld [vmem:[#allocation28 + $0x70] sm:$0xff] }
0x1b3f   : > { %9302 = vmatpush3.bf16.xpose.msk.msra.mxu0 %vm11698_vm12, %v9297_v41  ;;  %v6772_v41 = vld [vmem:[#allocation28 + $0x58] sm:$0xff] }
0x1b40   : > { %v9327_v53 = vpack.c.bf16 %v6772_v41, %v6771_v46  ;;  %v9363_v46 = vpack.c.bf16 %v6881_v19, %v6880_v58  ;;  %v6864_v41 = vld [vmem:[#allocation22 + $0x60] sm:$0xff] }
0x1b46   : > { %8764 = vmatmul.mubr.msk.f32.vlgmr.msra.gmra.mrb[82].mxu0 %vm5929_vm11, %v6531_v7  ;;  %v6776_v7 = vld [vmem:[#allocation28 + $0x78] sm:$0xff] }
0x1c0e   : > { %v8758_v37 = vpop.f32.mrb[80].mxu0 }
0x1c0f   : > { %v6519_v60 = vpop.f32.mrb[81].mxu0 }
0x1c10   : > { %v9716_v4 = vpack.i.bf16 %v8758_v37, %v6519_v60  ;;  %v9335_v37 = vpack.c.bf16 %v6776_v7, %v6775_v62  ;;  %v9367_v62 = vpack.c.bf16 %v6883_v13, %v6882_v27 }
0x1c19   : > { %v8765_v35 = vpop.f32.mrb[82].mxu0 }
0x1c1a   : > { %v6620_v44 = vmul.f32 0.17677669, %v8765_v35  ;;  %v6610_v57 = vpop.f32.mrb[83].mxu0 }
0x1c1b   : > { %v6619_v23 = vmul.f32 0.17677669, %v6610_v57  ;;  %v12066_v57 = vld [vmem:[#allocation70_spill] sm:$0xff] }
0x1c1c   : > { %v6624_v45 = vsel %vm1353_vm2, %v6620_v44, -inf }
0x1c1d   : > { %6625 = vmax.xlane.f32.xlu0 %v6624_v45  ;;  %v6621_v3 = vsel %vm1353_vm2, %v6619_v23, -inf  ;;  %v6868_v45 = vld [vmem:[#allocation22 + $0x80] sm:$0xff] }
0x1c1e   : > { %6622 = vmax.xlane.f32.xlu1 %v6621_v3  ;;  %v6869_v3 = vld [vmem:[#allocation22 + $0x88] sm:$0xff] }
0x1caa   : > { %v6626_v2 = vpop.xlane.xlu0 %6625 }
0x1cab   : > { %v6628_v24 = vsub.f32 %v6620_v44, %v6626_v2  ;;  %v6623_v8 = vpop.xlane.xlu1 %6622  ;;  %v12065_v44 = vld [vmem:[#allocation67_spill] sm:$0xff] }
0x1cac   : > { %v6627_v42 = vsub.f32 %v6619_v23, %v6623_v8  ;;  %v12067_v23 = vld [vmem:[#allocation71_spill] sm:$0xff]  ;;  %v6853_v8 = vld [vmem:[#allocation22 + $0x8] sm:$0xff] }
0x1cad   : > { %v6631_v17 = vmul.f32 1.442695, %v6628_v24  ;;  %v6852_v2 = vld [vmem:[#allocation22] sm:$0xff]  ;;  %v9339_v24 = vpack.c.bf16 %v6869_v3, %v6868_v45 }
0x1cae   : > { %v6629_v0 = vmul.f32 1.442695, %v6627_v42  ;;  %v6870_v42 = vld [vmem:[#allocation22 + $0x90] sm:$0xff] }
0x1caf   : > { %9759 = vpow2.f32 %v6631_v17  ;;  %v6871_v17 = vld [vmem:[#allocation22 + $0x98] sm:$0xff]  ;;  %9340 = vmatprep.subr.bf16.mxu0 %v9339_v24 }
0x1cb0   : > { %9761 = vpow2.f32 %v6629_v0  ;;  %v9341_v0 = vpack.c.bf16 %v6853_v8, %v6852_v2 }
0x1cb2   : > { %9342 = vmatpush3.bf16.msra.mxu0 %v9341_v0  ;;  %v6867_v0 = vld [vmem:[#allocation22 + $0x78] sm:$0xff] }
0x1cb9   : > { %v9760_v5 = vpop.eup %9759 }
0x1cba   : > { %v9762_v59 = vpop.eup %9761  ;;  %v6636_v26 = vsel %vm1353_vm2, %v9760_v5, 0.0 }
0x1cbb   : > { %6637 = vadd.xlane.f32.xlu1 %v6636_v26  ;;  %v6633_v12 = vsel %vm1353_vm2, %v9762_v59, 0.0  ;;  %v6873_v26 = vld [vmem:[#allocation22 + $0xa8] sm:$0xff] }
0x1cbc   : > { %6634 = vadd.xlane.f32.xlu0 %v6633_v12  ;;  %v12068_v12 = vld [vmem:[#allocation72_spill] sm:$0xff] }
0x1ccc   : > { %9712 = vrot.lane.b32.xlu1 %v9711_v15, %s10411_s2 }
0x1cd0   : > { %9717 = vrot.lane.b32.xlu1 %v9716_v4, %s10406_s28  ;;  %s12063_s28 = smov 3  }
0x1cd2   : > { %9707 = vrot.lane.b32.xlu0 %v11704_v51, %s10411_s2  ;;  %s10416_s2 = smov 4  }
0x1cd4   : > { %7066 = vrot.lane.b32.xlu1 %v9775_v31, %s10412_s7 }
0x1cd8   : > { %7068 = vrot.lane.b32.xlu1 %v9776_v61, %s10412_s7  ;;  %s12064_s7 = smov 96  }
0x1cdc   : > { %7082 = vrot.lane.b32.xlu1 %v11003_v6, %s10413_s26 }
0x1ce0   : > { %7090 = vrot.lane.b32.xlu1 %v11062_v47, %s10414_s11 }
0x1ce4   : > { %7098 = vrot.lane.b32.xlu1 %v11089_v11, %s10415_s15 }
0x1ce8   : > { %7122 = vrot.lane.b32.xlu1 %v11115_v39, %s12063_s28 }
0x1cec   : > { %7130 = vrot.lane.b32.xlu1 %v11160_v22, %s10416_s2  ;;  %v6761_v22 = vld [vmem:[#allocation28] sm:$0xff] }
0x1cf0   : > { %7138 = vrot.lane.b32.xlu1 %v11188_v63, %s11974_s10  ;;  %v6762_v63 = vld [vmem:[#allocation28 + $0x8] sm:$0xff]  ;;  %s10418_s10 = smov 126  }
0x1cf1   : > { %v9307_v40 = vpack.c.bf16 %v6762_v63, %v6761_v22  ;;  %v6877_v22 = vld [vmem:[#allocation22 + $0xc8] sm:$0xff]  ;;  %v12071_v63 = vld [vmem:[#allocation74_spill] sm:$0xff] }
0x1d48   : > { %v6638_v6 = vpop.xlane.xlu1 %6637 }
0x1d49   : > { %9763 = vrcp.f32 %v6638_v6  ;;  %v6635_v51 = vpop.xlane.xlu0 %6634  ;;  %v6856_v6 = vld [vmem:[#allocation22 + $0x20] sm:$0xff] }
0x1d4a   : > { %9765 = vrcp.f32 %v6635_v51  ;;  %v6857_v51 = vld [vmem:[#allocation22 + $0x28] sm:$0xff] }
0x1d4c   : > { %v9713_v7 = vpop.permute.xlu1 %9712 }
0x1d4d   : > { %v9708_v47 = vpop.permute.xlu0 %9707 }
0x1d4e   : > { %v9710_v55 = vunpack.i.h.bf16 %v9708_v47  ;;  %v9709_v21 = vunpack.i.l.bf16 %v9708_v47  ;;  %v6874_v47 = vld [vmem:[#allocation22 + $0xb0] sm:$0xff] }
0x1d50   : > { %v9303_v15 = vpack.c.bf16 %v9710_v55, %v9709_v21  ;;  %v6875_v55 = vld [vmem:[#allocation22 + $0xb8] sm:$0xff]  ;;  %v12069_v21 = vld [vmem:[#allocation73_spill] sm:$0xff] }
0x1d52   : > { %9304 = vmatprep.subr.bf16.mxu1 %v9303_v15 }
0x1d53   : > { %v9764_v11 = vpop.eup %9763  ;;  %9306 = vmatpush3.bf16.msra.mxu1 %v9303_v15  ;;  %v9349_v15 = vpack.c.bf16 %v6857_v51, %v6856_v6 }
0x1d54   : > { %v9766_v39 = vpop.eup %9765  ;;  %v6642_v34 = vmul.f32 %v9764_v11, %v9760_v5  ;;  %9308 = vmatprep.subr.bf16.mxu1 %v9307_v40  ;;  %v6854_v5 = vld [vmem:[#allocation22 + $0x10] sm:$0xff]  ;;  %v9351_v11 = vpack.c.bf16 %v6875_v55, %v6874_v47 }
0x1d55   : > { %v6641_v38 = vmul.f32 %v9766_v39, %v9762_v59  ;;  %v6872_v59 = vld [vmem:[#allocation22 + $0xa0] sm:$0xff]  ;;  %v6858_v39 = vld [vmem:[#allocation22 + $0x30] sm:$0xff] }
0x1d56   : > { %v9347_v61 = vpack.c.bf16 %v6873_v26, %v6872_v59 }
0x1d57   : > { %8770 = vmatprep.mubr.msk.f32.mxu1 %vm1353_vm2, %v6641_v38  ;;  %v6859_v38 = vld [vmem:[#allocation22 + $0x38] sm:$0xff] }
0x1d58   : > { %8771 = vmatmul.mubr.msk.f32.vlgmr.msra.gmra.mrb[64].mxu1 %vm1353_vm2, %v6642_v34  ;;  %v6876_v34 = vld [vmem:[#allocation22 + $0xc0] sm:$0xff]  ;;  %v9353_v36 = vpack.c.bf16 %v6859_v38, %v6858_v39 }
0x1d59   : > { %9310 = vmatpush3.bf16.msra.mxu1 %v9307_v40  ;;  %v9355_v40 = vpack.c.bf16 %v6877_v22, %v6876_v34 }
0x1d5a   : > { %9312 = vmatprep.subr.bf16.mxu1 %v9311_v56 }
0x1d5d   : > { %9314 = vmatpush3.bf16.msra.mxu1 %v9311_v56  ;;  %v6861_v56 = vld [vmem:[#allocation22 + $0x48] sm:$0xff] }
0x1d5e   : > { %9316 = vmatprep.subr.bf16.mxu1 %v9315_v29 }
0x1d61   : > { %9318 = vmatpush3.bf16.msra.mxu1 %v9315_v29  ;;  %v9357_v29 = vpack.c.bf16 %v6861_v56, %v6860_v52 }
0x1d62   : > { %9320 = vmatprep.subr.bf16.mxu1 %v9319_v10 }
0x1d65   : > { %9322 = vmatpush3.bf16.msra.mxu1 %v9319_v10  ;;  %v6863_v10 = vld [vmem:[#allocation22 + $0x58] sm:$0xff] }
0x1d66   : > { %9324 = vmatprep.subr.bf16.mxu1 %v9323_v20 }
0x1d69   : > { %9326 = vmatpush3.bf16.msra.mxu1 %v9323_v20  ;;  %v9361_v20 = vpack.c.bf16 %v6863_v10, %v6862_v48  ;;  %v12074_v48 = vld [vmem:[#allocation69_spill] sm:$0xff] }
0x1d6a   : > { %9328 = vmatprep.subr.bf16.mxu1 %v9327_v53 }
0x1d6d   : > { %9330 = vmatpush3.bf16.msra.mxu1 %v9327_v53  ;;  %v6865_v53 = vld [vmem:[#allocation22 + $0x68] sm:$0xff] }
0x1d6e   : > { %9332 = vmatprep.subr.bf16.mxu1 %v9331_v30 }
0x1d71   : > { %9334 = vmatpush3.bf16.msra.mxu1 %v9331_v30  ;;  %v9365_v30 = vpack.c.bf16 %v6865_v53, %v6864_v41  ;;  %v7236_v41 = vld [vmem:[%s10581_s14 + $0x8] sm:$0xff] }
0x1d72   : > { %9336 = vmatprep.subr.bf16.mxu1 %v9335_v37 }
0x1d75   : > { %9338 = vmatpush3.bf16.msra.mxu1 %v9335_v37  ;;  %v9718_v37 = vpop.permute.xlu1 %9717 }
0x1d79   : > { %v7067_v38 = vpop.permute.xlu1 %7066 }
0x1d7d   : > { %v7069_v22 = vpop.permute.xlu1 %7068 }
0x1e2b   : > { %v8772_v60 = vpop.f32.mrb[64].mxu1 }
0x1e2c   : > { %v6721_v4 = vpop.f32.mrb[65].mxu1 }
0x1e2d   : > { %v9721_v35 = vpack.i.bf16 %v8772_v60, %v6721_v4  ;;  %v9715_v60 = vunpack.i.h.bf16 %v9713_v7  ;;  %v9714_v4 = vunpack.i.l.bf16 %v9713_v7 }
0x1e2f   : > { %9722 = vrot.lane.b32.xlu0 %v9721_v35, %s12064_s7  ;;  %v9720_v35 = vunpack.i.h.bf16 %v9718_v37  ;;  %v6754_v2 = vsel %vm5929_vm11, %v11732_v43, %v9714_v4 }
0x1e33   : > { %7074 = vrot.lane.b32.xlu0 %v10977_v50, %s10418_s10  ;;  %v9343_v50 = vpack.c.bf16 %v6871_v17, %v6870_v42 }
0x1e35   : > { %9344 = vmatprep.subr.bf16.mxu0 %v9343_v50 }
0x1e37   : > { %7076 = vrot.lane.b32.xlu0 %v10975_v49, %s10418_s10  ;;  %v6855_v49 = vld [vmem:[#allocation22 + $0x18] sm:$0xff] }
0x1e38   : > { %v9345_v31 = vpack.c.bf16 %v6855_v49, %v6854_v5  ;;  %v7153_v5 = vld [vmem:[%s12072_s5] sm:$0xff] }
0x1e3a   : > { %9346 = vmatpush3.bf16.msra.mxu0 %v9345_v31 }
0x1e3b   : > { %7084 = vrot.lane.b32.xlu0 %v12065_v44, %s10413_s26  ;;  %9348 = vmatprep.subr.bf16.mxu0 %v9347_v61  ;;  %v9719_v44 = vunpack.i.l.bf16 %v9718_v37  ;;  %s12076_s26 = sld [smem:[#allocation56_spill]] }
0x1e3d   : > { %v6756_v24 = vsel %vm2325_vm8, %v6754_v2, %v9719_v44 }
0x1e3e   : > { %9350 = vmatpush3.bf16.msra.mxu0 %v9349_v15 }
0x1e3f   : > { %7092 = vrot.lane.b32.xlu0 %v12066_v57, %s10414_s11  ;;  %9352 = vmatprep.subr.bf16.mxu0 %v9351_v11  ;;  %s12073_s11 = sld [smem:[#allocation45_spill]] }
0x1e42   : > { %9354 = vmatpush3.bf16.msra.mxu0 %v9353_v36  ;;  %v7083_v36 = vpop.permute.xlu1 %7082 }
0x1e43   : > { %7100 = vrot.lane.b32.xlu0 %v12067_v23, %s10415_s15  ;;  %s12070_s15 = smov 5   ;;  %9356 = vmatprep.subr.bf16.mxu0 %v9355_v40  ;;  %v6755_v23 = vsel %vm5929_vm11, %v11730_v25, %v9715_v60  ;;  %v6866_v25 = vld [vmem:[#allocation22 + $0x70] sm:$0xff] }
0x1e44   : > { %v6757_v8 = vsel %vm2325_vm8, %v6755_v23, %v9720_v35  ;;  %v9369_v50 = vpack.c.bf16 %v6867_v0, %v6866_v25  ;;  %vm7104_vm8 = vcmask 7168   ;;  %v12075_v35 = vld [vmem:[#allocation68_spill] sm:$0xff] }
0x1e45   : > { %v6968_v43 = vld [vmem:[%s12073_s11] sm:$0xff]  ;;  %v6969_v49 = vld [vmem:[%s12073_s11 + $0x8] sm:$0xff]  ;;  %v6970_v59 = vld [vmem:[%s12073_s11 + $0x10] sm:$0xff] }
0x1e46   : > { %9358 = vmatpush3.bf16.msra.mxu0 %v9357_v29  ;;  %v9371_v26 = vpack.c.bf16 %v6969_v49, %v6968_v43  ;;  %v6972_v61 = vld [vmem:[%s12073_s11 + $0x20] sm:$0xff]  ;;  %v6973_v6 = vld [vmem:[%s12073_s11 + $0x28] sm:$0xff]  ;;  %v6974_v47 = vld [vmem:[%s12073_s11 + $0x30] sm:$0xff]  ;;  %v7091_v52 = vpop.permute.xlu1 %7090 }
0x1e47   : > { %7124 = vrot.lane.b32.xlu0 %v12068_v12, %s12063_s28  ;;  %9360 = vmatprep.subr.bf16.mxu0 %v9359_v33  ;;  %v6971_v12 = vld [vmem:[%s12073_s11 + $0x18] sm:$0xff]  ;;  %v9379_v51 = vpack.c.bf16 %v6973_v6, %v6972_v61  ;;  %v6976_v15 = vld [vmem:[%s12073_s11 + $0x40] sm:$0xff]  ;;  %v6977_v11 = vld [vmem:[%s12073_s11 + $0x48] sm:$0xff]  ;;  %s1206_s28 = sand.u32 1, %s10343_s1  }
0x1e48   : > { %v9375_v31 = vpack.c.bf16 %v6971_v12, %v6970_v59  ;;  %9372 = vmatprep.subr.bf16.mxu1 %v9371_v26  ;;  %v6975_v55 = vld [vmem:[%s12073_s11 + $0x38] sm:$0xff]  ;;  %v9387_v39 = vpack.c.bf16 %v6977_v11, %v6976_v15  ;;  %v6978_v25 = vld [vmem:[%s12073_s11 + $0x50] sm:$0xff]  ;;  %v6981_v43 = vld [vmem:[%s12073_s11 + $0x68] sm:$0xff]  ;;  %s11896_s3 = scalar_lea.sflag [#allocation4], %s1206_s28 }
0x1e49   : > { %v6979_v0 = vld [vmem:[%s12073_s11 + $0x58] sm:$0xff]  ;;  %v6982_v59 = vld [vmem:[%s12073_s11 + $0x70] sm:$0xff]  ;;  %v7973_v61 = vld [vmem:[%s12076_s26] ss:$0 sm:$0xff] }
0x1e4a   : > { %9362 = vmatpush3.bf16.msra.mxu0 %v9361_v20  ;;  %v7099_v14 = vpop.permute.xlu1 %7098 }
0x1e4b   : > { %7132 = vrot.lane.b32.xlu0 %v12069_v21, %s10416_s2  ;;  %9364 = vmatprep.subr.bf16.mxu0 %v9363_v46  ;;  %v9383_v21 = vpack.c.bf16 %v6975_v55, %v6974_v47  ;;  %v7235_v46 = vld [vmem:[%s10581_s14] sm:$0xff]  ;;  %s7828_s2 = sshll.u32 %s1206_s28, 4 }
0x1e4c   : > { %v9403_v7 = vpack.c.bf16 %v7236_v41, %v7235_v46  ;;  %s1208_s10 = scalar_lea.vmem [#allocation29], %s7828_s2 }
0x1e4d   : > { %s7532_s7 = sshll.u32 %s1208_s10, 4  ;;  %s11891_s7 = int_to_ptr.vmem [resolvable:$true] %s7532_s7 }
0x1e4e   : > { %9366 = vmatpush3.bf16.msra.mxu0 %v9365_v30  ;;  %v7123_v58 = vpop.permute.xlu1 %7122  ;;  %s10253_s4 = scalar_lea.vmem %s11891_s7, 256 }
0x1e4f   : > { %7140 = vrot.lane.b32.xlu0 %v12071_v63, %s12070_s15  ;;  %9368 = vmatprep.subr.bf16.mxu0 %v9367_v62  ;;  %s7991_s15 = sshll.u32 %s10614_s0, 8  ;;  %p10254_p12 = scmp.ne.s32.totalorder %s11891_s7, %s10253_s4 }
0x1e50   : > { %s11894_s26 = scalar_lea.hbm %s10591_s27, %s7991_s15  ;;  %s10420_s0 = smov [#allocation29]  }
0x1e51   : > { %p10255_p2 = pnand %p10254_p12, %p12077_p1  ;;  %s10257_s2 = sshll.u32 %s10420_s0, 4  ;;  %s10258_s2 = int_to_ptr.vmem [resolvable:$false] %s10257_s2 }
0x1e52   : > { %9370 = vmatpush3.bf16.msra.mxu0 %v9369_v50  ;;  %v7131_v13 = vpop.permute.xlu1 %7130  ;;  %v9391_v50 = vpack.c.bf16 %v6979_v0, %v6978_v25  ;;  %s10259_s5 = scalar_lea.vmem %s10258_s2, 512  ;;  %p10260_p4 = scmp.lt.s32.totalorder %s11891_s7, %s10258_s2 }
0x1e53   : > { %8843 = vmatprep.subr.mxu0 %v7153_v5  ;;  %p10256_p3 = pneg %p10255_p2  ;;  %p10261_p7 = scmp.lt.s32.totalorder %s10259_s5, %s10253_s4 }
0x1e55   : > { %p10262_p8 = por %p10261_p7, %p10260_p4 }
0x1e57   : > { %p10263_p11 = pnand %p10262_p8, %p10256_p3 }
0x1ea1   : > { %v9723_v57 = vpop.permute.xlu0 %9722 }
0x1ea2   : > { %v9725_v45 = vunpack.i.h.bf16 %v9723_v57  ;;  %v9724_v3 = vunpack.i.l.bf16 %v9723_v57 }
0x1ea4   : > { %v6759_v42 = vsel %vm6758_vm14, %v6756_v24, %v9724_v3  ;;  %v6760_v17 = vsel %vm6758_vm14, %v6757_v8, %v9725_v45  ;;  %v7139_v45 = vpop.permute.xlu1 %7138 }
0x1ea5   : > { %8805 = vmatprep.mubr.f32.mxu1 %v6759_v42  ;;  %v7075_v34 = vpop.permute.xlu0 %7074 }
0x1ea6   : > { %8806 = vmatmul.mubr.f32.vlgmr.msra.gmra.mrb[66].mxu1 %v6760_v17  ;;  %v7105_v9 = vsel %vm7104_vm8, %v7067_v38, %v7075_v34 }
0x1ea7   : > { %9374 = vmatpush3.bf16.msra.mxu1 %v9371_v26  ;;  %v7108_v29 = vsel %vm7107_vm15, %v7105_v9, %v7083_v36  ;;  %v6983_v26 = vld [vmem:[%s12073_s11 + $0x78] sm:$0xff] }
0x1ea8   : > { %9376 = vmatprep.subr.bf16.mxu1 %v9375_v31  ;;  %v7110_v10 = vsel %vm1218_vm0, %v7108_v29, %v12074_v48  ;;  %v9399_v12 = vpack.c.bf16 %v6983_v26, %v6982_v59 }
0x1ea9   : > { %v7077_v63 = vpop.permute.xlu0 %7076  ;;  %v7113_v19 = vsel %vm7112_vm1, %v7110_v10, %v7091_v52  ;;  %v7974_v52 = vld [vmem:[#allocation14] ss:$0 sm:$0xff] }
0x1eaa   : > { %v7116_v53 = vsel %vm7115_vm4, %v7113_v19, %v7099_v14  ;;  %v7106_v30 = vsel %vm7104_vm8, %v7069_v22, %v7077_v63 }
0x1eab   : > { %9378 = vmatpush3.bf16.msra.mxu1 %v9375_v31  ;;  %v7144_v4 = vsel %vm2631_vm10, %v7116_v53, %v7123_v58  ;;  %v7118_v16 = vsel %vm2631_vm10, %v7116_v53, 0.0 }
0x1eac   : > { %9380 = vmatprep.subr.bf16.mxu1 %v9379_v51  ;;  %v7146_v57 = vsel %vm2634_vm13, %v7144_v4, %v7131_v13 }
0x1ead   : > { %v7085_v40 = vpop.permute.xlu0 %7084  ;;  %v7148_v2 = vsel %vm2228_vm3, %v7146_v57, %v7139_v45 }
0x1eae   : > { %v7109_v37 = vsel %vm7107_vm15, %v7106_v30, %v7085_v40 }
0x1eaf   : > { %9382 = vmatpush3.bf16.msra.mxu1 %v9379_v51  ;;  %v7111_v44 = vsel %vm1218_vm0, %v7109_v37, %v12075_v35  ;;  %v10419_v37 = vmov 1  }
0x1eb0   : > { %9384 = vmatprep.subr.bf16.mxu1 %v9383_v21  ;;  %9726 = vset.pattern.permute.xlu0 %v10419_v37 }
0x1eb1   : > { %v7093_v56 = vpop.permute.xlu0 %7092 }
0x1eb2   : > { %v7114_v23 = vsel %vm7112_vm1, %v7111_v44, %v7093_v56 }
0x1eb3   : > { %9386 = vmatpush3.bf16.msra.mxu1 %v9383_v21 }
0x1eb4   : > { %9388 = vmatprep.subr.bf16.mxu1 %v9387_v39 }
0x1eb5   : > { %v7101_v33 = vpop.permute.xlu0 %7100 }
0x1eb6   : > { %v7117_v3 = vsel %vm7115_vm4, %v7114_v23, %v7101_v33 }
0x1eb7   : > { %9390 = vmatpush3.bf16.msra.mxu1 %v9387_v39  ;;  %v7119_v8 = vsel %vm2631_vm10, %v7117_v3, 0.0 }
0x1eb8   : > { %9392 = vmatprep.subr.bf16.mxu1 %v9391_v50 }
0x1eb9   : > { %v7125_v20 = vpop.permute.xlu0 %7124 }
0x1eba   : > { %v7145_v24 = vsel %vm2631_vm10, %v7117_v3, %v7125_v20 }
0x1ebb   : > { %9394 = vmatpush3.bf16.msra.mxu1 %v9391_v50 }
0x1ebd   : > { %v7133_v60 = vpop.permute.xlu0 %7132 }
0x1ebe   : > { %v7147_v42 = vsel %vm2634_vm13, %v7145_v24, %v7133_v60 }
0x1f79   : > { %v8807_v27 = vpop.f32.mrb[66].mxu1 }
0x1f7a   : > { %v6843_v62 = vpop.f32.mrb[67].mxu1 }
0x1f7b   : > { %6955 = vmatprep.mubr.f32.mxu0 %v6843_v62 }
0x1f7c   : > { %6956 = vmatmul.mubr.f32.vlgmr.msra.gmra.mrb[84].mxu0 %v2603_v1  ;;  %v7141_v1 = vpop.permute.xlu0 %7140 }
0x1f7d   : > { %6960 = vmatprep.mubr.f32.mxu0 %v8807_v27  ;;  %8844 = vmatpush3.msra.mxu0 %v7153_v5  ;;  %v7149_v32 = vsel %vm2228_vm3, %v7147_v42, %v7141_v1  ;;  %v6980_v5 = vld [vmem:[%s12073_s11 + $0x60] sm:$0xff] }
0x1f7e   : > { %9404 = vmatprep.subr.bf16.mxu0 %v9403_v7  ;;  %v7152_v17 = vsel %vm7150_vm5, %v7149_v32, 0.0  ;;  %v9395_v49 = vpack.c.bf16 %v6981_v43, %v6980_v5 }
0x1f80   : > { %6961 = vmatmul.mubr.f32.gmra.mrb[86].mxu0 %v2604_v54  ;;  %v7151_v54 = vsel %vm7150_vm5, %v7148_v2, 0.0  ;;  %9396 = vmatprep.subr.bf16.mxu1 %v9395_v49 }
0x1f81   : > { %8845 = vmatprep.mubr.msk.f32.mxu0 %vm2228_vm3, %v7118_v16  ;;  %9398 = vmatpush3.bf16.msra.mxu1 %v9395_v49 }
0x1f82   : > { %9400 = vmatprep.subr.bf16.mxu1 %v9399_v12 }
0x1f84   : > { %8846 = vmatmul.mubr.msk.f32.vlgmr.msra.gmra.mrb[88].mxu0 %vm2228_vm3, %v7119_v8 }
0x1f85   : > { %9406 = vmatpush3.bf16.msra.mxu0 %v9403_v7  ;;  %8852 = vmatprep.mubr.msk.f32.mxu0 %vm1353_vm2, %v7151_v54 }
0x1f86   : > { %9402 = vmatpush3.bf16.msra.mxu1 %v9399_v12 }
0x1f88   : > { %8853 = vmatmul.mubr.msk.f32.vlgmr.msra.gmra.mrb[90].mxu0 %vm1353_vm2, %v7152_v17 }
0x204f   : > { %v8337_v31 = vpop.f32.mrb[84].mxu0 }
0x2050   : > { %v8338_v6 = vpop.f32.mrb[85].mxu0 }
0x2051   : > { %v8339_v51 = vadd.f32 %v8338_v6, %v8337_v31 }
0x2053   : > { %v6958_v47 = vadd.f32 %v8339_v51, %v7973_v61  ;;  %v8340_v55 = vpop.f32.mrb[86].mxu0 }
0x2054   : > { %v8341_v21 = vpop.f32.mrb[87].mxu0 }
0x2055   : > { %v6966_v15 = vmax.f32 %v6958_v47, 0.0  ;;  %v8342_v11 = vadd.f32 %v8341_v21, %v8340_v55 }
0x2057   : > { %v6963_v39 = vadd.f32 %v8342_v11, %v7973_v61  ;;  %8840 = vmatprep.mubr.f32.mxu1 %v6966_v15  ;;  %v8847_v38 = vpop.f32.mrb[88].mxu0 }
0x2058   : > { %v7226_v34 = vpop.f32.mrb[89].mxu0 }
0x2059   : > { %v6967_v22 = vmax.f32 %v6963_v39, 0.0  ;;  %8859 = vmatprep.mubr.msk.f32.mxu0 %vm5929_vm11, %v7226_v34 }
0x205b   : > { %8841 = vmatmul.mubr.f32.vlgmr.msra.gmra.mrb[68].mxu1 %v6967_v22  ;;  %v8854_v63 = vpop.f32.mrb[90].mxu0 }
0x205c   : > { %v7309_v36 = vpop.f32.mrb[91].mxu0 }
0x205d   : > { %v9407_v40 = vpack.c.bf16 %v8854_v63, %v7309_v36 }
0x205f   : > { %9409 = vmatprep.subr.msk.bf16.mxu0 %vm11698_vm12, %v9407_v40 }
0x2060   : > { %9412 = vmatpush3.bf16.xpose.msk.msra.mxu0 %vm11698_vm12, %v9407_v40 }
0x2067   : > { %8860 = vmatmul.mubr.msk.f32.vlgmr.msra.gmra.mrb[92].mxu0 %vm5929_vm11, %v8847_v38 }
0x212e   : > { %v8842_v56 = vpop.f32.mrb[68].mxu1 }
0x212f   : > { %v7063_v9 = vadd.f32 %v8842_v56, %v7974_v52  ;;  %v7057_v14 = vpop.f32.mrb[69].mxu1 }
0x2130   : > { %v7058_v29 = vadd.f32 %v7974_v52, %v7057_v14 }
0x2132   : > { %v9413_v33 = vpack.c.bf16 %v7063_v9, %v7058_v29 }
0x2134   : > { %9414 = vmatprep.subr.bf16.mxu0 %v9413_v33 }
0x2135   : > { %9416 = vmatpush3.bf16.msra.mxu0 %v9413_v33 }
0x213a   : > { %v8861_v48 = vpop.f32.mrb[92].mxu0 }
0x213b   : > { %v7396_v10 = vpop.f32.mrb[93].mxu0  ;;  %v7408_v58 = vsel %vm1353_vm2, %v8861_v48, -inf }
0x213c   : > { %7409 = vmax.xlane.f32.xlu0 %v7408_v58  ;;  %v7405_v19 = vsel %vm1353_vm2, %v7396_v10, -inf }
0x213d   : > { %7406 = vmax.xlane.f32.xlu1 %v7405_v19 }
0x21c9   : > { %v7410_v28 = vpop.xlane.xlu0 %7409 }
0x21ca   : > { %v7412_v20 = vsub.f32 %v8861_v48, %v7410_v28  ;;  %v7407_v46 = vpop.xlane.xlu1 %7406 }
0x21cb   : > { %v7411_v41 = vsub.f32 %v7396_v10, %v7407_v46 }
0x21cc   : > { %v7415_v53 = vmul.f32 1.442695, %v7412_v20 }
0x21cd   : > { %v7413_v27 = vmul.f32 1.442695, %v7411_v41 }
0x21ce   : > { %9767 = vpow2.f32 %v7415_v53 }
0x21cf   : > { %9769 = vpow2.f32 %v7413_v27 }
0x21d8   : > { %v9768_v13 = vpop.eup %9767 }
0x21d9   : > { %v9770_v30 = vpop.eup %9769  ;;  %v7420_v62 = vsel %vm1353_vm2, %v9768_v13, 0.0 }
0x21da   : > { %7421 = vadd.xlane.f32.xlu1 %v7420_v62  ;;  %v7417_v7 = vsel %vm1353_vm2, %v9770_v30, 0.0 }
0x21db   : > { %7418 = vadd.xlane.f32.xlu0 %v7417_v7 }
0x21f1   : > { %7509 = vperm.xlu0 %9726, %v11648_v18  }
0x2267   : > { %v7422_v60 = vpop.xlane.xlu1 %7421 }
0x2268   : > { %9771 = vrcp.f32 %v7422_v60  ;;  %v7419_v4 = vpop.xlane.xlu0 %7418 }
0x2269   : > { %9773 = vrcp.f32 %v7419_v4 }
0x2270   : > { %v7510_v45 = vpop.permute.xlu0 %7509 }
0x2272   : > { %v9772_v35 = vpop.eup %9771 }
0x2273   : > { %v9774_v44 = vpop.eup %9773  ;;  %v7426_v23 = vmul.f32 %v9772_v35, %v9768_v13 }
0x2274   : > { %v7425_v57 = vmul.f32 %v9774_v44, %v9770_v30 }
0x2276   : > { %8866 = vmatprep.mubr.msk.f32.mxu0 %vm1353_vm2, %v7425_v57 }
0x2277   : > { %8867 = vmatmul.mubr.msk.f32.vlgmr.msra.gmra.mrb[94].mxu0 %vm1353_vm2, %v7426_v23 }
0x234a   : > { %v8868_v3 = vpop.f32.mrb[94].mxu0 }
0x234b   : > { %v7513_v18 = vmul.f32 %v8868_v3, %v7510_v45  ;;  %v7499_v16 = vpop.f32.mrb[95].mxu0 }
0x234c   : > { %v7512_v1 = vmul.f32 %v7510_v45, %v7499_v16 }
0x234d   : > { %v7515_v2 = vadd.f32 %v7513_v18, %v7063_v9 }
0x234e   : > { %v7514_v24 = vadd.f32 %v7512_v1, %v7058_v29 }
0x234f   : > { %7517 = vst [vmem:[%s1208_s10 + $0x8] sm:$0xff] %v7515_v2 }
0x2350   : > { %7516 = vst [vmem:[%s1208_s10] sm:$0xff] %v7514_v24 }
0x2351   : > { %10266 = shalt.err (!%p10263_p11)
}
0x2352   : > { %s10267_s28 = scalar_lea.hbm %s11894_s26, 256  ;;  %s10271_s10 = scalar_lea.hbm %s10591_s27, 512 }
0x2353   : > { %p10268_p13 = scmp.ne.s32.totalorder %s11894_s26, %s10267_s28  ;;  %p10272_p5 = scmp.lt.u32.totalorder %s11894_s26, %s10591_s27 }
0x2354   : > { %p10273_p9 = scmp.lt.u32.totalorder %s10271_s10, %s10267_s28  ;;  %p10275_p12 = scmp.lt.u32.totalorder %s10267_s28, %s11894_s26 }
0x2355   : > { %p10269_p6 = pnand %p10268_p13, %p12077_p1 }
0x2356   : > { %p10274_p10 = por %p10273_p9, %p10272_p5 }
0x2357   : > { %p10270_p0 = pneg %p10269_p6 }
0x2358   : > { %p10276_p2 = por %p10275_p12, %p10274_p10 }
0x235a   : > { %p10277_p3 = pnand %p10276_p2, %p10270_p0 }
0x235c   : > { %10280 = shalt.err (!%p10277_p3)
}
0x235d   : > { %s10421_s5 = smov 128   ;;  %s10422_s4 = smov 8  }
0x235e   : > { %9485 = dma.vmem_to_hbm [thread:$0]  (%p12077_p1), %s11891_s7, 256, %s11894_s26, %s11896_s3, %s10421_s5, %s10421_s5, %s10422_s4  }
0x235f PF: > { %s12078_s15 = sld [smem:[#allocation63_spill]]  ;;  %s12079_s0 = sld [smem:[#allocation61_spill]] }
0x2360   : > { %s12080_s2 = sld [smem:[#allocation66_spill]] }
0x2365   : > { %p9577_p4 = scmp.ge.s32.totalorder %s12078_s15, 2  ;;  %s7547_s6 = sand.u32 1, %s12079_s0  }
0x2366   : > { %p12081_p7 = scmp.ne.s32.totalorder %s12080_s2, 0  ;;  %s7548_s28 = scalar_lea.sflag [#allocation4], %s7547_s6 }
0x2368   : > { %p9540_p8 = pnand %p9577_p4, %p12081_p7 }
0x236a   : > { %10334 = dma.done.wait (!%p9540_p8), %s7548_s28, 256  }
0x236b   : > { %10336 = vsyncadd (!%p9540_p8), %s7548_s28, 4294967040  ;;  %s12082_s7 = sld [smem:[#allocation64_spill]]  ;;  %s12083_s10 = sld [smem:[#allocation62_spill]] }
0x236c   : > { %s12084_s2 = sld [smem:[#allocation65_spill]]  ;;  %s12085_s28 = smov %s10343_s1 }
0x2371   : > { %p84_p11 = scmp.ge.s32.totalorder %s12082_s7, 4   ;;  %s12086_s1 = smov %s12083_s10 }
0x2373   :  { %86 = sbr.rel (!%p84_p11) target bundleno = 70 (0x46), region = 284 }
0x237a   :  { %7553 = vsyncpa [#allocation3], 1 }
0x237b   :  { %7555 = vsyncpa [#allocation3 + $0x1], 1 }
0x237c   :  { %7556 = vsyncpa [#allocation6], 1 }
0x237d   :  { %7557 = vsyncpa [#allocation9], 1 }
0x237e   :  { %7558 = vsyncpa [#allocation12], 1 }
0x237f   :  { %7559 = vsyncpa [#allocation15], 1 }
0x2380   :  { %7560 = vsyncpa [#allocation18], 1 }
0x2381   :  { %7561 = vsyncpa [#allocation21], 1 }
0x2382   :  { %7562 = vsyncpa [#allocation24], 1 }
0x2383   :  { %7563 = vsyncpa [#allocation27], 1 }
0x2384   :  { %7564 = vsyncpa [#allocation4], 1 }
0x2385   :  { %7566 = vsyncpa [#allocation4 + $0x1], 1 }

</bundles_post_ra>
